<compile_context>
chip_gen: v5e
topology: v5e:2x2
jax: 0.10.0
libtpu: 0.0.40
codegen_flags: <defaults>
</compile_context>

<pallas_src>
import jax
import jax.numpy as jnp
from jax.experimental import pallas as pl
from jax.experimental.pallas import tpu as pltpu


# ----------------------------------------------------------------------------
# Fused kernel
# ----------------------------------------------------------------------------
def _make_bottleneck_kernel(TH, W, H, PAD=8):
    THW = TH * W

    def kernel(x_tile_ref, x_hbm_ref,
               w1_ref, s1_ref, w2_ref, s2_ref, w3_ref, s3_ref,
               o_ref,
               mid_ref, acc_ref, halo_ref, sem):
        n = pl.program_id(0)
        t = pl.program_id(1)
        n_ht = H // TH
        Cmid = w1_ref.shape[1]

        # --------------------------------------------------------------
        # Kick off halo-row DMAs (rows h0-1 and h0+TH of this image).
        # The row index is clamped at image edges; the clamped fetch is
        # harmless because edge halos are zero-filled below.
        # --------------------------------------------------------------
        h0 = t * TH
        base = n * (H * W)
        top_row = jnp.maximum(h0 - 1, 0)
        bot_row = jnp.minimum(h0 + TH, H - 1)
        top_cp = pltpu.make_async_copy(
            x_hbm_ref.at[pl.ds(base + top_row * W, W), :],
            halo_ref.at[0], sem.at[0])
        bot_cp = pltpu.make_async_copy(
            x_hbm_ref.at[pl.ds(base + bot_row * W, W), :],
            halo_ref.at[1], sem.at[1])
        top_cp.start()
        bot_cp.start()

        w1 = w1_ref[...]
        s1 = s1_ref[...]

        def conv1(x_f32):  # 1x1 conv + bn1 (scale folded into w1) + relu
            y = jnp.dot(x_f32.astype(jnp.bfloat16), w1,
                        preferred_element_type=jnp.float32)
            return jnp.maximum(y + s1, 0.0)

        # Zero the guard padding of the mid slab (only read at masked taps).
        mid_ref[pl.ds(0, PAD), :] = jnp.zeros((PAD, Cmid), jnp.float32)
        mid_ref[pl.ds(PAD + (TH + 2) * W, PAD), :] = jnp.zeros(
            (PAD, Cmid), jnp.float32)

        # conv1 on the TH body rows (overlaps the halo DMAs above).
        mid_ref[pl.ds(PAD + W, THW), :] = conv1(x_tile_ref[...])

        # Halo rows of the mid slab: conv1 of the DMA'd rows, zeros at edges.
        top_cp.wait()
        bot_cp.wait()

        @pl.when(t == 0)
        def _():
            mid_ref[pl.ds(PAD, W), :] = jnp.zeros((W, Cmid), jnp.float32)

        @pl.when(t > 0)
        def _():
            mid_ref[pl.ds(PAD, W), :] = conv1(halo_ref[0])

        @pl.when(t == n_ht - 1)
        def _():
            mid_ref[pl.ds(PAD + (TH + 1) * W, W), :] = jnp.zeros(
                (W, Cmid), jnp.float32)

        @pl.when(t < n_ht - 1)
        def _():
            mid_ref[pl.ds(PAD + (TH + 1) * W, W), :] = conv1(halo_ref[1])

        # --------------------------------------------------------------
        # conv2: 3x3 as 9 shifted bf16 matmuls into an f32 VMEM accumulator.
        # Tap (dy, dx) for flat output index h*W+w needs mid flat index
        #   PAD + (h+dy)*W + (w+dx-1)  ==  (PAD + dy*W + dx - 1) + h*W + w,
        # i.e. a contiguous slice of the flat mid slab.  Column wrap at the
        # W edges (and the 1-element guard reads) is masked out.
        # --------------------------------------------------------------
        col = jax.lax.broadcasted_iota(jnp.int32, (THW, 1), 0) % W
        left_edge = col == 0
        right_edge = col == (W - 1)

        acc_ref[...] = jnp.zeros_like(acc_ref)
        for dy in range(3):
            for dx in range(3):
                start = PAD + dy * W + (dx - 1)
                tap = mid_ref[pl.ds(start, THW), :]
                if dx == 0:
                    tap = jnp.where(left_edge, 0.0, tap)
                elif dx == 2:
                    tap = jnp.where(right_edge, 0.0, tap)
                acc_ref[...] += jnp.dot(tap.astype(jnp.bfloat16),
                                        w2_ref[dy * 3 + dx],
                                        preferred_element_type=jnp.float32)

        # bn2 + relu, conv3 (1x1) + bn3 + residual + relu (epilogue in f32).
        mid2 = jnp.maximum(acc_ref[...] + s2_ref[...], 0.0).astype(jnp.bfloat16)
        y = jnp.dot(mid2, w3_ref[...], preferred_element_type=jnp.float32)
        y = y + s3_ref[...] + x_tile_ref[...]          # residual (Cin == Cout)
        o_ref[...] = jnp.maximum(y, 0.0).astype(o_ref.dtype)

    return kernel


# ----------------------------------------------------------------------------
# Wrapper
# ----------------------------------------------------------------------------
def bn_fold(gamma, beta, mean, var, eps=1e-5):
    scale = gamma / jnp.sqrt(var + eps)
    shift = beta - mean * scale
    return scale.reshape(1, -1), shift.reshape(1, -1)


def _pick_row_tile(H, W, max_rows=8):
    for cand in range(min(H, max_rows), 0, -1):
        if H % cand == 0 and (cand * W) % 8 == 0:
            return cand
    return H


def bottleneck_forward(x_nchw, p, th=None):
    N, Cin, H, W = x_nchw.shape
    Cmid = p["w1"].shape[1]
    Cout = p["w3"].shape[1]
    assert Cin == Cout, "stride=1/downsample=None requires inplanes == planes*4"

    # Fold BN scale into the conv weights (bf16 for the MXU); shifts stay f32.
    w1 = (p["w1"] * p["scale1"]).astype(jnp.bfloat16)              # (Cin, Cmid)
    w2 = (p["w2"] * p["scale2"]).reshape(9, Cmid, Cmid).astype(jnp.bfloat16)
    w3 = (p["w3"] * p["scale3"]).astype(jnp.bfloat16)              # (Cmid, Cout)
    s1 = p["shift1"].astype(jnp.float32)
    s2 = p["shift2"].astype(jnp.float32)
    s3 = p["shift3"].astype(jnp.float32)

    if th is None:
        th = _pick_row_tile(H, W)
    assert H % th == 0 and (th * W) % 8 == 0, (H, W, th)
    n_ht = H // th
    PAD = 8

    x2d = jnp.transpose(x_nchw, (0, 2, 3, 1)).reshape(N * H * W, Cin)

    kernel = _make_bottleneck_kernel(th, W, H, PAD)
    out2d = pl.pallas_call(
        kernel,
        out_shape=jax.ShapeDtypeStruct((N * H * W, Cout), x_nchw.dtype),
        grid=(N, n_ht),
        in_specs=[
            pl.BlockSpec((th * W, Cin), lambda n, t: (n * n_ht + t, 0)),
            pl.BlockSpec(memory_space=pl.ANY),        # same x, for halo DMAs
            pl.BlockSpec((Cin, Cmid), lambda n, t: (0, 0)),
            pl.BlockSpec((1, Cmid), lambda n, t: (0, 0)),
            pl.BlockSpec((9, Cmid, Cmid), lambda n, t: (0, 0, 0)),
            pl.BlockSpec((1, Cmid), lambda n, t: (0, 0)),
            pl.BlockSpec((Cmid, Cout), lambda n, t: (0, 0)),
            pl.BlockSpec((1, Cout), lambda n, t: (0, 0)),
        ],
        out_specs=pl.BlockSpec((th * W, Cout), lambda n, t: (n * n_ht + t, 0)),
        scratch_shapes=[
            pltpu.VMEM((2 * PAD + (th + 2) * W, Cmid), jnp.float32),  # mid slab
            pltpu.VMEM((th * W, Cmid), jnp.float32),                  # 3x3 acc
            pltpu.VMEM((2, W, Cin), jnp.float32),                     # halo rows
            pltpu.SemaphoreType.DMA((2,)),
        ],
        compiler_params=pltpu.CompilerParams(
            dimension_semantics=("parallel", "parallel")),
    )(x2d, x2d, w1, s1, w2, s2, w3, s3)

    out = out2d.reshape(N, H, W, Cout)
    return jnp.transpose(out, (0, 3, 1, 2))            # NHWC -> NCHW


# ----------------------------------------------------------------------------
# Pure-JAX f32 reference (correctness check)
# ----------------------------------------------------------------------------
def reference_forward(x_nchw, p):
    x = jnp.transpose(x_nchw, (0, 2, 3, 1))

    def conv(h, w_hwio, pad):
        return jax.lax.conv_general_dilated(
            h, w_hwio, (1, 1), [(pad, pad), (pad, pad)],
            dimension_numbers=("NHWC", "HWIO", "NHWC"))

    h = conv(x, p["w1"].reshape(1, 1, *p["w1"].shape), 0)
    h = jnp.maximum(h * p["scale1"][0] + p["shift1"][0], 0.0)
    h = conv(h, p["w2"], 1)
    h = jnp.maximum(h * p["scale2"][0] + p["shift2"][0], 0.0)
    h = conv(h, p["w3"].reshape(1, 1, *p["w3"].shape), 0)
    h = h * p["scale3"][0] + p["shift3"][0] + x
    h = jnp.maximum(h, 0.0)
    return jnp.transpose(h, (0, 3, 1, 2))


# ----------------------------------------------------------------------------
if __name__ == "__main__":
    # stride=1, downsample=None  =>  inplanes == planes * expansion
    N, inplanes, planes, H, W = 2, 128, 32, 16, 16
    expansion = 4
    cout = planes * expansion
    assert cout == inplanes

    key = jax.random.PRNGKey(0)
    ks = jax.random.split(key, 16)

    x = jax.random.normal(ks[0], (N, inplanes, H, W), jnp.float32)

    # Conv weights (matmul / HWIO layouts).
    w1 = jax.random.normal(ks[1], (inplanes, planes), jnp.float32) * 0.1
    w2 = jax.random.normal(ks[2], (3, 3, planes, planes), jnp.float32) * 0.1
    w3 = jax.random.normal(ks[3], (planes, cout), jnp.float32) * 0.1

    # BatchNorm (eval mode, running stats folded to scale/shift).
    def bn_params(kg, kb, km, kv, c):
        gamma = 1.0 + 0.1 * jax.random.normal(kg, (c,), jnp.float32)
        beta = 0.1 * jax.random.normal(kb, (c,), jnp.float32)
        mean = 0.1 * jax.random.normal(km, (c,), jnp.float32)
        var = 1.0 + 0.5 * jax.random.uniform(kv, (c,), jnp.float32)
        return bn_fold(gamma, beta, mean, var)

    scale1, shift1 = bn_params(ks[4], ks[5], ks[6], ks[7], planes)
    scale2, shift2 = bn_params(ks[8], ks[9], ks[10], ks[11], planes)
    scale3, shift3 = bn_params(ks[12], ks[13], ks[14], ks[15], cout)

    params = dict(w1=w1, w2=w2, w3=w3,
                  scale1=scale1, shift1=shift1,
                  scale2=scale2, shift2=shift2,
                  scale3=scale3, shift3=shift3)

    out = jax.block_until_ready(bottleneck_forward(x, params))
    ref = jax.block_until_ready(reference_forward(x, params))

    assert out.shape == (N, cout, H, W), out.shape
    err = float(jnp.max(jnp.abs(out - ref)))
    # bf16 MXU matmuls vs a pure-f32 reference: allow a few percent.
    assert jnp.allclose(out, ref, rtol=5e-2, atol=1e-1), f"max abs err {err}"

    print("KERNEL_OK")
</pallas_src>

<mosaic_0001>
module attributes {stable_mosaic.version = 11 : i64} {
  func.func @kernel(%arg0: i32, %arg1: i32, %arg2: memref<128x128xf32, #tpu.memory_space<vmem>>, %arg3: memref<512x128xf32, #tpu.memory_space<any>>, %arg4: memref<128x32xbf16, #tpu.memory_space<vmem>>, %arg5: memref<1x32xf32, #tpu.memory_space<vmem>>, %arg6: memref<9x32x32xbf16, #tpu.memory_space<vmem>>, %arg7: memref<1x32xf32, #tpu.memory_space<vmem>>, %arg8: memref<32x128xbf16, #tpu.memory_space<vmem>>, %arg9: memref<1x128xf32, #tpu.memory_space<vmem>>, %arg10: memref<128x128xf32, #tpu.memory_space<vmem>>, %arg11: memref<176x32xf32, #tpu.memory_space<vmem>>, %arg12: memref<128x32xf32, #tpu.memory_space<vmem>>, %arg13: memref<2x16x128xf32, #tpu.memory_space<vmem>>, %arg14: memref<2x!tpu.dma_semaphore, #tpu.memory_space<semaphore_mem>>) attributes {dimension_semantics = [#tpu.dimension_semantics<parallel>, #tpu.dimension_semantics<parallel>], iteration_bounds = array<i64: 2, 2>, scalar_prefetch = 0 : i64, scratch_operands = 4 : i64, tpu.core_type = #tpu.core_type<tc>, window_params = [{transform_indices = @transform_0, window_bounds = array<i64: 128, 128>}, {}, {pipeline_mode = #tpu.pipeline_mode<synchronous>, transform_indices = @transform_2, window_bounds = array<i64: 128, 32>}, {pipeline_mode = #tpu.pipeline_mode<synchronous>, transform_indices = @transform_3, window_bounds = array<i64: 1, 32>}, {pipeline_mode = #tpu.pipeline_mode<synchronous>, transform_indices = @transform_4, window_bounds = array<i64: 9, 32, 32>}, {pipeline_mode = #tpu.pipeline_mode<synchronous>, transform_indices = @transform_5, window_bounds = array<i64: 1, 32>}, {pipeline_mode = #tpu.pipeline_mode<synchronous>, transform_indices = @transform_6, window_bounds = array<i64: 32, 128>}, {pipeline_mode = #tpu.pipeline_mode<synchronous>, transform_indices = @transform_7, window_bounds = array<i64: 1, 128>}, {transform_indices = @transform_8, window_bounds = array<i64: 128, 128>}]} {
    %c8_i32 = arith.constant 8 : i32
    %0 = arith.muli %arg1, %c8_i32 : i32
    %c256_i32 = arith.constant 256 : i32
    %1 = arith.muli %arg0, %c256_i32 : i32
    %c1_i32 = arith.constant 1 : i32
    %2 = arith.subi %0, %c1_i32 : i32
    %c0_i32 = arith.constant 0 : i32
    %3 = arith.maxsi %2, %c0_i32 : i32
    %c8_i32_0 = arith.constant 8 : i32
    %4 = arith.addi %0, %c8_i32_0 : i32
    %c15_i32 = arith.constant 15 : i32
    %5 = arith.minsi %4, %c15_i32 : i32
    %c16_i32 = arith.constant 16 : i32
    %6 = arith.muli %3, %c16_i32 : i32
    %7 = arith.addi %1, %6 : i32
    %c16_i32_1 = arith.constant 16 : i32
    %8 = arith.muli %5, %c16_i32_1 : i32
    %9 = arith.addi %1, %8 : i32
    %c0_i32_2 = arith.constant 0 : i32
    %c0_i32_3 = arith.constant 0 : i32
    %c0_i32_4 = arith.constant 0 : i32
    %10 = tpu.memref_slice %arg3[%7, %c0_i32_4] : memref<512x128xf32, #tpu.memory_space<any>> -> memref<16x128xf32, #tpu.memory_space<any>>
    %c0_i32_5 = arith.constant 0 : i32
    %c0_i32_6 = arith.constant 0 : i32
    %11 = tpu.memref_slice %arg13[%c0_i32_2, %c0_i32_5, %c0_i32_6] : memref<2x16x128xf32, #tpu.memory_space<vmem>> -> memref<1x16x128xf32, #tpu.memory_space<vmem>>
    %12 = tpu.memref_squeeze %11 : memref<1x16x128xf32, #tpu.memory_space<vmem>> -> memref<16x128xf32, #tpu.memory_space<vmem>>
    %13 = tpu.memref_slice %arg14[%c0_i32_3] : memref<2x!tpu.dma_semaphore, #tpu.memory_space<semaphore_mem>> -> memref<1x!tpu.dma_semaphore, #tpu.memory_space<semaphore_mem>>
    %14 = tpu.memref_squeeze %13 : memref<1x!tpu.dma_semaphore, #tpu.memory_space<semaphore_mem>> -> memref<!tpu.dma_semaphore, #tpu.memory_space<semaphore_mem>>
    tpu.enqueue_dma source(%10 : memref<16x128xf32, #tpu.memory_space<any>>) target(%12 : memref<16x128xf32, #tpu.memory_space<vmem>>) target_semaphore(%14 : memref<!tpu.dma_semaphore, #tpu.memory_space<semaphore_mem>>)
    %c1_i32_7 = arith.constant 1 : i32
    %c1_i32_8 = arith.constant 1 : i32
    %c0_i32_9 = arith.constant 0 : i32
    %15 = tpu.memref_slice %arg3[%9, %c0_i32_9] : memref<512x128xf32, #tpu.memory_space<any>> -> memref<16x128xf32, #tpu.memory_space<any>>
    %c0_i32_10 = arith.constant 0 : i32
    %c0_i32_11 = arith.constant 0 : i32
    %16 = tpu.memref_slice %arg13[%c1_i32_7, %c0_i32_10, %c0_i32_11] : memref<2x16x128xf32, #tpu.memory_space<vmem>> -> memref<1x16x128xf32, #tpu.memory_space<vmem>>
    %17 = tpu.memref_squeeze %16 : memref<1x16x128xf32, #tpu.memory_space<vmem>> -> memref<16x128xf32, #tpu.memory_space<vmem>>
    %18 = tpu.memref_slice %arg14[%c1_i32_8] : memref<2x!tpu.dma_semaphore, #tpu.memory_space<semaphore_mem>> -> memref<1x!tpu.dma_semaphore, #tpu.memory_space<semaphore_mem>>
    %19 = tpu.memref_squeeze %18 : memref<1x!tpu.dma_semaphore, #tpu.memory_space<semaphore_mem>> -> memref<!tpu.dma_semaphore, #tpu.memory_space<semaphore_mem>>
    tpu.enqueue_dma source(%15 : memref<16x128xf32, #tpu.memory_space<any>>) target(%17 : memref<16x128xf32, #tpu.memory_space<vmem>>) target_semaphore(%19 : memref<!tpu.dma_semaphore, #tpu.memory_space<semaphore_mem>>)
    %c0 = arith.constant 0 : index
    %c0_12 = arith.constant 0 : index
    %20 = vector.load %arg4[%c0, %c0_12] : memref<128x32xbf16, #tpu.memory_space<vmem>>, vector<128x32xbf16>
    %c0_13 = arith.constant 0 : index
    %c0_14 = arith.constant 0 : index
    %21 = vector.load %arg5[%c0_13, %c0_14] : memref<1x32xf32, #tpu.memory_space<vmem>>, vector<1x32xf32>
    %cst = arith.constant 0.000000e+00 : f32
    %22 = vector.broadcast %cst : f32 to vector<8x32xf32>
    %c0_15 = arith.constant 0 : index
    %c0_16 = arith.constant 0 : index
    %23 = vector.load %arg11[%c0_15, %c0_16] : memref<176x32xf32, #tpu.memory_space<vmem>>, vector<8x32xf32>
    tpu.vector_store %arg11[%c0_15, %c0_16], %22 {strides = array<i32>} : memref<176x32xf32, #tpu.memory_space<vmem>>, vector<8x32xf32>,
    %cst_17 = arith.constant 0.000000e+00 : f32
    %24 = vector.broadcast %cst_17 : f32 to vector<8x32xf32>
    %c168 = arith.constant 168 : index
    %c0_18 = arith.constant 0 : index
    %25 = vector.load %arg11[%c168, %c0_18] : memref<176x32xf32, #tpu.memory_space<vmem>>, vector<8x32xf32>
    tpu.vector_store %arg11[%c168, %c0_18], %24 {strides = array<i32>} : memref<176x32xf32, #tpu.memory_space<vmem>>, vector<8x32xf32>,
    %c0_19 = arith.constant 0 : index
    %c0_20 = arith.constant 0 : index
    %26 = vector.load %arg2[%c0_19, %c0_20] : memref<128x128xf32, #tpu.memory_space<vmem>>, vector<128x128xf32>
    %27 = arith.truncf %26 : vector<128x128xf32> to vector<128x128xbf16>
    %cst_21 = arith.constant dense<0.000000e+00> : vector<128x32xf32>
    %28 = tpu.matmul %27, %20, %cst_21 {dimension_numbers = #tpu.dot_dimension_numbers<[1], [0], [0], [1], [0, 0, 1, 1], [], []>} : vector<128x128xbf16>, vector<128x32xbf16>, vector<128x32xf32> -> vector<128x32xf32>
    %29 = vector.broadcast %21 : vector<1x32xf32> to vector<128x32xf32>
    %30 = arith.addf %28, %29 : vector<128x32xf32>
    %cst_22 = arith.constant 0.000000e+00 : f32
    %31 = vector.broadcast %cst_22 : f32 to vector<128x32xf32>
    %32 = arith.maximumf %30, %31 : vector<128x32xf32>
    %c24 = arith.constant 24 : index
    %c0_23 = arith.constant 0 : index
    %33 = vector.load %arg11[%c24, %c0_23] : memref<176x32xf32, #tpu.memory_space<vmem>>, vector<128x32xf32>
    tpu.vector_store %arg11[%c24, %c0_23], %32 {strides = array<i32>} : memref<176x32xf32, #tpu.memory_space<vmem>>, vector<128x32xf32>,
    %c0_i32_24 = arith.constant 0 : i32
    %c0_i32_25 = arith.constant 0 : i32
    %c0_i32_26 = arith.constant 0 : i32
    %34 = tpu.memref_slice %arg3[%7, %c0_i32_26] : memref<512x128xf32, #tpu.memory_space<any>> -> memref<16x128xf32, #tpu.memory_space<any>>
    %c0_i32_27 = arith.constant 0 : i32
    %c0_i32_28 = arith.constant 0 : i32
    %35 = tpu.memref_slice %arg13[%c0_i32_24, %c0_i32_27, %c0_i32_28] : memref<2x16x128xf32, #tpu.memory_space<vmem>> -> memref<1x16x128xf32, #tpu.memory_space<vmem>>
    %36 = tpu.memref_squeeze %35 : memref<1x16x128xf32, #tpu.memory_space<vmem>> -> memref<16x128xf32, #tpu.memory_space<vmem>>
    %37 = tpu.memref_slice %arg14[%c0_i32_25] : memref<2x!tpu.dma_semaphore, #tpu.memory_space<semaphore_mem>> -> memref<1x!tpu.dma_semaphore, #tpu.memory_space<semaphore_mem>>
    %38 = tpu.memref_squeeze %37 : memref<1x!tpu.dma_semaphore, #tpu.memory_space<semaphore_mem>> -> memref<!tpu.dma_semaphore, #tpu.memory_space<semaphore_mem>>
    tpu.wait_dma2 semaphore(%38 : memref<!tpu.dma_semaphore, #tpu.memory_space<semaphore_mem>>) src(%34 : memref<16x128xf32, #tpu.memory_space<any>>) dst(%36 : memref<16x128xf32, #tpu.memory_space<vmem>>)
    %c1_i32_29 = arith.constant 1 : i32
    %c1_i32_30 = arith.constant 1 : i32
    %c0_i32_31 = arith.constant 0 : i32
    %39 = tpu.memref_slice %arg3[%9, %c0_i32_31] : memref<512x128xf32, #tpu.memory_space<any>> -> memref<16x128xf32, #tpu.memory_space<any>>
    %c0_i32_32 = arith.constant 0 : i32
    %c0_i32_33 = arith.constant 0 : i32
    %40 = tpu.memref_slice %arg13[%c1_i32_29, %c0_i32_32, %c0_i32_33] : memref<2x16x128xf32, #tpu.memory_space<vmem>> -> memref<1x16x128xf32, #tpu.memory_space<vmem>>
    %41 = tpu.memref_squeeze %40 : memref<1x16x128xf32, #tpu.memory_space<vmem>> -> memref<16x128xf32, #tpu.memory_space<vmem>>
    %42 = tpu.memref_slice %arg14[%c1_i32_30] : memref<2x!tpu.dma_semaphore, #tpu.memory_space<semaphore_mem>> -> memref<1x!tpu.dma_semaphore, #tpu.memory_space<semaphore_mem>>
    %43 = tpu.memref_squeeze %42 : memref<1x!tpu.dma_semaphore, #tpu.memory_space<semaphore_mem>> -> memref<!tpu.dma_semaphore, #tpu.memory_space<semaphore_mem>>
    tpu.wait_dma2 semaphore(%43 : memref<!tpu.dma_semaphore, #tpu.memory_space<semaphore_mem>>) src(%39 : memref<16x128xf32, #tpu.memory_space<any>>) dst(%41 : memref<16x128xf32, #tpu.memory_space<vmem>>)
    %c0_i32_34 = arith.constant 0 : i32
    %44 = arith.cmpi eq, %arg1, %c0_i32_34 : i32
    %45 = arith.extui %44 : i1 to i32
    %c0_i32_35 = arith.constant 0 : i32
    %46 = arith.cmpi ne, %45, %c0_i32_35 : i32
    scf.if %46 {
      %cst_150 = arith.constant 0.000000e+00 : f32
      %192 = vector.broadcast %cst_150 : f32 to vector<16x32xf32>
      %c8_151 = arith.constant 8 : index
      %c0_152 = arith.constant 0 : index
      %193 = vector.load %arg11[%c8_151, %c0_152] : memref<176x32xf32, #tpu.memory_space<vmem>>, vector<16x32xf32>
      tpu.vector_store %arg11[%c8_151, %c0_152], %192 {strides = array<i32>} : memref<176x32xf32, #tpu.memory_space<vmem>>, vector<16x32xf32>,
    } else {
    }
    %c0_i32_36 = arith.constant 0 : i32
    %47 = arith.cmpi sgt, %arg1, %c0_i32_36 : i32
    %48 = arith.extui %47 : i1 to i32
    %c0_i32_37 = arith.constant 0 : i32
    %49 = arith.cmpi ne, %48, %c0_i32_37 : i32
    scf.if %49 {
      %c0_150 = arith.constant 0 : index
      %c0_151 = arith.constant 0 : index
      %c0_152 = arith.constant 0 : index
      %192 = vector.load %arg13[%c0_150, %c0_151, %c0_152] : memref<2x16x128xf32, #tpu.memory_space<vmem>>, vector<1x16x128xf32>
      %193 = vector.shape_cast %192 : vector<1x16x128xf32> to vector<16x128xf32>
      %194 = arith.truncf %193 : vector<16x128xf32> to vector<16x128xbf16>
      %cst_153 = arith.constant dense<0.000000e+00> : vector<16x32xf32>
      %195 = tpu.matmul %194, %20, %cst_153 {dimension_numbers = #tpu.dot_dimension_numbers<[1], [0], [0], [1], [0, 0, 1, 1], [], []>} : vector<16x128xbf16>, vector<128x32xbf16>, vector<16x32xf32> -> vector<16x32xf32>
      %196 = vector.broadcast %21 : vector<1x32xf32> to vector<16x32xf32>
      %197 = arith.addf %195, %196 : vector<16x32xf32>
      %cst_154 = arith.constant 0.000000e+00 : f32
      %198 = vector.broadcast %cst_154 : f32 to vector<16x32xf32>
      %199 = arith.maximumf %197, %198 : vector<16x32xf32>
      %c8_155 = arith.constant 8 : index
      %c0_156 = arith.constant 0 : index
      %200 = vector.load %arg11[%c8_155, %c0_156] : memref<176x32xf32, #tpu.memory_space<vmem>>, vector<16x32xf32>
      tpu.vector_store %arg11[%c8_155, %c0_156], %199 {strides = array<i32>} : memref<176x32xf32, #tpu.memory_space<vmem>>, vector<16x32xf32>,
    } else {
    }
    %c1_i32_38 = arith.constant 1 : i32
    %50 = arith.cmpi eq, %arg1, %c1_i32_38 : i32
    %51 = arith.extui %50 : i1 to i32
    %c0_i32_39 = arith.constant 0 : i32
    %52 = arith.cmpi ne, %51, %c0_i32_39 : i32
    scf.if %52 {
      %cst_150 = arith.constant 0.000000e+00 : f32
      %192 = vector.broadcast %cst_150 : f32 to vector<16x32xf32>
      %c152 = arith.constant 152 : index
      %c0_151 = arith.constant 0 : index
      %193 = vector.load %arg11[%c152, %c0_151] : memref<176x32xf32, #tpu.memory_space<vmem>>, vector<16x32xf32>
      tpu.vector_store %arg11[%c152, %c0_151], %192 {strides = array<i32>} : memref<176x32xf32, #tpu.memory_space<vmem>>, vector<16x32xf32>,
    } else {
    }
    %c1_i32_40 = arith.constant 1 : i32
    %53 = arith.cmpi slt, %arg1, %c1_i32_40 : i32
    %54 = arith.extui %53 : i1 to i32
    %c0_i32_41 = arith.constant 0 : i32
    %55 = arith.cmpi ne, %54, %c0_i32_41 : i32
    scf.if %55 {
      %c1_150 = arith.constant 1 : index
      %c0_151 = arith.constant 0 : index
      %c0_152 = arith.constant 0 : index
      %192 = vector.load %arg13[%c1_150, %c0_151, %c0_152] : memref<2x16x128xf32, #tpu.memory_space<vmem>>, vector<1x16x128xf32>
      %193 = vector.shape_cast %192 : vector<1x16x128xf32> to vector<16x128xf32>
      %194 = arith.truncf %193 : vector<16x128xf32> to vector<16x128xbf16>
      %cst_153 = arith.constant dense<0.000000e+00> : vector<16x32xf32>
      %195 = tpu.matmul %194, %20, %cst_153 {dimension_numbers = #tpu.dot_dimension_numbers<[1], [0], [0], [1], [0, 0, 1, 1], [], []>} : vector<16x128xbf16>, vector<128x32xbf16>, vector<16x32xf32> -> vector<16x32xf32>
      %196 = vector.broadcast %21 : vector<1x32xf32> to vector<16x32xf32>
      %197 = arith.addf %195, %196 : vector<16x32xf32>
      %cst_154 = arith.constant 0.000000e+00 : f32
      %198 = vector.broadcast %cst_154 : f32 to vector<16x32xf32>
      %199 = arith.maximumf %197, %198 : vector<16x32xf32>
      %c152 = arith.constant 152 : index
      %c0_155 = arith.constant 0 : index
      %200 = vector.load %arg11[%c152, %c0_155] : memref<176x32xf32, #tpu.memory_space<vmem>>, vector<16x32xf32>
      tpu.vector_store %arg11[%c152, %c0_155], %199 {strides = array<i32>} : memref<176x32xf32, #tpu.memory_space<vmem>>, vector<16x32xf32>,
    } else {
    }
    %56 = tpu.iota {dimensions = array<i32: 0>} : vector<128x1xi32>
    %c16_i32_42 = arith.constant 16 : i32
    %c0_i32_43 = arith.constant 0 : i32
    %57 = arith.cmpi eq, %c16_i32_42, %c0_i32_43 : i32
    %c1_i32_44 = arith.constant 1 : i32
    %58 = arith.select %57, %c1_i32_44, %c16_i32_42 : i32
    %59 = vector.broadcast %58 : i32 to vector<128x1xi32>
    %60 = arith.remsi %56, %59 : vector<128x1xi32>
    %c0_i32_45 = arith.constant 0 : i32
    %61 = vector.broadcast %c0_i32_45 : i32 to vector<128x1xi32>
    %62 = arith.cmpi ne, %60, %61 : vector<128x1xi32>
    %c0_i32_46 = arith.constant 0 : i32
    %63 = vector.broadcast %c0_i32_46 : i32 to vector<128x1xi32>
    %64 = arith.cmpi slt, %60, %63 : vector<128x1xi32>
    %c0_i32_47 = arith.constant 0 : i32
    %65 = arith.cmpi slt, %58, %c0_i32_47 : i32
    %66 = vector.broadcast %65 : i1 to vector<128x1xi1>
    %67 = vector.broadcast %66 : vector<128x1xi1> to vector<128x1xi1>
    %68 = arith.xori %64, %67 : vector<128x1xi1>
    %69 = arith.andi %68, %62 : vector<128x1xi1>
    %70 = vector.broadcast %58 : i32 to vector<128x1xi32>
    %71 = arith.addi %60, %70 : vector<128x1xi32>
    %72 = arith.select %69, %71, %60 : vector<128x1xi1>, vector<128x1xi32>
    %c0_i32_48 = arith.constant 0 : i32
    %73 = vector.broadcast %c0_i32_48 : i32 to vector<128x1xi32>
    %74 = arith.cmpi eq, %72, %73 : vector<128x1xi32>
    %c15_i32_49 = arith.constant 15 : i32
    %75 = vector.broadcast %c15_i32_49 : i32 to vector<128x1xi32>
    %76 = arith.cmpi eq, %72, %75 : vector<128x1xi32>
    %cst_50 = arith.constant 0.000000e+00 : f32
    %77 = vector.broadcast %cst_50 : f32 to vector<128x32xf32>
    %c0_51 = arith.constant 0 : index
    %c0_52 = arith.constant 0 : index
    %78 = vector.load %arg12[%c0_51, %c0_52] : memref<128x32xf32, #tpu.memory_space<vmem>>, vector<128x32xf32>
    tpu.vector_store %arg12[%c0_51, %c0_52], %77 {strides = array<i32>} : memref<128x32xf32, #tpu.memory_space<vmem>>, vector<128x32xf32>,
    %c7 = arith.constant 7 : index
    %c0_53 = arith.constant 0 : index
    %79 = vector.load %arg11[%c7, %c0_53] : memref<176x32xf32, #tpu.memory_space<vmem>>, vector<128x32xf32>
    %cst_54 = arith.constant 0.000000e+00 : f32
    %80 = vector.shape_cast %74 : vector<128x1xi1> to vector<128x1xi1>
    %81 = vector.broadcast %80 : vector<128x1xi1> to vector<128x32xi1>
    %82 = vector.broadcast %cst_54 : f32 to vector<128x32xf32>
    %83 = arith.select %81, %82, %79 : vector<128x32xi1>, vector<128x32xf32>
    %c0_55 = arith.constant 0 : index
    %c0_56 = arith.constant 0 : index
    %84 = vector.load %arg12[%c0_55, %c0_56] : memref<128x32xf32, #tpu.memory_space<vmem>>, vector<128x32xf32>
    %85 = arith.truncf %83 : vector<128x32xf32> to vector<128x32xbf16>
    %c0_57 = arith.constant 0 : index
    %c0_58 = arith.constant 0 : index
    %c0_59 = arith.constant 0 : index
    %86 = vector.load %arg6[%c0_57, %c0_58, %c0_59] : memref<9x32x32xbf16, #tpu.memory_space<vmem>>, vector<1x32x32xbf16>
    %87 = vector.shape_cast %86 : vector<1x32x32xbf16> to vector<32x32xbf16>
    %cst_60 = arith.constant dense<0.000000e+00> : vector<128x32xf32>
    %88 = tpu.matmul %85, %87, %cst_60 {dimension_numbers = #tpu.dot_dimension_numbers<[1], [0], [0], [1], [0, 0, 1, 1], [], []>} : vector<128x32xbf16>, vector<32x32xbf16>, vector<128x32xf32> -> vector<128x32xf32>
    %89 = arith.addf %84, %88 : vector<128x32xf32>
    %c0_61 = arith.constant 0 : index
    %c0_62 = arith.constant 0 : index
    %90 = vector.load %arg12[%c0_61, %c0_62] : memref<128x32xf32, #tpu.memory_space<vmem>>, vector<128x32xf32>
    tpu.vector_store %arg12[%c0_61, %c0_62], %89 {strides = array<i32>} : memref<128x32xf32, #tpu.memory_space<vmem>>, vector<128x32xf32>,
    %c8 = arith.constant 8 : index
    %c0_63 = arith.constant 0 : index
    %91 = vector.load %arg11[%c8, %c0_63] : memref<176x32xf32, #tpu.memory_space<vmem>>, vector<128x32xf32>
    %c0_64 = arith.constant 0 : index
    %c0_65 = arith.constant 0 : index
    %92 = vector.load %arg12[%c0_64, %c0_65] : memref<128x32xf32, #tpu.memory_space<vmem>>, vector<128x32xf32>
    %93 = arith.truncf %91 : vector<128x32xf32> to vector<128x32xbf16>
    %c1 = arith.constant 1 : index
    %c0_66 = arith.constant 0 : index
    %c0_67 = arith.constant 0 : index
    %94 = vector.load %arg6[%c1, %c0_66, %c0_67] : memref<9x32x32xbf16, #tpu.memory_space<vmem>>, vector<1x32x32xbf16>
    %95 = vector.shape_cast %94 : vector<1x32x32xbf16> to vector<32x32xbf16>
    %cst_68 = arith.constant dense<0.000000e+00> : vector<128x32xf32>
    %96 = tpu.matmul %93, %95, %cst_68 {dimension_numbers = #tpu.dot_dimension_numbers<[1], [0], [0], [1], [0, 0, 1, 1], [], []>} : vector<128x32xbf16>, vector<32x32xbf16>, vector<128x32xf32> -> vector<128x32xf32>
    %97 = arith.addf %92, %96 : vector<128x32xf32>
    %c0_69 = arith.constant 0 : index
    %c0_70 = arith.constant 0 : index
    %98 = vector.load %arg12[%c0_69, %c0_70] : memref<128x32xf32, #tpu.memory_space<vmem>>, vector<128x32xf32>
    tpu.vector_store %arg12[%c0_69, %c0_70], %97 {strides = array<i32>} : memref<128x32xf32, #tpu.memory_space<vmem>>, vector<128x32xf32>,
    %c9 = arith.constant 9 : index
    %c0_71 = arith.constant 0 : index
    %99 = vector.load %arg11[%c9, %c0_71] : memref<176x32xf32, #tpu.memory_space<vmem>>, vector<128x32xf32>
    %cst_72 = arith.constant 0.000000e+00 : f32
    %100 = vector.shape_cast %76 : vector<128x1xi1> to vector<128x1xi1>
    %101 = vector.broadcast %100 : vector<128x1xi1> to vector<128x32xi1>
    %102 = vector.broadcast %cst_72 : f32 to vector<128x32xf32>
    %103 = arith.select %101, %102, %99 : vector<128x32xi1>, vector<128x32xf32>
    %c0_73 = arith.constant 0 : index
    %c0_74 = arith.constant 0 : index
    %104 = vector.load %arg12[%c0_73, %c0_74] : memref<128x32xf32, #tpu.memory_space<vmem>>, vector<128x32xf32>
    %105 = arith.truncf %103 : vector<128x32xf32> to vector<128x32xbf16>
    %c2 = arith.constant 2 : index
    %c0_75 = arith.constant 0 : index
    %c0_76 = arith.constant 0 : index
    %106 = vector.load %arg6[%c2, %c0_75, %c0_76] : memref<9x32x32xbf16, #tpu.memory_space<vmem>>, vector<1x32x32xbf16>
    %107 = vector.shape_cast %106 : vector<1x32x32xbf16> to vector<32x32xbf16>
    %cst_77 = arith.constant dense<0.000000e+00> : vector<128x32xf32>
    %108 = tpu.matmul %105, %107, %cst_77 {dimension_numbers = #tpu.dot_dimension_numbers<[1], [0], [0], [1], [0, 0, 1, 1], [], []>} : vector<128x32xbf16>, vector<32x32xbf16>, vector<128x32xf32> -> vector<128x32xf32>
    %109 = arith.addf %104, %108 : vector<128x32xf32>
    %c0_78 = arith.constant 0 : index
    %c0_79 = arith.constant 0 : index
    %110 = vector.load %arg12[%c0_78, %c0_79] : memref<128x32xf32, #tpu.memory_space<vmem>>, vector<128x32xf32>
    tpu.vector_store %arg12[%c0_78, %c0_79], %109 {strides = array<i32>} : memref<128x32xf32, #tpu.memory_space<vmem>>, vector<128x32xf32>,
    %c23 = arith.constant 23 : index
    %c0_80 = arith.constant 0 : index
    %111 = vector.load %arg11[%c23, %c0_80] : memref<176x32xf32, #tpu.memory_space<vmem>>, vector<128x32xf32>
    %cst_81 = arith.constant 0.000000e+00 : f32
    %112 = vector.shape_cast %74 : vector<128x1xi1> to vector<128x1xi1>
    %113 = vector.broadcast %112 : vector<128x1xi1> to vector<128x32xi1>
    %114 = vector.broadcast %cst_81 : f32 to vector<128x32xf32>
    %115 = arith.select %113, %114, %111 : vector<128x32xi1>, vector<128x32xf32>
    %c0_82 = arith.constant 0 : index
    %c0_83 = arith.constant 0 : index
    %116 = vector.load %arg12[%c0_82, %c0_83] : memref<128x32xf32, #tpu.memory_space<vmem>>, vector<128x32xf32>
    %117 = arith.truncf %115 : vector<128x32xf32> to vector<128x32xbf16>
    %c3 = arith.constant 3 : index
    %c0_84 = arith.constant 0 : index
    %c0_85 = arith.constant 0 : index
    %118 = vector.load %arg6[%c3, %c0_84, %c0_85] : memref<9x32x32xbf16, #tpu.memory_space<vmem>>, vector<1x32x32xbf16>
    %119 = vector.shape_cast %118 : vector<1x32x32xbf16> to vector<32x32xbf16>
    %cst_86 = arith.constant dense<0.000000e+00> : vector<128x32xf32>
    %120 = tpu.matmul %117, %119, %cst_86 {dimension_numbers = #tpu.dot_dimension_numbers<[1], [0], [0], [1], [0, 0, 1, 1], [], []>} : vector<128x32xbf16>, vector<32x32xbf16>, vector<128x32xf32> -> vector<128x32xf32>
    %121 = arith.addf %116, %120 : vector<128x32xf32>
    %c0_87 = arith.constant 0 : index
    %c0_88 = arith.constant 0 : index
    %122 = vector.load %arg12[%c0_87, %c0_88] : memref<128x32xf32, #tpu.memory_space<vmem>>, vector<128x32xf32>
    tpu.vector_store %arg12[%c0_87, %c0_88], %121 {strides = array<i32>} : memref<128x32xf32, #tpu.memory_space<vmem>>, vector<128x32xf32>,
    %c24_89 = arith.constant 24 : index
    %c0_90 = arith.constant 0 : index
    %123 = vector.load %arg11[%c24_89, %c0_90] : memref<176x32xf32, #tpu.memory_space<vmem>>, vector<128x32xf32>
    %c0_91 = arith.constant 0 : index
    %c0_92 = arith.constant 0 : index
    %124 = vector.load %arg12[%c0_91, %c0_92] : memref<128x32xf32, #tpu.memory_space<vmem>>, vector<128x32xf32>
    %125 = arith.truncf %123 : vector<128x32xf32> to vector<128x32xbf16>
    %c4 = arith.constant 4 : index
    %c0_93 = arith.constant 0 : index
    %c0_94 = arith.constant 0 : index
    %126 = vector.load %arg6[%c4, %c0_93, %c0_94] : memref<9x32x32xbf16, #tpu.memory_space<vmem>>, vector<1x32x32xbf16>
    %127 = vector.shape_cast %126 : vector<1x32x32xbf16> to vector<32x32xbf16>
    %cst_95 = arith.constant dense<0.000000e+00> : vector<128x32xf32>
    %128 = tpu.matmul %125, %127, %cst_95 {dimension_numbers = #tpu.dot_dimension_numbers<[1], [0], [0], [1], [0, 0, 1, 1], [], []>} : vector<128x32xbf16>, vector<32x32xbf16>, vector<128x32xf32> -> vector<128x32xf32>
    %129 = arith.addf %124, %128 : vector<128x32xf32>
    %c0_96 = arith.constant 0 : index
    %c0_97 = arith.constant 0 : index
    %130 = vector.load %arg12[%c0_96, %c0_97] : memref<128x32xf32, #tpu.memory_space<vmem>>, vector<128x32xf32>
    tpu.vector_store %arg12[%c0_96, %c0_97], %129 {strides = array<i32>} : memref<128x32xf32, #tpu.memory_space<vmem>>, vector<128x32xf32>,
    %c25 = arith.constant 25 : index
    %c0_98 = arith.constant 0 : index
    %131 = vector.load %arg11[%c25, %c0_98] : memref<176x32xf32, #tpu.memory_space<vmem>>, vector<128x32xf32>
    %cst_99 = arith.constant 0.000000e+00 : f32
    %132 = vector.shape_cast %76 : vector<128x1xi1> to vector<128x1xi1>
    %133 = vector.broadcast %132 : vector<128x1xi1> to vector<128x32xi1>
    %134 = vector.broadcast %cst_99 : f32 to vector<128x32xf32>
    %135 = arith.select %133, %134, %131 : vector<128x32xi1>, vector<128x32xf32>
    %c0_100 = arith.constant 0 : index
    %c0_101 = arith.constant 0 : index
    %136 = vector.load %arg12[%c0_100, %c0_101] : memref<128x32xf32, #tpu.memory_space<vmem>>, vector<128x32xf32>
    %137 = arith.truncf %135 : vector<128x32xf32> to vector<128x32xbf16>
    %c5 = arith.constant 5 : index
    %c0_102 = arith.constant 0 : index
    %c0_103 = arith.constant 0 : index
    %138 = vector.load %arg6[%c5, %c0_102, %c0_103] : memref<9x32x32xbf16, #tpu.memory_space<vmem>>, vector<1x32x32xbf16>
    %139 = vector.shape_cast %138 : vector<1x32x32xbf16> to vector<32x32xbf16>
    %cst_104 = arith.constant dense<0.000000e+00> : vector<128x32xf32>
    %140 = tpu.matmul %137, %139, %cst_104 {dimension_numbers = #tpu.dot_dimension_numbers<[1], [0], [0], [1], [0, 0, 1, 1], [], []>} : vector<128x32xbf16>, vector<32x32xbf16>, vector<128x32xf32> -> vector<128x32xf32>
    %141 = arith.addf %136, %140 : vector<128x32xf32>
    %c0_105 = arith.constant 0 : index
    %c0_106 = arith.constant 0 : index
    %142 = vector.load %arg12[%c0_105, %c0_106] : memref<128x32xf32, #tpu.memory_space<vmem>>, vector<128x32xf32>
    tpu.vector_store %arg12[%c0_105, %c0_106], %141 {strides = array<i32>} : memref<128x32xf32, #tpu.memory_space<vmem>>, vector<128x32xf32>,
    %c39 = arith.constant 39 : index
    %c0_107 = arith.constant 0 : index
    %143 = vector.load %arg11[%c39, %c0_107] : memref<176x32xf32, #tpu.memory_space<vmem>>, vector<128x32xf32>
    %cst_108 = arith.constant 0.000000e+00 : f32
    %144 = vector.shape_cast %74 : vector<128x1xi1> to vector<128x1xi1>
    %145 = vector.broadcast %144 : vector<128x1xi1> to vector<128x32xi1>
    %146 = vector.broadcast %cst_108 : f32 to vector<128x32xf32>
    %147 = arith.select %145, %146, %143 : vector<128x32xi1>, vector<128x32xf32>
    %c0_109 = arith.constant 0 : index
    %c0_110 = arith.constant 0 : index
    %148 = vector.load %arg12[%c0_109, %c0_110] : memref<128x32xf32, #tpu.memory_space<vmem>>, vector<128x32xf32>
    %149 = arith.truncf %147 : vector<128x32xf32> to vector<128x32xbf16>
    %c6 = arith.constant 6 : index
    %c0_111 = arith.constant 0 : index
    %c0_112 = arith.constant 0 : index
    %150 = vector.load %arg6[%c6, %c0_111, %c0_112] : memref<9x32x32xbf16, #tpu.memory_space<vmem>>, vector<1x32x32xbf16>
    %151 = vector.shape_cast %150 : vector<1x32x32xbf16> to vector<32x32xbf16>
    %cst_113 = arith.constant dense<0.000000e+00> : vector<128x32xf32>
    %152 = tpu.matmul %149, %151, %cst_113 {dimension_numbers = #tpu.dot_dimension_numbers<[1], [0], [0], [1], [0, 0, 1, 1], [], []>} : vector<128x32xbf16>, vector<32x32xbf16>, vector<128x32xf32> -> vector<128x32xf32>
    %153 = arith.addf %148, %152 : vector<128x32xf32>
    %c0_114 = arith.constant 0 : index
    %c0_115 = arith.constant 0 : index
    %154 = vector.load %arg12[%c0_114, %c0_115] : memref<128x32xf32, #tpu.memory_space<vmem>>, vector<128x32xf32>
    tpu.vector_store %arg12[%c0_114, %c0_115], %153 {strides = array<i32>} : memref<128x32xf32, #tpu.memory_space<vmem>>, vector<128x32xf32>,
    %c40 = arith.constant 40 : index
    %c0_116 = arith.constant 0 : index
    %155 = vector.load %arg11[%c40, %c0_116] : memref<176x32xf32, #tpu.memory_space<vmem>>, vector<128x32xf32>
    %c0_117 = arith.constant 0 : index
    %c0_118 = arith.constant 0 : index
    %156 = vector.load %arg12[%c0_117, %c0_118] : memref<128x32xf32, #tpu.memory_space<vmem>>, vector<128x32xf32>
    %157 = arith.truncf %155 : vector<128x32xf32> to vector<128x32xbf16>
    %c7_119 = arith.constant 7 : index
    %c0_120 = arith.constant 0 : index
    %c0_121 = arith.constant 0 : index
    %158 = vector.load %arg6[%c7_119, %c0_120, %c0_121] : memref<9x32x32xbf16, #tpu.memory_space<vmem>>, vector<1x32x32xbf16>
    %159 = vector.shape_cast %158 : vector<1x32x32xbf16> to vector<32x32xbf16>
    %cst_122 = arith.constant dense<0.000000e+00> : vector<128x32xf32>
    %160 = tpu.matmul %157, %159, %cst_122 {dimension_numbers = #tpu.dot_dimension_numbers<[1], [0], [0], [1], [0, 0, 1, 1], [], []>} : vector<128x32xbf16>, vector<32x32xbf16>, vector<128x32xf32> -> vector<128x32xf32>
    %161 = arith.addf %156, %160 : vector<128x32xf32>
    %c0_123 = arith.constant 0 : index
    %c0_124 = arith.constant 0 : index
    %162 = vector.load %arg12[%c0_123, %c0_124] : memref<128x32xf32, #tpu.memory_space<vmem>>, vector<128x32xf32>
    tpu.vector_store %arg12[%c0_123, %c0_124], %161 {strides = array<i32>} : memref<128x32xf32, #tpu.memory_space<vmem>>, vector<128x32xf32>,
    %c41 = arith.constant 41 : index
    %c0_125 = arith.constant 0 : index
    %163 = vector.load %arg11[%c41, %c0_125] : memref<176x32xf32, #tpu.memory_space<vmem>>, vector<128x32xf32>
    %cst_126 = arith.constant 0.000000e+00 : f32
    %164 = vector.shape_cast %76 : vector<128x1xi1> to vector<128x1xi1>
    %165 = vector.broadcast %164 : vector<128x1xi1> to vector<128x32xi1>
    %166 = vector.broadcast %cst_126 : f32 to vector<128x32xf32>
    %167 = arith.select %165, %166, %163 : vector<128x32xi1>, vector<128x32xf32>
    %c0_127 = arith.constant 0 : index
    %c0_128 = arith.constant 0 : index
    %168 = vector.load %arg12[%c0_127, %c0_128] : memref<128x32xf32, #tpu.memory_space<vmem>>, vector<128x32xf32>
    %169 = arith.truncf %167 : vector<128x32xf32> to vector<128x32xbf16>
    %c8_129 = arith.constant 8 : index
    %c0_130 = arith.constant 0 : index
    %c0_131 = arith.constant 0 : index
    %170 = vector.load %arg6[%c8_129, %c0_130, %c0_131] : memref<9x32x32xbf16, #tpu.memory_space<vmem>>, vector<1x32x32xbf16>
    %171 = vector.shape_cast %170 : vector<1x32x32xbf16> to vector<32x32xbf16>
    %cst_132 = arith.constant dense<0.000000e+00> : vector<128x32xf32>
    %172 = tpu.matmul %169, %171, %cst_132 {dimension_numbers = #tpu.dot_dimension_numbers<[1], [0], [0], [1], [0, 0, 1, 1], [], []>} : vector<128x32xbf16>, vector<32x32xbf16>, vector<128x32xf32> -> vector<128x32xf32>
    %173 = arith.addf %168, %172 : vector<128x32xf32>
    %c0_133 = arith.constant 0 : index
    %c0_134 = arith.constant 0 : index
    %174 = vector.load %arg12[%c0_133, %c0_134] : memref<128x32xf32, #tpu.memory_space<vmem>>, vector<128x32xf32>
    tpu.vector_store %arg12[%c0_133, %c0_134], %173 {strides = array<i32>} : memref<128x32xf32, #tpu.memory_space<vmem>>, vector<128x32xf32>,
    %c0_135 = arith.constant 0 : index
    %c0_136 = arith.constant 0 : index
    %175 = vector.load %arg12[%c0_135, %c0_136] : memref<128x32xf32, #tpu.memory_space<vmem>>, vector<128x32xf32>
    %c0_137 = arith.constant 0 : index
    %c0_138 = arith.constant 0 : index
    %176 = vector.load %arg7[%c0_137, %c0_138] : memref<1x32xf32, #tpu.memory_space<vmem>>, vector<1x32xf32>
    %177 = vector.broadcast %176 : vector<1x32xf32> to vector<128x32xf32>
    %178 = arith.addf %175, %177 : vector<128x32xf32>
    %cst_139 = arith.constant 0.000000e+00 : f32
    %179 = vector.broadcast %cst_139 : f32 to vector<128x32xf32>
    %180 = arith.maximumf %178, %179 : vector<128x32xf32>
    %181 = arith.truncf %180 : vector<128x32xf32> to vector<128x32xbf16>
    %c0_140 = arith.constant 0 : index
    %c0_141 = arith.constant 0 : index
    %182 = vector.load %arg8[%c0_140, %c0_141] : memref<32x128xbf16, #tpu.memory_space<vmem>>, vector<32x128xbf16>
    %cst_142 = arith.constant dense<0.000000e+00> : vector<128x128xf32>
    %183 = tpu.matmul %181, %182, %cst_142 {dimension_numbers = #tpu.dot_dimension_numbers<[1], [0], [0], [1], [0, 0, 1, 1], [], []>} : vector<128x32xbf16>, vector<32x128xbf16>, vector<128x128xf32> -> vector<128x128xf32>
    %c0_143 = arith.constant 0 : index
    %c0_144 = arith.constant 0 : index
    %184 = vector.load %arg9[%c0_143, %c0_144] : memref<1x128xf32, #tpu.memory_space<vmem>>, vector<1x128xf32>
    %185 = vector.broadcast %184 : vector<1x128xf32> to vector<128x128xf32>
    %186 = arith.addf %183, %185 : vector<128x128xf32>
    %c0_145 = arith.constant 0 : index
    %c0_146 = arith.constant 0 : index
    %187 = vector.load %arg2[%c0_145, %c0_146] : memref<128x128xf32, #tpu.memory_space<vmem>>, vector<128x128xf32>
    %188 = arith.addf %186, %187 : vector<128x128xf32>
    %cst_147 = arith.constant 0.000000e+00 : f32
    %189 = vector.broadcast %cst_147 : f32 to vector<128x128xf32>
    %190 = arith.maximumf %188, %189 : vector<128x128xf32>
    %c0_148 = arith.constant 0 : index
    %c0_149 = arith.constant 0 : index
    %191 = vector.load %arg10[%c0_148, %c0_149] : memref<128x128xf32, #tpu.memory_space<vmem>>, vector<128x128xf32>
    tpu.vector_store %arg10[%c0_148, %c0_149], %190 {strides = array<i32>} : memref<128x128xf32, #tpu.memory_space<vmem>>, vector<128x128xf32>,
    return
  }
  func.func @transform_0(%arg0: i32, %arg1: i32) -> (i32, i32) {
    %c2_i32 = arith.constant 2 : i32
    %0 = arith.muli %arg0, %c2_i32 : i32
    %1 = arith.addi %0, %arg1 : i32
    %c0_i32 = arith.constant 0 : i32
    %c0_i32_0 = arith.constant 0 : i32
    return %1, %c0_i32 : i32, i32
  }
  func.func @transform_2(%arg0: i32, %arg1: i32) -> (i32, i32) {
    %c0_i32 = arith.constant 0 : i32
    %c0_i32_0 = arith.constant 0 : i32
    %c0_i32_1 = arith.constant 0 : i32
    return %c0_i32, %c0_i32_0 : i32, i32
  }
  func.func @transform_3(%arg0: i32, %arg1: i32) -> (i32, i32) {
    %c0_i32 = arith.constant 0 : i32
    %c0_i32_0 = arith.constant 0 : i32
    %c0_i32_1 = arith.constant 0 : i32
    return %c0_i32, %c0_i32_0 : i32, i32
  }
  func.func @transform_4(%arg0: i32, %arg1: i32) -> (i32, i32, i32) {
    %c0_i32 = arith.constant 0 : i32
    %c0_i32_0 = arith.constant 0 : i32
    %c0_i32_1 = arith.constant 0 : i32
    %c0_i32_2 = arith.constant 0 : i32
    return %c0_i32, %c0_i32_0, %c0_i32_1 : i32, i32, i32
  }
  func.func @transform_5(%arg0: i32, %arg1: i32) -> (i32, i32) {
    %c0_i32 = arith.constant 0 : i32
    %c0_i32_0 = arith.constant 0 : i32
    %c0_i32_1 = arith.constant 0 : i32
    return %c0_i32, %c0_i32_0 : i32, i32
  }
  func.func @transform_6(%arg0: i32, %arg1: i32) -> (i32, i32) {
    %c0_i32 = arith.constant 0 : i32
    %c0_i32_0 = arith.constant 0 : i32
    %c0_i32_1 = arith.constant 0 : i32
    return %c0_i32, %c0_i32_0 : i32, i32
  }
  func.func @transform_7(%arg0: i32, %arg1: i32) -> (i32, i32) {
    %c0_i32 = arith.constant 0 : i32
    %c0_i32_0 = arith.constant 0 : i32
    %c0_i32_1 = arith.constant 0 : i32
    return %c0_i32, %c0_i32_0 : i32, i32
  }
  func.func @transform_8(%arg0: i32, %arg1: i32) -> (i32, i32) {
    %c2_i32 = arith.constant 2 : i32
    %0 = arith.muli %arg0, %c2_i32 : i32
    %1 = arith.addi %0, %arg1 : i32
    %c0_i32 = arith.constant 0 : i32
    %c0_i32_0 = arith.constant 0 : i32
    return %1, %c0_i32 : i32, i32
  }
}

</mosaic_0001>

<bundles_post_ra>
// kernel: tpu_custom_call.1
= control target key start
LH: loop header
LB: loop body
LE: loop exit
PB: predicated region body
PF: predicated region fallthrough
CT: control target
= control target key end

     0   :  { %s4620_s0 = inlined_call_operand.hbm [shape: f32[512,128], index: 0, kind: input, shape index: {}]   ;;  %s4621_s1 = inlined_call_operand.hbm [shape: f32[512,128], index: 1, kind: input, shape index: {}]   ;;  %s4622_s2 = inlined_call_operand.vmem [shape: bf16[128,32], index: 2, kind: input, shape index: {}]   ;;  %s4623_s3 = inlined_call_operand.vmem [shape: f32[1,32], index: 3, kind: input, shape index: {}]   ;;  %s4624_s4 = inlined_call_operand.hbm [shape: bf16[9,32,32], index: 4, kind: input, shape index: {}]   ;;  %s4625_s5 = inlined_call_operand.vmem [shape: f32[1,32], index: 5, kind: input, shape index: {}]   ;;  %s4626_s6 = inlined_call_operand.vmem [shape: bf16[32,128], index: 6, kind: input, shape index: {}]   ;;  %s4627_s7 = inlined_call_operand.vmem [shape: f32[1,128], index: 7, kind: input, shape index: {}]   ;;  %s4628_s8 = inlined_call_operand.hbm [shape: f32[512,128], index: 8, kind: output, shape index: {}]  }
   0x1   :  { %4639 = sst [smem:[#allocation30_spill]] %s4624_s4 }
   0x2   :  { %4640 = sst [smem:[#allocation31_spill]] %s4625_s5 }
   0x3   :  { %4641 = sst [smem:[#allocation32_spill]] %s4627_s7 }
   0x4   :  { %4642 = sst [smem:[#allocation33_spill]] %s4628_s8 }
   0x5   :  { %13 = vsyncpa [#allocation7], 0 }
   0x6   :  { %15 = vsyncpa [#allocation7 + $0x1], 0 }
   0x7   :  { %16 = vsyncpa [#allocation10], 0 }
   0x8   :  { %17 = vsyncpa [#allocation8], 0 }
   0x9   :  { %19 = vsyncpa [#allocation8 + $0x1], 0  ;;  %s3518_s27 = smov 0   ;;  %s3520_s28 = smov 0  }
   0xa   :  { %s3522_s29 = smov 0   ;;  %s3524_s30 = smov 0  }
   0xb   :  { %s3526_s9 = smov 0   ;;  %s3528_s10 = smov 0  }
   0xc   :  { %s3530_s11 = smov 0   ;;  %s3532_s12 = smov 0  }
   0xd LB: > { %4643 = sst [smem:[#allocation23_spill]] %s3431_s27  ;;  %s2859_s13 = sadd.s32 4294967295, %s3459_s12   ;;  %s3459_s12 = sphi %s3532_s12, %s25_s12   ;;  %s3455_s11 = sphi %s3530_s11, %s4700_s11   ;;  %s3451_s10 = sphi %s3528_s10, %s4699_s10   ;;  %s3447_s9 = sphi %s3526_s9, %s4698_s9   ;;  %s3443_s30 = sphi %s3524_s30, %s4697_s30   ;;  %s3439_s29 = sphi %s3522_s29, %s4703_s29   ;;  %s3435_s28 = sphi %s3520_s28, %s4702_s28   ;;  %s3431_s27 = sphi %s3518_s27, %s4701_s27  }
   0xe   : > { %4644 = sst [smem:[#allocation24_spill]] %s3451_s10  ;;  %s2860_s14 = sadd.s32 4294967294, %s3459_s12  }
   0xf   : > { %4645 = sst [smem:[#allocation25_spill]] %s3455_s11  ;;  %p61_p0 = scmp.ne.s32.totalorder %s3435_s28, %s3431_s27 }
  0x10   : > { %p3562_p1 = scmp.eq.s32.totalorder %s2859_s13, 0  ;;  %p3566_p2 = scmp.eq.s32.totalorder %s2859_s13, 3 }
  0x11   : > { %p221_p3 = scmp.eq.s32.totalorder %s2860_s14, 3  ;;  %p2865_p5 = scmp.ge.s32.totalorder %s3459_s12, 1 }
  0x12   : > { %p3572_p4 = por %p3562_p1, %p61_p0  ;;  %p228_p7 = scmp.lt.s32.totalorder %s3459_s12, 5 }
  0x13   : > { %p3577_p6 = por %p221_p3, %p61_p0  ;;  %s4651_s4 = sld [smem:[#allocation30_spill]] }
  0x14   : > { %p3585_p8 = pnand %p2865_p5, %p228_p7  ;;  %s3461_s23 = smov [#allocation9]  }
  0x15   : > { %s4649_s18 = scalar_select %p3577_p6, 1, 0 }
  0x16   : > { %p3151_p9 = pneg %p3585_p8  ;;  %s247_s24 = sshll.u32 %s3461_s23, 4  ;;  %s248_s24 = int_to_ptr.vmem [resolvable:$true] %s247_s24 }
  0x17   : > { %4650 = sst [smem:[#allocation26_spill]] %s4649_s18  ;;  %s3462_s25 = smov 64  }
  0x18   : > { %p3152_p10 = pnand %p3151_p9, %p3562_p1  ;;  %s3463_s26 = smov 4  }
  0x19   : > { %s245_s21 = sshll.u32 %s4651_s4, 4  ;;  %s34_s13 = sadd.s32 1, %s3451_s10  ;;  %s246_s21 = int_to_ptr.hbm [resolvable:$true] %s245_s21 }
  0x1a   : > { %3154 = dma.hbm_to_vmem [thread:$0]  (!%p3152_p10), %s246_s21, 2304, %s248_s24, [#allocation10], %s3462_s25, %s3462_s25, %s3463_s26  }
  0x1b   : > { %p35_p11 = scmp.ge.s32.totalorder %s34_s13, 2  ;;  %s37_s14 = sadd.s32 1, %s3455_s11 }
  0x1c   : > { %s2861_s19 = sshll.u32 %s3455_s11, 1  ;;  %s48_s20 = sadd.s32 1, %s3439_s29 }
  0x1d   : > { %s4705_s13 = smov (%p35_p11, %s34_s13), 0  ;;  %s4707_s14 = smov (!%p35_p11, %s37_s14), %s3455_s11 }
  0x1e   : > { %4653 = sst [smem:[#allocation27_spill]] %s4705_s13  ;;  %s42_s23 = sadd.s32 %s3451_s10, %s2861_s19 }
  0x1f   : > { %p55_p12 = scmp.ne.s32.totalorder %s3439_s29, %s3435_s28  ;;  %p39_p13 = scmp.ge.s32.totalorder %s4707_s14, 2 }
  0x20   : > { %p56_p0 = scmp.eq.s32.totalorder %s3459_s12, 0  ;;  %p3164_p5 = scmp.lt.s32.totalorder %s3459_s12, 4 }
  0x21   : > { %p3606_p3 = por %p3566_p2, %p55_p12  ;;  %s4709_s14 = smov (%p39_p13, %s4707_s14), 0 }
  0x22   : > { %4656 = sst [smem:[#allocation29_spill]] %s4709_s14  ;;  %p3613_p7 = por %p56_p0, %p55_p12 }
  0x23   : > { %s4654_s4 = scalar_select %p3606_p3, 1, 0 }
  0x24   : > { %s270_s24 = sand.u32 1, %s3439_s29   ;;  %s2862_s25 = sshll.u32 %s4709_s14, 1 }
  0x25   : > { %4655 = sst [smem:[#allocation28_spill]] %s4654_s4  ;;  %s44_s26 = sadd.s32 %s2862_s25, %s4705_s13 }
  0x26   : > { %s2868_s19 = sshll.u32 %s270_s24, 7  ;;  %s45_s11 = ssub.s32 %s42_s23, %s44_s26 }
  0x27   : > { %p46_p9 = scmp.eq.s32.totalorder %s45_s11, 0  ;;  %s3085_s16 = sshll.u32 %s42_s23, 7 }
  0x28   : > { %s281_s27 = scalar_lea.hbm %s4620_s0, %s3085_s16  ;;  %s274_s4 = scalar_lea.vmem [#allocation6], %s2868_s19 }
  0x29   : > { %s284_s8 = sshll.u32 %s274_s4, 4  ;;  %s282_s5 = sshll.u32 %s281_s27, 4  ;;  %s285_s8 = int_to_ptr.vmem [resolvable:$true] %s284_s8  ;;  %s283_s5 = int_to_ptr.hbm [resolvable:$true] %s282_s5 }
  0x2a   : > { %s3624_s7 = scalar_select %p46_p9, %s3439_s29, %s48_s20  }
  0x2b   : > { %p3156_p2 = pnand %p3164_p5, %p3613_p7  ;;  %s271_s14 = scalar_lea.sflag [#allocation7], %s270_s24 }
  0x2c   : > { %s3464_s25 = smov 128   ;;  %s3465_s13 = smov 8  }
  0x2d   : > { %3158 = dma.hbm_to_vmem [thread:$0]  (!%p3156_p2), %s283_s5, 2048, %s285_s8, %s271_s14, %s3464_s25, %s3464_s25, %s3465_s13  }
  0x2e   : > { %296 = sbr.rel (%p3585_p8) target bundleno = 1262 (0x4ee), region = 48  ;;  %s3633_s10 = sand.u32 (!%p3585_p8), 1, %s3435_s28  }
  0x2f   : > { %s4638_s4 = sshll.u32 (!%p3585_p8), %s3633_s10, 7  ;;  %s299_s27 = scalar_lea.sflag (!%p3585_p8), [#allocation7], %s3633_s10 }
  0x30   : > { %s3639_s11 = scalar_lea.vmem (!%p3585_p8), [#allocation6], %s4638_s4 }
  0x33   : > { %3414 = dma.done.wait (%p3572_p4), %s299_s27, 2048  }
  0x34   : > { %3416 = vsyncadd (%p3572_p4), %s299_s27, 4294965248 }
  0x35   : > { %3418 = dma.done.wait (%p3562_p1), [#allocation10], 2304  }
  0x36   : > { %3420 = vsyncadd (%p3562_p1), [#allocation10], 4294964992  ;;  %v3652_v0 = vld [vmem:[%s4622_s2 + $0x38] sm:$0xff]  ;;  %v3659_v1 = vld [vmem:[%s4622_s2 + $0x30] sm:$0xff]  ;;  %vm405_vm0 = vcmask 261120   ;;  %v3466_v6 = vmov 0.0  }
  0x37   : > { %483 = vmatpush.bf16.msra.mxu0 %v3652_v0  ;;  %3115 = vmatpush.bf16.msra.mxu1 %v3652_v0  ;;  %v3668_v2 = vld [vmem:[%s4622_s2 + $0x28] sm:$0xff]  ;;  %v3677_v3 = vld [vmem:[%s4622_s2 + $0x20] sm:$0xff]  ;;  %v3686_v4 = vld [vmem:[%s4622_s2 + $0x18] sm:$0xff]  ;;  %406 = vst.msk [vmem:[#allocation2] sm:$0xff] %vm405_vm0, %v3466_v6  ;;  %s2876_s27 = sshll.u32 %s3443_s30, 3  ;;  %s2877_s18 = sshll.u32 %s3447_s9, 8 }
  0x38   : > { %3116 = vmatpush.bf16.msra.mxu2 %v3652_v0  ;;  %3117 = vmatpush.bf16.msra.mxu3 %v3652_v0  ;;  %v3695_v5 = vld [vmem:[%s4622_s2 + $0x10] sm:$0xff]  ;;  %407 = vst.msk [vmem:[#allocation2 + $0xa8] sm:$0xff] %vm405_vm0, %v3466_v6  ;;  %v3708_v7 = vld [vmem:[%s4622_s2 + $0x8] sm:$0xff]  ;;  %v3715_v8 = vld [vmem:[%s4622_s2] sm:$0xff]  ;;  %s2878_s5 = sadd.s32 4294967295, %s2876_s27  ;;  %s351_s8 = sadd.s32 8, %s2876_s27 }
  0x39   : > { %v408_v9 = vld [vmem:[%s3639_s11] sm:$0xff]  ;;  %v409_v10 = vld [vmem:[%s3639_s11 + $0x8] sm:$0xff]  ;;  %v410_v21 = vld [vmem:[%s3639_s11 + $0x10] sm:$0xff]  ;;  %p349_p1 = scmp.gt.s32.totalorder %s2878_s5, 0  ;;  %p352_p4 = scmp.lt.s32.totalorder %s351_s8, 15 }
  0x3a   : > { %v412_v11 = vld [vmem:[%s3639_s11 + $0x20] sm:$0xff]  ;;  %v413_v12 = vld [vmem:[%s3639_s11 + $0x28] sm:$0xff]  ;;  %v424_v17 = vpack.c.bf16 %v409_v10, %v408_v9  ;;  %v411_v22 = vld [vmem:[%s3639_s11 + $0x18] sm:$0xff]  ;;  %s3467_s21 = smov [#allocation4]   ;;  %s3309_s27 = scalar_lea.hbm %s4621_s1, 512 }
  0x3b   : > { %484 = vmatpush.bf16.msra.mxu0 %v3659_v1  ;;  %3118 = vmatpush.bf16.msra.mxu1 %v3659_v1  ;;  %v416_v13 = vld [vmem:[%s3639_s11 + $0x40] sm:$0xff]  ;;  %v417_v14 = vld [vmem:[%s3639_s11 + $0x48] sm:$0xff]  ;;  %v426_v18 = vpack.c.bf16 %v413_v12, %v412_v11  ;;  %v414_v23 = vld [vmem:[%s3639_s11 + $0x30] sm:$0xff]  ;;  %v425_v29 = vpack.c.bf16 %v411_v22, %v410_v21  ;;  %s4711_s5 = smov (!%p349_p1, %s2878_s5), 0  ;;  %s4713_s8 = smov (!%p352_p4, %s351_s8), 15 }
  0x3c   : > { %3119 = vmatpush.bf16.msra.mxu2 %v3659_v1  ;;  %3120 = vmatpush.bf16.msra.mxu3 %v3659_v1  ;;  %v420_v15 = vld [vmem:[%s3639_s11 + $0x60] sm:$0xff]  ;;  %v421_v16 = vld [vmem:[%s3639_s11 + $0x68] sm:$0xff]  ;;  %v428_v19 = vpack.c.bf16 %v417_v14, %v416_v13  ;;  %v415_v24 = vld [vmem:[%s3639_s11 + $0x38] sm:$0xff]  ;;  %s2879_s22 = sshll.u32 %s4711_s5, 4  ;;  %s2880_s17 = sshll.u32 %s4713_s8, 4 }
  0x3d   : > { %v430_v20 = vpack.c.bf16 %v421_v16, %v420_v15  ;;  %v418_v25 = vld [vmem:[%s3639_s11 + $0x50] sm:$0xff]  ;;  %v419_v26 = vld [vmem:[%s3639_s11 + $0x58] sm:$0xff]  ;;  %v427_v30 = vpack.c.bf16 %v415_v24, %v414_v23  ;;  %s355_s15 = sadd.s32 %s2879_s22, %s2877_s18  ;;  %s368_s24 = sshll.u32 %s3467_s21, 4  ;;  %s369_s24 = int_to_ptr.vmem [resolvable:$true] %s368_s24 }
  0x3e   : > { %v422_v27 = vld [vmem:[%s3639_s11 + $0x70] sm:$0xff]  ;;  %v423_v28 = vld [vmem:[%s3639_s11 + $0x78] sm:$0xff]  ;;  %v429_v31 = vpack.c.bf16 %v419_v26, %v418_v25  ;;  %s358_s20 = scalar_lea.hbm %s4621_s1, %s355_s15 }
  0x3f   : > { %485 = vmatpush.bf16.msra.mxu0 %v3668_v2  ;;  %3121 = vmatpush.bf16.msra.mxu1 %v3668_v2  ;;  %v431_v32 = vpack.c.bf16 %v423_v28, %v422_v27  ;;  %s366_s23 = sshll.u32 %s358_s20, 4  ;;  %s367_s23 = int_to_ptr.hbm [resolvable:$true] %s366_s23 }
  0x40   : > { %3122 = vmatpush.bf16.msra.mxu2 %v3668_v2  ;;  %3123 = vmatpush.bf16.msra.mxu3 %v3668_v2  ;;  %s3305_s26 = sshra.s32 %s367_s23, 4  ;;  %s3306_s26 = int_to_ptr.hbm [resolvable:$true] %s3305_s26 }
  0x41   : > { %s3307_s19 = scalar_lea.hbm %s3306_s26, 16  ;;  %p3310_p10 = scmp.lt.s32.totalorder %s3306_s26, %s4621_s1 }
  0x42   : > { %p3308_p8 = scmp.ne.s32.totalorder %s3306_s26, %s3307_s19  ;;  %p3311_p11 = scmp.lt.s32.totalorder %s3309_s27, %s3307_s19 }
  0x43   : > { %486 = vmatpush.bf16.msra.mxu0 %v3677_v3  ;;  %3124 = vmatpush.bf16.msra.mxu1 %v3677_v3 }
  0x44   : > { %3125 = vmatpush.bf16.msra.mxu2 %v3677_v3  ;;  %3126 = vmatpush.bf16.msra.mxu3 %v3677_v3  ;;  %p3312_p12 = por %p3311_p11, %p3310_p10 }
  0x46   : > { %p3313_p13 = pnand %p3312_p12, %p3308_p8 }
  0x47   : > { %487 = vmatpush.bf16.msra.mxu0 %v3686_v4  ;;  %3127 = vmatpush.bf16.msra.mxu1 %v3686_v4 }
  0x48   : > { %3128 = vmatpush.bf16.msra.mxu2 %v3686_v4  ;;  %3129 = vmatpush.bf16.msra.mxu3 %v3686_v4 }
  0x4b   : > { %488 = vmatpush.bf16.msra.mxu0 %v3695_v5  ;;  %3130 = vmatpush.bf16.msra.mxu1 %v3695_v5 }
  0x4c   : > { %3131 = vmatpush.bf16.msra.mxu2 %v3695_v5  ;;  %3132 = vmatpush.bf16.msra.mxu3 %v3695_v5 }
  0x4f   : > { %489 = vmatpush.bf16.msra.mxu0 %v3708_v7  ;;  %3133 = vmatpush.bf16.msra.mxu1 %v3708_v7 }
  0x50   : > { %3134 = vmatpush.bf16.msra.mxu2 %v3708_v7  ;;  %3135 = vmatpush.bf16.msra.mxu3 %v3708_v7 }
  0x53   : > { %490 = vmatpush.bf16.msra.mxu0 %v3715_v8  ;;  %3136 = vmatpush.bf16.msra.mxu1 %v3715_v8 }
  0x54   : > { %3137 = vmatpush.bf16.msra.mxu2 %v3715_v8  ;;  %3138 = vmatpush.bf16.msra.mxu3 %v3715_v8 }
  0x56   : > { %491 = vmatmul.bf16.vlgmr.msra.gmra.mxu0 %v424_v17  ;;  %501 = vmatmul.bf16.vlgmr.msra.gmra.mxu1 %v426_v18 }
  0x57   : > { %511 = vmatmul.bf16.vlgmr.msra.gmra.mxu2 %v428_v19  ;;  %521 = vmatmul.bf16.vlgmr.msra.gmra.mxu3 %v430_v20 }
  0x66   : > { %496 = vmatmul.bf16.gmra.mxu0 %v425_v29  ;;  %506 = vmatmul.bf16.gmra.mxu1 %v427_v30 }
  0x67   : > { %516 = vmatmul.bf16.gmra.mxu2 %v429_v31  ;;  %526 = vmatmul.bf16.gmra.mxu3 %v431_v32 }
  0x68   : > { %3316 = shalt.err (!%p3313_p13)  }
  0x69   : > { %371 = dma.hbm_to_vmem [thread:$0]  %s367_s23, 256, %s369_s24, [#allocation5] }
  0x6a   : > { %s357_s8 = sadd.s32 %s2880_s17, %s2877_s18  ;;  %s3468_s21 = smov [#allocation4 + $0x10]  }
  0x6b   : > { %s372_s14 = scalar_lea.hbm %s4621_s1, %s357_s8  ;;  %s384_s4 = sshll.u32 %s3468_s21, 4  ;;  %s385_s4 = int_to_ptr.vmem [resolvable:$true] %s384_s4 }
  0x6c   : > { %s382_s20 = sshll.u32 %s372_s14, 4  ;;  %s383_s20 = int_to_ptr.hbm [resolvable:$true] %s382_s20 }
  0x6d   : > { %s3329_s16 = sshra.s32 %s383_s20, 4  ;;  %s3330_s16 = int_to_ptr.hbm [resolvable:$true] %s3329_s16 }
  0x6e   : > { %s3331_s25 = scalar_lea.hbm %s3330_s16, 16  ;;  %p3334_p5 = scmp.lt.s32.totalorder %s3330_s16, %s4621_s1 }
  0x6f   : > { %p3332_p0 = scmp.ne.s32.totalorder %s3330_s16, %s3331_s25  ;;  %p3335_p7 = scmp.lt.s32.totalorder %s3309_s27, %s3331_s25 }
  0x71   : > { %p3336_p9 = por %p3335_p7, %p3334_p5 }
  0x73   : > { %p3337_p2 = pnand %p3336_p9, %p3332_p0 }
  0x75   : > { %3340 = shalt.err (!%p3337_p2)  }
  0x76   : > { %387 = dma.hbm_to_vmem [thread:$0]  %s383_s20, 256, %s385_s4, [#allocation5 + $0x1]  ;;  %v404_v33 = vld [vmem:[%s4623_s3] sm:$0x1] }
  0x77   : > { %v3761_v34 = vperm.slane %v404_v33, 0  ;;  %s4658_s4 = sshll.u32 %s3633_s10, 7 }
  0x78   : > { %s3797_s23 = scalar_lea.vmem [#allocation11], %s4658_s4 }
  0xd3   : > { %v492_v35 = vpop.f32.mrf.mxu0  ;;  %v502_v36 = vpop.f32.mrf.mxu1 }
  0xd4   : > { %v493_v37 = vadd.f32 %v492_v35, %v3761_v34  ;;  %v503_v38 = vadd.f32 %v502_v36, %v3761_v34 }
  0xd6   : > { %v532_v39 = vmax.f32 %v493_v37, 0.0  ;;  %v536_v40 = vmax.f32 %v503_v38, 0.0 }
  0xd8   : > { %548 = vst.msk [vmem:[#allocation2 + $0x18] sm:$0xff] %vm405_vm0, %v532_v39 }
  0xd9   : > { %552 = vst.msk [vmem:[#allocation2 + $0x38] sm:$0xff] %vm405_vm0, %v536_v40 }
  0xda   : > { %v512_v41 = vpop.f32.mrf.mxu2  ;;  %v522_v42 = vpop.f32.mrf.mxu3 }
  0xdb   : > { %v513_v43 = vadd.f32 %v512_v41, %v3761_v34  ;;  %v523_v44 = vadd.f32 %v522_v42, %v3761_v34  ;;  %v494_v45 = vpop.f32.mrf.mxu0  ;;  %v504_v46 = vpop.f32.mrf.mxu1 }
  0xdc   : > { %v495_v47 = vadd.f32 %v494_v45, %v3761_v34  ;;  %v505_v48 = vadd.f32 %v504_v46, %v3761_v34 }
  0xdd   : > { %v540_v49 = vmax.f32 %v513_v43, 0.0  ;;  %v544_v50 = vmax.f32 %v523_v44, 0.0 }
  0xde   : > { %v533_v51 = vmax.f32 %v495_v47, 0.0  ;;  %v537_v52 = vmax.f32 %v505_v48, 0.0 }
  0xdf   : > { %556 = vst.msk [vmem:[#allocation2 + $0x58] sm:$0xff] %vm405_vm0, %v540_v49 }
  0xe0   : > { %560 = vst.msk [vmem:[#allocation2 + $0x78] sm:$0xff] %vm405_vm0, %v544_v50 }
  0xe1   : > { %549 = vst.msk [vmem:[#allocation2 + $0x20] sm:$0xff] %vm405_vm0, %v533_v51 }
  0xe2   : > { %553 = vst.msk [vmem:[#allocation2 + $0x40] sm:$0xff] %vm405_vm0, %v537_v52  ;;  %v514_v53 = vpop.f32.mrf.mxu2  ;;  %v524_v54 = vpop.f32.mrf.mxu3 }
  0xe3   : > { %v515_v55 = vadd.f32 %v514_v53, %v3761_v34  ;;  %v525_v56 = vadd.f32 %v524_v54, %v3761_v34  ;;  %v497_v57 = vpop.f32.mrf.mxu0  ;;  %v507_v58 = vpop.f32.mrf.mxu1 }
  0xe4   : > { %v498_v59 = vadd.f32 %v497_v57, %v3761_v34  ;;  %v508_v60 = vadd.f32 %v507_v58, %v3761_v34 }
  0xe5   : > { %v541_v61 = vmax.f32 %v515_v55, 0.0  ;;  %v545_v62 = vmax.f32 %v525_v56, 0.0 }
  0xe6   : > { %v534_v63 = vmax.f32 %v498_v59, 0.0  ;;  %v538_v9 = vmax.f32 %v508_v60, 0.0 }
  0xe7   : > { %557 = vst.msk [vmem:[#allocation2 + $0x60] sm:$0xff] %vm405_vm0, %v541_v61 }
  0xe8   : > { %561 = vst.msk [vmem:[#allocation2 + $0x80] sm:$0xff] %vm405_vm0, %v545_v62 }
  0xe9   : > { %550 = vst.msk [vmem:[#allocation2 + $0x28] sm:$0xff] %vm405_vm0, %v534_v63 }
  0xea   : > { %554 = vst.msk [vmem:[#allocation2 + $0x48] sm:$0xff] %vm405_vm0, %v538_v9  ;;  %v517_v10 = vpop.f32.mrf.mxu2  ;;  %v527_v11 = vpop.f32.mrf.mxu3 }
  0xeb   : > { %v518_v12 = vadd.f32 %v517_v10, %v3761_v34  ;;  %v528_v13 = vadd.f32 %v527_v11, %v3761_v34  ;;  %v499_v14 = vpop.f32.mrf.mxu0  ;;  %v509_v15 = vpop.f32.mrf.mxu1 }
  0xec   : > { %v500_v16 = vadd.f32 %v499_v14, %v3761_v34  ;;  %v510_v17 = vadd.f32 %v509_v15, %v3761_v34 }
  0xed   : > { %v542_v18 = vmax.f32 %v518_v12, 0.0  ;;  %v546_v19 = vmax.f32 %v528_v13, 0.0 }
  0xee   : > { %v535_v20 = vmax.f32 %v500_v16, 0.0  ;;  %v539_v21 = vmax.f32 %v510_v17, 0.0 }
  0xef   : > { %558 = vst.msk [vmem:[#allocation2 + $0x68] sm:$0xff] %vm405_vm0, %v542_v18 }
  0xf0   : > { %562 = vst.msk [vmem:[#allocation2 + $0x88] sm:$0xff] %vm405_vm0, %v546_v19 }
  0xf1   : > { %551 = vst.msk [vmem:[#allocation2 + $0x30] sm:$0xff] %vm405_vm0, %v535_v20 }
  0xf2   : > { %555 = vst.msk [vmem:[#allocation2 + $0x50] sm:$0xff] %vm405_vm0, %v539_v21  ;;  %v519_v22 = vpop.f32.mrf.mxu2  ;;  %v529_v23 = vpop.f32.mrf.mxu3 }
  0xf3   : > { %v520_v24 = vadd.f32 %v519_v22, %v3761_v34  ;;  %v530_v25 = vadd.f32 %v529_v23, %v3761_v34 }
  0xf5   : > { %v543_v26 = vmax.f32 %v520_v24, 0.0  ;;  %v547_v27 = vmax.f32 %v530_v25, 0.0 }
  0xf7   : > { %559 = vst.msk [vmem:[#allocation2 + $0x70] sm:$0xff] %vm405_vm0, %v543_v26 }
  0xf8   : > { %563 = vst.msk [vmem:[#allocation2 + $0x90] sm:$0xff] %vm405_vm0, %v547_v27 }
  0xf9   : > { %3421 = dma.done.wait [#allocation5], 256 }
  0xfa   : > { %3422 = vsyncadd [#allocation5], 4294967040 }
  0xfb   : > { %3423 = dma.done.wait [#allocation5 + $0x1], 256 }
  0xfc   : > { %3424 = vsyncadd [#allocation5 + $0x1], 4294967040  ;;  %p2913_p1 = scmp.ne.s32.totalorder %s3443_s30, 0 }
  0xfe   : > { %572 = sbr.rel (%p2913_p1) target bundleno = 262 (0x106), region = 68 }
 0x103   : > { %v3469_v28 = vmov 0.0  }
 0x104   : > { %573 = vst.msk [vmem:[#allocation2 + $0x8] sm:$0xff] %vm405_vm0, %v3469_v28 }
 0x105   : > { %574 = vst.msk [vmem:[#allocation2 + $0x10] sm:$0xff] %vm405_vm0, %v3469_v28 }
 0x106 PF: > { %p2914_p4 = scmp.le.s32.totalorder %s3443_s30, 0 }
 0x108   : > { %578 = sbr.rel (%p2914_p4) target bundleno = 439 (0x1b7), region = 72 }
 0x10d   : > { %582 = vmatpush.bf16.msra.mxu0 %v3652_v0  ;;  %v579_v29 = vld [vmem:[#allocation4] sm:$0xff]  ;;  %v580_v30 = vld [vmem:[#allocation4 + $0x8] sm:$0xff] }
 0x10e   : > { %v581_v31 = vpack.c.bf16 %v580_v30, %v579_v29 }
 0x111   : > { %583 = vmatpush.bf16.msra.mxu0 %v3659_v1 }
 0x115   : > { %584 = vmatpush.bf16.msra.mxu0 %v3668_v2 }
 0x119   : > { %585 = vmatpush.bf16.msra.mxu0 %v3677_v3 }
 0x11d   : > { %586 = vmatpush.bf16.msra.mxu0 %v3686_v4 }
 0x121   : > { %587 = vmatpush.bf16.msra.mxu0 %v3695_v5 }
 0x125   : > { %588 = vmatpush.bf16.msra.mxu0 %v3708_v7 }
 0x129   : > { %589 = vmatpush.bf16.msra.mxu0 %v3715_v8 }
 0x12c   : > { %590 = vmatmul.bf16.vlgmr.msra.gmra.mxu0 %v581_v31 }
 0x1a9   : > { %v591_v32 = vpop.f32.mrf.mxu0 }
 0x1aa   : > { %v592_v33 = vadd.f32 %v591_v32, %v3761_v34 }
 0x1ac   : > { %v596_v35 = vmax.f32 %v592_v33, 0.0 }
 0x1ae   : > { %598 = vst.msk [vmem:[#allocation2 + $0x8] sm:$0xff] %vm405_vm0, %v596_v35 }
 0x1b1   : > { %v593_v36 = vpop.f32.mrf.mxu0 }
 0x1b2   : > { %v594_v37 = vadd.f32 %v593_v36, %v3761_v34 }
 0x1b4   : > { %v597_v38 = vmax.f32 %v594_v37, 0.0 }
 0x1b6   : > { %599 = vst.msk [vmem:[#allocation2 + $0x10] sm:$0xff] %vm405_vm0, %v597_v38 }
 0x1b7 PF: > { %p2915_p8 = scmp.ne.s32.totalorder %s3443_s30, 1 }
 0x1b9   : > { %603 = sbr.rel (%p2915_p8) target bundleno = 449 (0x1c1), region = 76 }
 0x1be   : > { %v3470_v39 = vmov 0.0  }
 0x1bf   : > { %604 = vst.msk [vmem:[#allocation2 + $0x98] sm:$0xff] %vm405_vm0, %v3470_v39 }
 0x1c0   : > { %605 = vst.msk [vmem:[#allocation2 + $0xa0] sm:$0xff] %vm405_vm0, %v3470_v39 }
 0x1c1 PF: > { %p2916_p10 = scmp.ge.s32.totalorder %s3443_s30, 1 }
 0x1c3   : > { %609 = sbr.rel (%p2916_p10) target bundleno = 626 (0x272), region = 80 }
 0x1c8   : > { %613 = vmatpush.bf16.msra.mxu0 %v3652_v0  ;;  %v610_v40 = vld [vmem:[#allocation4 + $0x10] sm:$0xff]  ;;  %v611_v41 = vld [vmem:[#allocation4 + $0x18] sm:$0xff] }
 0x1c9   : > { %v612_v42 = vpack.c.bf16 %v611_v41, %v610_v40 }
 0x1cc   : > { %614 = vmatpush.bf16.msra.mxu0 %v3659_v1 }
 0x1d0   : > { %615 = vmatpush.bf16.msra.mxu0 %v3668_v2 }
 0x1d4   : > { %616 = vmatpush.bf16.msra.mxu0 %v3677_v3 }
 0x1d8   : > { %617 = vmatpush.bf16.msra.mxu0 %v3686_v4 }
 0x1dc   : > { %618 = vmatpush.bf16.msra.mxu0 %v3695_v5 }
 0x1e0   : > { %619 = vmatpush.bf16.msra.mxu0 %v3708_v7 }
 0x1e4   : > { %620 = vmatpush.bf16.msra.mxu0 %v3715_v8 }
 0x1e7   : > { %621 = vmatmul.bf16.vlgmr.msra.gmra.mxu0 %v612_v42 }
 0x264   : > { %v622_v43 = vpop.f32.mrf.mxu0 }
 0x265   : > { %v623_v0 = vadd.f32 %v622_v43, %v3761_v34 }
 0x267   : > { %v627_v1 = vmax.f32 %v623_v0, 0.0 }
 0x269   : > { %629 = vst.msk [vmem:[#allocation2 + $0x98] sm:$0xff] %vm405_vm0, %v627_v1 }
 0x26c   : > { %v624_v2 = vpop.f32.mrf.mxu0 }
 0x26d   : > { %v625_v3 = vadd.f32 %v624_v2, %v3761_v34 }
 0x26f   : > { %v628_v4 = vmax.f32 %v625_v3, 0.0 }
 0x271   : > { %630 = vst.msk [vmem:[#allocation2 + $0xa0] sm:$0xff] %vm405_vm0, %v628_v4 }
 0x272 PF: > { %v3095_v5 = vld [vmem:[#allocation9 + $0x8] sm:$0xff]  ;;  %v3097_v7 = vld [vmem:[#allocation9 + $0x18] sm:$0xff]  ;;  %v631_v44 = vlaneseq  ;;  %880 = vst.msk [vmem:[#allocation3 + $0x40] sm:$0xff] %vm405_vm0, %v3466_v6  ;;  %v3094_v8 = vld [vmem:[#allocation9] sm:$0xff]  ;;  %s4691_s13 = sld [smem:[#allocation31_spill]]  ;;  %s3078_s16 = sshll.u32 %s3447_s9, 1 }
 0x273   : > { %881 = vst.msk [vmem:[#allocation3 + $0x48] sm:$0xff] %vm405_vm0, %v3466_v6  ;;  %3139 = vmatpush.bf16.msra.mxu2 %v3095_v5  ;;  %3141 = vmatpush.bf16.msra.mxu3 %v3097_v7  ;;  %v3096_v45 = vld [vmem:[#allocation9 + $0x10] sm:$0xff]  ;;  %v1105_v34 = vld [vmem:[#allocation2 + $0x48] sm:$0xff]  ;;  %v1106_v47 = vld [vmem:[#allocation2 + $0x50] sm:$0xff]  ;;  %s4692_s21 = sld [smem:[#allocation32_spill]]  ;;  %s2731_s25 = sadd.s32 %s3443_s30, %s3078_s16 }
 0x274   : > { %v3835_v46 = vshrl.u32 %v631_v44, 7  ;;  %872 = vst.msk [vmem:[#allocation3] sm:$0xff] %vm405_vm0, %v3466_v6  ;;  %v3099_v48 = vld [vmem:[#allocation9 + $0x28] sm:$0xff]  ;;  %v3101_v49 = vld [vmem:[#allocation9 + $0x38] sm:$0xff]  ;;  %1022 = vmatpush.bf16.msra.mxu0 %v3095_v5  ;;  %1184 = vmatpush.bf16.msra.mxu1 %v3097_v7  ;;  %v3845_v54 = vpack.c.bf16 %v1106_v47, %v1105_v34  ;;  %v1098_v61 = vld [vmem:[#allocation2 + $0x10] sm:$0xff]  ;;  %s3114_s26 = sshll.u32 %s2731_s25, 7 }
 0x275   : > { %882 = vst.msk [vmem:[#allocation3 + $0x50] sm:$0xff] %vm405_vm0, %v3466_v6  ;;  %v888_v52 = vld [vmem:[#allocation2 + $0x7] sm:$0xff]  ;;  %v889_v55 = vld [vmem:[#allocation2 + $0xf] sm:$0xff]  ;;  %v3103_v59 = vld [vmem:[#allocation9 + $0x48] sm:$0xff]  ;;  %s4693_s17 = sld [smem:[#allocation33_spill]]  ;;  %s2737_s9 = sshll.u32 %s3797_s23, 4  ;;  %s2738_s9 = int_to_ptr.vmem [resolvable:$true] %s2737_s9 }
 0x276   : > { %v640_v50 = vadd.s32 64, %v3835_v46  ;;  %v652_v51 = vand.u32 15, %v3835_v46  ;;  %v3843_v53 = vld [vmem:[#allocation2 + $0x47] sm:$0xff]  ;;  %873 = vst.msk [vmem:[#allocation3 + $0x8] sm:$0xff] %vm405_vm0, %v3466_v6  ;;  %v3855_v62 = vld [vmem:[#allocation2 + $0x4f] sm:$0xff]  ;;  %v634_v16 = vadd.s32 16, %v3835_v46 }
 0x277   : > { %v3847_v56 = vld [vmem:[#allocation2 + $0x27] sm:$0xff]  ;;  %3140 = vmatpush.bf16.msra.mxu2 %v3094_v8  ;;  %3142 = vmatpush.bf16.msra.mxu3 %v3096_v45  ;;  %v3859_v9 = vld [vmem:[#allocation2 + $0x2f] sm:$0xff]  ;;  %883 = vst.msk [vmem:[#allocation3 + $0x58] sm:$0xff] %vm405_vm0, %v3466_v6  ;;  %v642_v18 = vadd.s32 80, %v3835_v46  ;;  %v3906_v24 = vld [vmem:[#allocation2 + $0x17] sm:$0xff]  ;;  %v636_v39 = vadd.s32 32, %v3835_v46 }
 0x278   : > { %v708_v57 = vand.u32 15, %v640_v50  ;;  %vm3851_vm1 = vcmp.eq.s32.totalorder %v652_v51, 0  ;;  %v1097_v60 = vld [vmem:[#allocation2 + $0x8] sm:$0xff]  ;;  %1023 = vmatpush.bf16.msra.mxu0 %v3094_v8  ;;  %1185 = vmatpush.bf16.msra.mxu1 %v3096_v45  ;;  %874 = vst.msk [vmem:[#allocation3 + $0x10] sm:$0xff] %vm405_vm0, %v3466_v6  ;;  %v3098_v19 = vld [vmem:[#allocation9 + $0x20] sm:$0xff]  ;;  %v3100_v20 = vld [vmem:[#allocation9 + $0x30] sm:$0xff] }
 0x279   : > { %v936_v63 = vsel %vm3851_vm1, 0.0, %v888_v52  ;;  %v2003_v10 = vsel %vm3851_vm1, 0.0, %v3847_v56  ;;  %v1129_v11 = vpack.c.bf16 %v1098_v61, %v1097_v60  ;;  %884 = vst.msk [vmem:[#allocation3 + $0x60] sm:$0xff] %vm405_vm0, %v3466_v6  ;;  %v666_v21 = vand.u32 15, %v634_v16  ;;  %v3914_v26 = vld [vmem:[#allocation2 + $0x57] sm:$0xff]  ;;  %v1108_v28 = vld [vmem:[#allocation2 + $0x60] sm:$0xff] }
 0x27a   : > { %vm3866_vm2 = vcmp.eq.s32.totalorder %v708_v57, 0  ;;  %v968_v13 = vpack.c.bf16 %v889_v55, %v936_v63  ;;  %v3871_v14 = vpack.c.bf16 %v3859_v9, %v2003_v10  ;;  %2945 = vmatmul.msk.bf16.vlgmr.msra.gmra.mxu3 %vm405_vm0, %v3845_v54  ;;  %875 = vst.msk [vmem:[#allocation3 + $0x18] sm:$0xff] %vm405_vm0, %v3466_v6  ;;  %v722_v22 = vand.u32 15, %v642_v18  ;;  %v1107_v27 = vld [vmem:[#allocation2 + $0x58] sm:$0xff]  ;;  %v1100_v32 = vld [vmem:[#allocation2 + $0x20] sm:$0xff]  ;;  %v3102_v41 = vld [vmem:[#allocation9 + $0x40] sm:$0xff] }
 0x27b   : > { %1394 = vmatpush.bf16.msrb.mxu2 %v3099_v48  ;;  %1572 = vmatpush.bf16.msrb.mxu3 %v3101_v49  ;;  %v944_v15 = vsel %vm3866_vm2, 0.0, %v3843_v53  ;;  %885 = vst.msk [vmem:[#allocation3 + $0x68] sm:$0xff] %vm405_vm0, %v3466_v6  ;;  %vm3902_vm3 = vcmp.eq.s32.totalorder %v666_v21, 0  ;;  %v3916_v29 = vld [vmem:[#allocation2 + $0x1f] sm:$0xff]  ;;  %v3926_v35 = vpack.c.bf16 %v1108_v28, %v1107_v27  ;;  %v644_v40 = vadd.s32 96, %v3835_v46  ;;  %v3948_v2 = vld [vmem:[#allocation2 + $0x67] sm:$0xff]  ;;  %s2736_s4 = scalar_lea.hbm %s4693_s17, %s3114_s26 }
 0x27c   : > { %1734 = vmatpush.bf16.msrb.mxu0 %v3103_v59  ;;  %v972_v17 = vpack.c.bf16 %v3855_v62, %v944_v15  ;;  %2941 = vmatmul.msk.bf16.vlgmr.msra.gmra.mxu1 %vm405_vm0, %v1129_v11  ;;  %876 = vst.msk [vmem:[#allocation3 + $0x20] sm:$0xff] %vm405_vm0, %v3466_v6  ;;  %vm3910_vm4 = vcmp.eq.s32.totalorder %v722_v22, 0  ;;  %v938_v30 = vsel %vm3902_vm3, 0.0, %v3906_v24  ;;  %v1099_v31 = vld [vmem:[#allocation2 + $0x18] sm:$0xff]  ;;  %v680_v42 = vand.u32 15, %v636_v39  ;;  %v1109_v3 = vld [vmem:[#allocation2 + $0x68] sm:$0xff] }
 0x27d   : > { %2925 = vmatmul.msk.bf16.vlgmr.msra.gmra.mxu0 %vm405_vm0, %v968_v13  ;;  %886 = vst.msk [vmem:[#allocation3 + $0x70] sm:$0xff] %vm405_vm0, %v3466_v6  ;;  %v3921_v33 = vld [vmem:[#allocation2 + $0x5f] sm:$0xff]  ;;  %v969_v36 = vpack.c.bf16 %v3916_v29, %v938_v30  ;;  %v3929_v37 = vpack.c.bf16 %v1100_v32, %v1099_v31  ;;  %v736_v43 = vand.u32 15, %v644_v40  ;;  %v1110_v4 = vld [vmem:[#allocation2 + $0x70] sm:$0xff]  ;;  %v1101_v7 = vld [vmem:[#allocation2 + $0x28] sm:$0xff]  ;;  %v633_v8 = vadd.s32 8, %v3835_v46 }
 0x27e   : > { %2929 = vmatmul.msk.bf16.vlgmr.msra.gmra.mxu2 %vm405_vm0, %v972_v17  ;;  %877 = vst.msk [vmem:[#allocation3 + $0x28] sm:$0xff] %vm405_vm0, %v3466_v6  ;;  %vm3940_vm5 = vcmp.eq.s32.totalorder %v680_v42, 0  ;;  %v1102_v44 = vld [vmem:[#allocation2 + $0x30] sm:$0xff]  ;;  %v3959_v47 = vpack.c.bf16 %v1110_v4, %v1109_v3  ;;  %v638_v52 = vadd.s32 48, %v3835_v46  ;;  %v646_v55 = vadd.s32 112, %v3835_v46  ;;  %v3107_v60 = vld [vmem:[#allocation9 + $0x68] sm:$0xff] }
 0x27f   : > { %1395 = vmatpush.bf16.msrb.mxu2 %v3098_v19  ;;  %1573 = vmatpush.bf16.msrb.mxu3 %v3100_v20  ;;  %887 = vst.msk [vmem:[#allocation3 + $0x78] sm:$0xff] %vm405_vm0, %v3466_v6  ;;  %vm3944_vm6 = vcmp.eq.s32.totalorder %v736_v43, 0  ;;  %v940_v5 = vsel %vm3940_vm5, 0.0, %v3847_v56  ;;  %v3954_v45 = vld [vmem:[#allocation2 + $0x6f] sm:$0xff]  ;;  %v3962_v49 = vpack.c.bf16 %v1102_v44, %v1101_v7  ;;  %v659_v51 = vand.u32 15, %v633_v8  ;;  %v3991_v17 = vld [vmem:[#allocation2 + $0x37] sm:$0xff] }
 0x280   : > { %878 = vst.msk [vmem:[#allocation3 + $0x30] sm:$0xff] %vm405_vm0, %v3466_v6  ;;  %1735 = vmatpush.bf16.msrb.mxu0 %v3102_v41  ;;  %v948_v34 = vsel %vm3944_vm6, 0.0, %v3948_v2  ;;  %v970_v48 = vpack.c.bf16 %v3859_v9, %v940_v5  ;;  %v3977_v59 = vld [vmem:[#allocation2 + $0x31] sm:$0xff]  ;;  %v3979_v61 = vld [vmem:[#allocation2 + $0x29] sm:$0xff]  ;;  %v694_v10 = vand.u32 15, %v638_v52  ;;  %v750_v13 = vand.u32 15, %v646_v55 }
 0x281   : > { %879 = vst.msk [vmem:[#allocation3 + $0x38] sm:$0xff] %vm405_vm0, %v3466_v6  ;;  %v946_v6 = vsel %vm3910_vm4, 0.0, %v3914_v26  ;;  %v974_v50 = vpack.c.bf16 %v3954_v45, %v948_v34  ;;  %vm3973_vm7 = vcmp.eq.s32.totalorder %v659_v51, 15  ;;  %v3109_v11 = vld [vmem:[#allocation9 + $0x78] sm:$0xff]  ;;  %v3997_v19 = vld [vmem:[#allocation2 + $0x77] sm:$0xff]  ;;  %v1112_v21 = vld [vmem:[#allocation2 + $0x80] sm:$0xff] }
 0x282   : > { %v973_v38 = vpack.c.bf16 %v3921_v33, %v946_v6  ;;  %v2344_v63 = vsel %vm3973_vm7, 0.0, %v3977_v59  ;;  %vm3987_vm8 = vcmp.eq.s32.totalorder %v694_v10, 0  ;;  %vm3993_vm9 = vcmp.eq.s32.totalorder %v750_v13, 0  ;;  %v1111_v20 = vld [vmem:[#allocation2 + $0x78] sm:$0xff]  ;;  %v1104_v30 = vld [vmem:[#allocation2 + $0x40] sm:$0xff]  ;;  %v3105_v41 = vld [vmem:[#allocation9 + $0x58] sm:$0xff] }
 0x283   : > { %v3985_v15 = vpack.c.bf16 %v2344_v63, %v3979_v61  ;;  %2090 = vmatpush.bf16.msra.mxu2 %v3107_v60  ;;  %2252 = vmatpush.bf16.msra.mxu3 %v3109_v11  ;;  %v3999_v22 = vld [vmem:[#allocation2 + $0x3f] sm:$0xff]  ;;  %v942_v27 = vsel %vm3987_vm8, 0.0, %v3991_v17  ;;  %v950_v32 = vsel %vm3993_vm9, 0.0, %v3997_v19  ;;  %v4009_v6 = vpack.c.bf16 %v1112_v21, %v1111_v20  ;;  %v1260_v42 = vld [vmem:[#allocation2 + $0x11] sm:$0xff]  ;;  %v1259_v3 = vld [vmem:[#allocation2 + $0x9] sm:$0xff]  ;;  %s2739_s27 = sshll.u32 %s2736_s4, 4  ;;  %s2740_s27 = int_to_ptr.hbm [resolvable:$true] %s2739_s27 }
 0x284   : > { %v1103_v28 = vld [vmem:[#allocation2 + $0x38] sm:$0xff]  ;;  %1912 = vmatpush.bf16.msrb.mxu1 %v3105_v41  ;;  %v1485_v43 = vsel %vm3851_vm1, 0.0, %v3906_v24  ;;  %v1308_v4 = vsel %vm3973_vm7, 0.0, %v1260_v42  ;;  %v635_v44 = vadd.s32 24, %v3835_v46  ;;  %v1262_v8 = vld [vmem:[#allocation2 + $0x21] sm:$0xff]  ;;  %v637_v57 = vadd.s32 40, %v3835_v46 }
 0x285   : > { %v4004_v31 = vld [vmem:[#allocation2 + $0x7f] sm:$0xff]  ;;  %v1517_v5 = vpack.c.bf16 %v3916_v29, %v1485_v43  ;;  %v1339_v7 = vpack.c.bf16 %v1308_v4, %v1259_v3  ;;  %v1826_v24 = vsel %vm3973_vm7, 0.0, %v1262_v8  ;;  %v1489_v10 = vsel %vm3940_vm5, 0.0, %v3991_v17  ;;  %v4098_v3 = vld [vmem:[#allocation2 + $0x51] sm:$0xff]  ;;  %v4100_v4 = vld [vmem:[#allocation2 + $0x49] sm:$0xff]  ;;  %s2723_s30 = scalar_lea.sflag [#allocation8], %s3633_s10 }
 0x286   : > { %v975_v39 = vpack.c.bf16 %v4004_v31, %v950_v32  ;;  %v3111_v40 = vld [vmem:[#allocation9 + $0x88] sm:$0xff]  ;;  %v3104_v34 = vld [vmem:[#allocation9 + $0x50] sm:$0xff]  ;;  %v687_v63 = vand.u32 15, %v637_v57  ;;  %v1519_v13 = vpack.c.bf16 %v3999_v22, %v1489_v10  ;;  %v639_v21 = vadd.s32 56, %v3835_v46  ;;  %s3367_s5 = sshra.s32 %s2740_s27, 4  ;;  %s3368_s5 = int_to_ptr.hbm [resolvable:$true] %s3367_s5 }
 0x287   : > { %2430 = vmatpush.bf16.msra.mxu0 %v3111_v40  ;;  %v1261_v58 = vld [vmem:[#allocation2 + $0x19] sm:$0xff]  ;;  %v641_v43 = vadd.s32 72, %v3835_v46  ;;  %s3369_s22 = scalar_lea.hbm %s3368_s5, 128  ;;  %p3374_p0 = scmp.lt.s32.totalorder %s3368_s5, %s4693_s17 }
 0x288   : > { %1913 = vmatpush.bf16.msrb.mxu1 %v3104_v34  ;;  %vm4055_vm11 = vcmp.eq.s32.totalorder %v687_v63, 15  ;;  %v701_v32 = vand.u32 15, %v639_v21  ;;  %v4127_v57 = vld [vmem:[#allocation2 + $0x59] sm:$0xff]  ;;  %p3370_p11 = scmp.ne.s32.totalorder %s3368_s5, %s3369_s22 }
 0x289   : > { %v1312_v11 = vsel %vm4055_vm11, 0.0, %v3977_v59  ;;  %v953_v63 = vld [vmem:[#allocation3 + $0x8] sm:$0xff] }
 0x28a   : > { %2946 = vmatmul.msk.bf16.gmra.mxu3 %vm405_vm0, %v3926_v35  ;;  %v1341_v20 = vpack.c.bf16 %v1312_v11, %v3979_v61  ;;  %vm4081_vm12 = vcmp.eq.s32.totalorder %v701_v32, 15  ;;  %p3371_p12 = pnand %p3370_p11, %p3606_p3 }
 0x28c   : > { %2942 = vmatmul.msk.bf16.gmra.mxu1 %vm405_vm0, %v3929_v37  ;;  %p3372_p13 = pneg %p3371_p12 }
 0x28d   : > { %2926 = vmatmul.msk.bf16.gmra.mxu0 %vm405_vm0, %v969_v36  ;;  %v971_v36 = vpack.c.bf16 %v3999_v22, %v942_v27  ;;  %v4072_v27 = vld [vmem:[#allocation2 + $0x41] sm:$0xff] }
 0x28e   : > { %2930 = vmatmul.msk.bf16.gmra.mxu2 %vm405_vm0, %v973_v38  ;;  %v4012_v38 = vpack.c.bf16 %v1104_v30, %v1103_v28  ;;  %v3106_v28 = vld [vmem:[#allocation9 + $0x60] sm:$0xff]  ;;  %v4074_v30 = vld [vmem:[#allocation2 + $0x39] sm:$0xff]  ;;  %v1314_v40 = vsel %vm4081_vm12, 0.0, %v4072_v27 }
 0x28f   : > { %2091 = vmatpush.bf16.msra.mxu2 %v3106_v28  ;;  %v1342_v42 = vpack.c.bf16 %v1314_v40, %v4074_v30  ;;  %v961_v40 = vld [vmem:[#allocation3 + $0x48] sm:$0xff] }
 0x29a   : > { %2947 = vmatmul.msk.bf16.gmra.mxu3 %vm405_vm0, %v3959_v47 }
 0x29c   : > { %2943 = vmatmul.msk.bf16.gmra.mxu1 %vm405_vm0, %v3962_v49 }
 0x29d   : > { %2927 = vmatmul.msk.bf16.gmra.mxu0 %vm405_vm0, %v970_v48  ;;  %v1857_v48 = vpack.c.bf16 %v1826_v24, %v1261_v58 }
 0x29e   : > { %2931 = vmatmul.msk.bf16.gmra.mxu2 %vm405_vm0, %v974_v50  ;;  %v673_v50 = vand.u32 15, %v635_v44 }
 0x2a0   : > { %vm4035_vm10 = vcmp.eq.s32.totalorder %v673_v50, 15 }
 0x2a1   : > { %v1310_v51 = vsel %vm4035_vm10, 0.0, %v1262_v8  ;;  %v1828_v60 = vsel %vm4035_vm10, 0.0, %v3977_v59  ;;  %v1830_v59 = vsel %vm4055_vm11, 0.0, %v4072_v27 }
 0x2a2   : > { %v1340_v55 = vpack.c.bf16 %v1310_v51, %v1261_v58  ;;  %v952_v58 = vld [vmem:[#allocation3] sm:$0xff]  ;;  %v643_v51 = vadd.s32 88, %v3835_v46 }
 0x2aa   : > { %2948 = vmatmul.msk.bf16.gmra.mxu3 %vm405_vm0, %v4009_v6 }
 0x2ac   : > { %2944 = vmatmul.msk.bf16.gmra.mxu1 %vm405_vm0, %v4012_v38 }
 0x2ad   : > { %2928 = vmatmul.msk.bf16.gmra.mxu0 %vm405_vm0, %v971_v36 }
 0x2ae   : > { %2932 = vmatmul.msk.bf16.gmra.mxu2 %vm405_vm0, %v975_v39  ;;  %v1491_v39 = vsel %vm3987_vm8, 0.0, %v3843_v53  ;;  %v3108_v53 = vld [vmem:[#allocation9 + $0x70] sm:$0xff] }
 0x2af   : > { %v1520_v41 = vpack.c.bf16 %v3855_v62, %v1491_v39  ;;  %v1832_v62 = vsel %vm4081_vm12, 0.0, %v4098_v3  ;;  %2253 = vmatpush.bf16.msra.mxu3 %v3108_v53 }
 0x2ba   : > { %2973 = vmatmul.msk.bf16.vlgmr.msrb.gmra.mxu3 %vm405_vm0, %v1517_v5  ;;  %v715_v5 = vand.u32 15, %v641_v43  ;;  %v954_v43 = vld [vmem:[#allocation3 + $0x10] sm:$0xff] }
 0x2bc   : > { %3005 = vmatmul.msk.bf16.vlgmr.msrb.gmra.mxu1 %vm405_vm0, %v1857_v48  ;;  %vm4107_vm13 = vcmp.eq.s32.totalorder %v715_v5, 15 }
 0x2bd   : > { %2989 = vmatmul.msk.bf16.vlgmr.msrb.gmra.mxu0 %vm405_vm0, %v3929_v37  ;;  %v1487_v37 = vsel %vm3902_vm3, 0.0, %v3847_v56  ;;  %v1858_v56 = vpack.c.bf16 %v1828_v60, %v3979_v61  ;;  %v1859_v61 = vpack.c.bf16 %v1830_v59, %v4074_v30  ;;  %v1316_v8 = vsel %vm4107_vm13, 0.0, %v4098_v3 }
 0x2be   : > { %2957 = vmatmul.msk.bf16.vlgmr.msrb.gmra.mxu2 %vm405_vm0, %v1339_v7  ;;  %v1518_v52 = vpack.c.bf16 %v3859_v9, %v1487_v37  ;;  %v1860_v7 = vpack.c.bf16 %v1832_v62, %v4100_v4  ;;  %v1343_v24 = vpack.c.bf16 %v1316_v8, %v4100_v4  ;;  %v1495_v59 = vsel %vm3910_vm4, 0.0, %v3948_v2 }
 0x2ca   : > { %2974 = vmatmul.msk.bf16.gmra.mxu3 %vm405_vm0, %v1518_v52  ;;  %v4125_v52 = vld [vmem:[#allocation2 + $0x61] sm:$0xff] }
 0x2cb   : > { %v1834_v60 = vsel %vm4107_vm13, 0.0, %v4125_v52 }
 0x2cc   : > { %3006 = vmatmul.msk.bf16.gmra.mxu1 %vm405_vm0, %v1858_v56  ;;  %v729_v56 = vand.u32 15, %v643_v51  ;;  %v1861_v10 = vpack.c.bf16 %v1834_v60, %v4127_v57  ;;  %v4159_v51 = vld [vmem:[#allocation2 + $0x69] sm:$0xff] }
 0x2cd   : > { %2990 = vmatmul.msk.bf16.gmra.mxu0 %vm405_vm0, %v3962_v49 }
 0x2ce   : > { %2958 = vmatmul.msk.bf16.gmra.mxu2 %vm405_vm0, %v1340_v55  ;;  %v960_v55 = vld [vmem:[#allocation3 + $0x40] sm:$0xff]  ;;  %vm4135_vm14 = vcmp.eq.s32.totalorder %v729_v56, 15 }
 0x2da   : > { %2975 = vmatmul.msk.bf16.gmra.mxu3 %vm405_vm0, %v1519_v13 }
 0x2dc   : > { %3007 = vmatmul.msk.bf16.gmra.mxu1 %vm405_vm0, %v1859_v61 }
 0x2dd   : > { %2991 = vmatmul.msk.bf16.gmra.mxu0 %vm405_vm0, %v4012_v38 }
 0x2de   : > { %2959 = vmatmul.msk.bf16.gmra.mxu2 %vm405_vm0, %v1341_v20 }
 0x2ea   : > { %2976 = vmatmul.msk.bf16.gmra.mxu3 %vm405_vm0, %v1520_v41  ;;  %v1318_v41 = vsel %vm4135_vm14, 0.0, %v4125_v52 }
 0x2eb   : > { %v1344_v5 = vpack.c.bf16 %v1318_v41, %v4127_v57 }
 0x2ec   : > { %3008 = vmatmul.msk.bf16.gmra.mxu1 %vm405_vm0, %v1860_v7 }
 0x2ed   : > { %2992 = vmatmul.msk.bf16.gmra.mxu0 %vm405_vm0, %v3845_v54  ;;  %v1493_v54 = vsel %vm3866_vm2, 0.0, %v3914_v26 }
 0x2ee   : > { %2960 = vmatmul.msk.bf16.gmra.mxu2 %vm405_vm0, %v1342_v42  ;;  %v1521_v34 = vpack.c.bf16 %v3921_v33, %v1493_v54  ;;  %v3110_v33 = vld [vmem:[#allocation9 + $0x80] sm:$0xff]  ;;  %v1522_v42 = vpack.c.bf16 %v3954_v45, %v1495_v59 }
 0x2ef   : > { %2431 = vmatpush.bf16.msra.mxu0 %v3110_v33 }
 0x2f9   : > { %v1187_v50 = vpop.f32.mrf.mxu1 }
 0x2fa   : > { %v1025_v48 = vpop.f32.mrf.mxu0  ;;  %2977 = vmatmul.msk.bf16.gmra.mxu3 %vm405_vm0, %v1521_v34 }
 0x2fb   : > { %v1065_v37 = vadd.f32 %v1025_v48, %v952_v58  ;;  %v645_v58 = vadd.s32 104, %v3835_v46 }
 0x2fc   : > { %3009 = vmatmul.msk.bf16.gmra.mxu1 %vm405_vm0, %v1861_v10 }
 0x2fd   : > { %1081 = vst.msk [vmem:[#allocation3] sm:$0xff] %vm405_vm0, %v1065_v37  ;;  %2993 = vmatmul.msk.bf16.gmra.mxu0 %vm405_vm0, %v3926_v35  ;;  %v1207_v26 = vpop.f32.mrf.mxu3  ;;  %v962_v37 = vld [vmem:[#allocation3 + $0x50] sm:$0xff]  ;;  %v743_v33 = vand.u32 15, %v645_v58 }
 0x2fe   : > { %2961 = vmatmul.msk.bf16.gmra.mxu2 %vm405_vm0, %v1343_v24 }
 0x2ff   : > { %vm4168_vm15 = vcmp.eq.s32.totalorder %v743_v33, 15 }
 0x301   : > { %v1045_v11 = vpop.f32.mrf.mxu2  ;;  %v1189_v20 = vpop.f32.mrf.mxu1 }
 0x302   : > { %v1073_v35 = vadd.f32 %v1045_v11, %v960_v55  ;;  %v1027_v13 = vpop.f32.mrf.mxu0  ;;  %v955_v55 = vld [vmem:[#allocation3 + $0x18] sm:$0xff] }
 0x303   : > { %v1066_v21 = vadd.f32 %v1027_v13, %v953_v63 }
 0x304   : > { %1089 = vst.msk [vmem:[#allocation3 + $0x40] sm:$0xff] %vm405_vm0, %v1073_v35  ;;  %v1113_v32 = vld [vmem:[#allocation3] sm:$0xff] }
 0x305   : > { %1082 = vst.msk [vmem:[#allocation3 + $0x8] sm:$0xff] %vm405_vm0, %v1066_v21  ;;  %v1227_v61 = vadd.f32 %v1187_v50, %v1113_v32  ;;  %v1209_v39 = vpop.f32.mrf.mxu3  ;;  %v4157_v50 = vld [vmem:[#allocation2 + $0x71] sm:$0xff]  ;;  %v1497_v21 = vsel %vm3944_vm6, 0.0, %v3997_v19 }
 0x306   : > { %v1523_v41 = vpack.c.bf16 %v4004_v31, %v1497_v21 }
 0x307   : > { %1243 = vst.msk [vmem:[#allocation3] sm:$0xff] %vm405_vm0, %v1227_v61 }
 0x309   : > { %v1047_v53 = vpop.f32.mrf.mxu2  ;;  %v1192_v7 = vpop.f32.mrf.mxu1 }
 0x30a   : > { %v1074_v62 = vadd.f32 %v1047_v53, %v961_v40  ;;  %v1030_v2 = vpop.f32.mrf.mxu0  ;;  %2978 = vmatmul.msk.bf16.gmra.mxu3 %vm405_vm0, %v1522_v42  ;;  %v963_v40 = vld [vmem:[#allocation3 + $0x58] sm:$0xff]  ;;  %v956_v42 = vld [vmem:[#allocation3 + $0x20] sm:$0xff] }
 0x30b   : > { %v1121_v54 = vld [vmem:[#allocation3 + $0x40] sm:$0xff]  ;;  %v1067_v8 = vadd.f32 %v1030_v2, %v954_v43 }
 0x30c   : > { %v1235_v34 = vadd.f32 %v1207_v26, %v1121_v54  ;;  %1090 = vst.msk [vmem:[#allocation3 + $0x48] sm:$0xff] %vm405_vm0, %v1074_v62  ;;  %v1114_v24 = vld [vmem:[#allocation3 + $0x8] sm:$0xff]  ;;  %v1836_v26 = vsel %vm4135_vm14, 0.0, %v4157_v50 }
 0x30d   : > { %1083 = vst.msk [vmem:[#allocation3 + $0x10] sm:$0xff] %vm405_vm0, %v1067_v8  ;;  %v1228_v45 = vadd.f32 %v1189_v20, %v1114_v24  ;;  %2994 = vmatmul.msk.bf16.gmra.mxu0 %vm405_vm0, %v3959_v47  ;;  %v1212_v48 = vpop.f32.mrf.mxu3  ;;  %v1862_v47 = vpack.c.bf16 %v1836_v26, %v4159_v51  ;;  %v647_v8 = vadd.s32 120, %v3835_v46  ;;  %v4191_v24 = vld [vmem:[#allocation2 + $0x81] sm:$0xff]  ;;  %v957_v26 = vld [vmem:[#allocation3 + $0x28] sm:$0xff] }
 0x30e   : > { %1251 = vst.msk [vmem:[#allocation3 + $0x40] sm:$0xff] %vm405_vm0, %v1235_v34  ;;  %2962 = vmatmul.msk.bf16.gmra.mxu2 %vm405_vm0, %v1344_v5  ;;  %v1838_v46 = vsel %vm4168_vm15, 0.0, %v4191_v24 }
 0x30f   : > { %1244 = vst.msk [vmem:[#allocation3 + $0x8] sm:$0xff] %vm405_vm0, %v1228_v45  ;;  %3010 = vmatmul.msk.bf16.gmra.mxu1 %vm405_vm0, %v1862_v47  ;;  %v964_v45 = vld [vmem:[#allocation3 + $0x60] sm:$0xff] }
 0x311   : > { %v1050_v60 = vpop.f32.mrf.mxu2  ;;  %v1194_v10 = vpop.f32.mrf.mxu1 }
 0x312   : > { %v1075_v56 = vadd.f32 %v1050_v60, %v962_v37  ;;  %v1032_v63 = vpop.f32.mrf.mxu0  ;;  %v757_v37 = vand.u32 15, %v647_v8 }
 0x313   : > { %v1122_v11 = vld [vmem:[#allocation3 + $0x48] sm:$0xff]  ;;  %v1068_v35 = vadd.f32 %v1032_v63, %v955_v55  ;;  %v4200_v55 = vld [vmem:[#allocation2 + $0x87] sm:$0xff] }
 0x314   : > { %v1236_v13 = vadd.f32 %v1209_v39, %v1122_v11  ;;  %1091 = vst.msk [vmem:[#allocation3 + $0x50] sm:$0xff] %vm405_vm0, %v1075_v56  ;;  %v1115_v59 = vld [vmem:[#allocation3 + $0x10] sm:$0xff]  ;;  %v1320_v39 = vsel %vm4168_vm15, 0.0, %v4157_v50  ;;  %vm4204_vm1 = vcmp.eq.s32.totalorder %v757_v37, 15  ;;  %v1499_v21 = vsel %vm3993_vm9, 0.0, %v4200_v55 }
 0x315   : > { %1084 = vst.msk [vmem:[#allocation3 + $0x18] sm:$0xff] %vm405_vm0, %v1068_v35  ;;  %v1229_v32 = vadd.f32 %v1192_v7, %v1115_v59  ;;  %v1214_v61 = vpop.f32.mrf.mxu3  ;;  %v1345_v19 = vpack.c.bf16 %v1320_v39, %v4159_v51  ;;  %v1662_v39 = vld [vmem:[#allocation2 + $0x90] sm:$0xff] }
 0x316   : > { %1252 = vst.msk [vmem:[#allocation3 + $0x48] sm:$0xff] %vm405_vm0, %v1236_v13  ;;  %v4208_v13 = vld [vmem:[#allocation2 + $0x8f] sm:$0xff] }
 0x317   : > { %1245 = vst.msk [vmem:[#allocation3 + $0x10] sm:$0xff] %vm405_vm0, %v1229_v32 }
 0x319   : > { %v1052_v43 = vpop.f32.mrf.mxu2  ;;  %v1197_v5 = vpop.f32.mrf.mxu1 }
 0x31a   : > { %v1076_v53 = vadd.f32 %v1052_v43, %v963_v40  ;;  %v1035_v62 = vpop.f32.mrf.mxu0  ;;  %2979 = vmatmul.msk.bf16.gmra.mxu3 %vm405_vm0, %v1523_v41  ;;  %v965_v41 = vld [vmem:[#allocation3 + $0x68] sm:$0xff]  ;;  %v1524_v43 = vpack.c.bf16 %v4208_v13, %v1499_v21 }
 0x31b   : > { %v1123_v2 = vld [vmem:[#allocation3 + $0x50] sm:$0xff]  ;;  %v1069_v7 = vadd.f32 %v1035_v62, %v956_v42  ;;  %v1322_v42 = vsel %vm4204_vm1, 0.0, %v4191_v24 }
 0x31c   : > { %v1237_v54 = vadd.f32 %v1212_v48, %v1123_v2  ;;  %1092 = vst.msk [vmem:[#allocation3 + $0x58] sm:$0xff] %vm405_vm0, %v1076_v53  ;;  %v1116_v34 = vld [vmem:[#allocation3 + $0x18] sm:$0xff]  ;;  %v4193_v48 = vld [vmem:[#allocation2 + $0x79] sm:$0xff] }
 0x31d   : > { %1085 = vst.msk [vmem:[#allocation3 + $0x20] sm:$0xff] %vm405_vm0, %v1069_v7  ;;  %v1230_v31 = vadd.f32 %v1194_v10, %v1116_v34  ;;  %2995 = vmatmul.msk.bf16.gmra.mxu0 %vm405_vm0, %v4009_v6  ;;  %v1217_v58 = vpop.f32.mrf.mxu3  ;;  %v1863_v6 = vpack.c.bf16 %v1838_v46, %v4193_v48  ;;  %v958_v53 = vld [vmem:[#allocation3 + $0x30] sm:$0xff] }
 0x31e   : > { %1253 = vst.msk [vmem:[#allocation3 + $0x50] sm:$0xff] %vm405_vm0, %v1237_v54  ;;  %2963 = vmatmul.msk.bf16.gmra.mxu2 %vm405_vm0, %v1345_v19 }
 0x31f   : > { %1246 = vst.msk [vmem:[#allocation3 + $0x18] sm:$0xff] %vm405_vm0, %v1230_v31  ;;  %3011 = vmatmul.msk.bf16.gmra.mxu1 %vm405_vm0, %v1863_v6  ;;  %v966_v6 = vld [vmem:[#allocation3 + $0x70] sm:$0xff] }
 0x321   : > { %v1055_v33 = vpop.f32.mrf.mxu2  ;;  %v1199_v10 = vpop.f32.mrf.mxu1 }
 0x322   : > { %v1077_v47 = vadd.f32 %v1055_v33, %v964_v45  ;;  %v1037_v60 = vpop.f32.mrf.mxu0 }
 0x323   : > { %v1124_v56 = vld [vmem:[#allocation3 + $0x58] sm:$0xff]  ;;  %v1070_v63 = vadd.f32 %v1037_v60, %v957_v26  ;;  %v4230_v26 = vld [vmem:[#allocation2 + $0x91] sm:$0xff] }
 0x324   : > { %v1238_v11 = vadd.f32 %v1214_v61, %v1124_v56  ;;  %1093 = vst.msk [vmem:[#allocation3 + $0x60] sm:$0xff] %vm405_vm0, %v1077_v47  ;;  %v1117_v59 = vld [vmem:[#allocation3 + $0x20] sm:$0xff]  ;;  %v1661_v61 = vld [vmem:[#allocation2 + $0x88] sm:$0xff]  ;;  %v1840_v33 = vsel %vm4204_vm1, 0.0, %v4230_v26 }
 0x325   : > { %1086 = vst.msk [vmem:[#allocation3 + $0x28] sm:$0xff] %vm405_vm0, %v1070_v63  ;;  %v1231_v32 = vadd.f32 %v1197_v5, %v1117_v59  ;;  %v1219_v40 = vpop.f32.mrf.mxu3  ;;  %v4220_v62 = vpack.c.bf16 %v1662_v39, %v1661_v61  ;;  %v1346_v5 = vpack.c.bf16 %v1322_v42, %v4193_v48  ;;  %v959_v47 = vld [vmem:[#allocation3 + $0x38] sm:$0xff] }
 0x326   : > { %1254 = vst.msk [vmem:[#allocation3 + $0x58] sm:$0xff] %vm405_vm0, %v1238_v11 }
 0x327   : > { %1247 = vst.msk [vmem:[#allocation3 + $0x20] sm:$0xff] %vm405_vm0, %v1231_v32 }
 0x329   : > { %v1057_v19 = vpop.f32.mrf.mxu2  ;;  %v1202_v46 = vpop.f32.mrf.mxu1 }
 0x32a   : > { %v1078_v2 = vadd.f32 %v1057_v19, %v965_v41  ;;  %v1040_v7 = vpop.f32.mrf.mxu0  ;;  %2980 = vmatmul.msk.bf16.gmra.mxu3 %vm405_vm0, %v1524_v43  ;;  %v967_v41 = vld [vmem:[#allocation3 + $0x78] sm:$0xff] }
 0x32b   : > { %v1125_v54 = vld [vmem:[#allocation3 + $0x60] sm:$0xff]  ;;  %v1071_v8 = vadd.f32 %v1040_v7, %v958_v53 }
 0x32c   : > { %v1239_v34 = vadd.f32 %v1217_v58, %v1125_v54  ;;  %1094 = vst.msk [vmem:[#allocation3 + $0x68] sm:$0xff] %vm405_vm0, %v1078_v2  ;;  %v1118_v31 = vld [vmem:[#allocation3 + $0x28] sm:$0xff]  ;;  %v4233_v58 = vld [vmem:[#allocation2 + $0x89] sm:$0xff] }
 0x32d   : > { %1087 = vst.msk [vmem:[#allocation3 + $0x30] sm:$0xff] %vm405_vm0, %v1071_v8  ;;  %v1232_v45 = vadd.f32 %v1199_v10, %v1118_v31  ;;  %2996 = vmatmul.msk.bf16.gmra.mxu0 %vm405_vm0, %v4220_v62  ;;  %v1222_v37 = vpop.f32.mrf.mxu3  ;;  %v1864_v60 = vpack.c.bf16 %v1840_v33, %v4233_v58  ;;  %v1324_v33 = vld [vmem:[#allocation3 + $0x8] sm:$0xff] }
 0x32e   : > { %1255 = vst.msk [vmem:[#allocation3 + $0x60] sm:$0xff] %vm405_vm0, %v1239_v34  ;;  %2964 = vmatmul.msk.bf16.gmra.mxu2 %vm405_vm0, %v1346_v5  ;;  %v1323_v34 = vld [vmem:[#allocation3] sm:$0xff] }
 0x32f   : > { %1248 = vst.msk [vmem:[#allocation3 + $0x28] sm:$0xff] %vm405_vm0, %v1232_v45  ;;  %3012 = vmatmul.msk.bf16.gmra.mxu1 %vm405_vm0, %v1864_v60 }
 0x331   : > { %v1060_v56 = vpop.f32.mrf.mxu2  ;;  %v1204_v42 = vpop.f32.mrf.mxu1 }
 0x332   : > { %v1079_v63 = vadd.f32 %v1060_v56, %v966_v6  ;;  %v1042_v10 = vpop.f32.mrf.mxu0  ;;  %v2005_v6 = vsel %vm3902_vm3, 0.0, %v3991_v17  ;;  %v1325_v17 = vld [vmem:[#allocation3 + $0x10] sm:$0xff] }
 0x333   : > { %v1126_v11 = vld [vmem:[#allocation3 + $0x68] sm:$0xff]  ;;  %v1072_v21 = vadd.f32 %v1042_v10, %v959_v47  ;;  %v2036_v10 = vpack.c.bf16 %v3999_v22, %v2005_v6 }
 0x334   : > { %v1240_v59 = vadd.f32 %v1219_v40, %v1126_v11  ;;  %1095 = vst.msk [vmem:[#allocation3 + $0x70] sm:$0xff] %vm405_vm0, %v1079_v63  ;;  %v1119_v32 = vld [vmem:[#allocation3 + $0x30] sm:$0xff] }
 0x335   : > { %1088 = vst.msk [vmem:[#allocation3 + $0x38] sm:$0xff] %vm405_vm0, %v1072_v21  ;;  %v1233_v61 = vadd.f32 %v1202_v46, %v1119_v32  ;;  %v1224_v39 = vpop.f32.mrf.mxu3 }
 0x336   : > { %1256 = vst.msk [vmem:[#allocation3 + $0x68] sm:$0xff] %vm405_vm0, %v1240_v59 }
 0x337   : > { %1249 = vst.msk [vmem:[#allocation3 + $0x30] sm:$0xff] %vm405_vm0, %v1233_v61 }
 0x339   : > { %v1062_v43 = vpop.f32.mrf.mxu2  ;;  %v4253_v8 = vpop.f32.mrf.mxu1 }
 0x33a   : > { %v1080_v53 = vadd.f32 %v1062_v43, %v967_v41  ;;  %v1737_v19 = vpop.f32.mrf.mxu0  ;;  %3037 = vmatmul.msk.bf16.vlgmr.msra.gmra.mxu3 %vm405_vm0, %v3962_v49  ;;  %v2170_v41 = vld [vmem:[#allocation2 + $0x50] sm:$0xff] }
 0x33b   : > { %v1127_v2 = vld [vmem:[#allocation3 + $0x70] sm:$0xff] }
 0x33c   : > { %v1241_v40 = vadd.f32 %v1222_v37, %v1127_v2  ;;  %1096 = vst.msk [vmem:[#allocation3 + $0x78] sm:$0xff] %vm405_vm0, %v1080_v53  ;;  %v1120_v5 = vld [vmem:[#allocation3 + $0x38] sm:$0xff]  ;;  %v2348_v2 = vsel %vm4055_vm11, 0.0, %v4098_v3 }
 0x33d   : > { %v1234_v7 = vadd.f32 %v1204_v42, %v1120_v5  ;;  %3053 = vmatmul.msk.bf16.vlgmr.msra.gmra.mxu0 %vm405_vm0, %v3985_v15  ;;  %v1575_v54 = vpop.f32.mrf.mxu3 }
 0x33e   : > { %1257 = vst.msk [vmem:[#allocation3 + $0x70] sm:$0xff] %vm405_vm0, %v1241_v40  ;;  %3021 = vmatmul.msk.bf16.vlgmr.msra.gmra.mxu2 %vm405_vm0, %v3871_v14  ;;  %v2346_v14 = vsel %vm4035_vm10, 0.0, %v4072_v27  ;;  %v1992_v40 = vld [vmem:[#allocation2 + $0x4f] sm:$0xff] }
 0x33f   : > { %1250 = vst.msk [vmem:[#allocation3 + $0x38] sm:$0xff] %vm405_vm0, %v1234_v7  ;;  %v2376_v60 = vpack.c.bf16 %v2346_v14, %v4074_v30 }
 0x341   : > { %v1397_v49 = vpop.f32.mrf.mxu2  ;;  %v4264_v56 = vpop.f32.mrf.mxu1 }
 0x342   : > { %v1437_v31 = vadd.f32 %v1397_v49, %v1323_v34  ;;  %v1739_v45 = vpop.f32.mrf.mxu0  ;;  %v1326_v34 = vld [vmem:[#allocation3 + $0x18] sm:$0xff] }
 0x343   : > { %v1128_v46 = vld [vmem:[#allocation3 + $0x78] sm:$0xff] }
 0x344   : > { %v1242_v37 = vadd.f32 %v1224_v39, %v1128_v46  ;;  %1453 = vst.msk [vmem:[#allocation3] sm:$0xff] %vm405_vm0, %v1437_v31  ;;  %v2169_v39 = vld [vmem:[#allocation2 + $0x48] sm:$0xff] }
 0x345   : > { %v1577_v15 = vpop.f32.mrf.mxu3  ;;  %v2199_v7 = vpack.c.bf16 %v2170_v41, %v2169_v39 }
 0x346   : > { %1258 = vst.msk [vmem:[#allocation3 + $0x78] sm:$0xff] %vm405_vm0, %v1242_v37 }
 0x349   : > { %v1399_v47 = vpop.f32.mrf.mxu2  ;;  %v4277_v32 = vpop.f32.mrf.mxu1 }
 0x34a   : > { %v1438_v63 = vadd.f32 %v1399_v47, %v1324_v33  ;;  %v4267_v11 = vpop.f32.mrf.mxu0  ;;  %3038 = vmatmul.msk.bf16.gmra.mxu3 %vm405_vm0, %v4012_v38  ;;  %v1991_v38 = vld [vmem:[#allocation2 + $0x47] sm:$0xff]  ;;  %v1327_v47 = vld [vmem:[#allocation3 + $0x20] sm:$0xff] }
 0x34b   : > { %v1501_v21 = vld [vmem:[#allocation3] sm:$0xff]  ;;  %v2007_v5 = vsel %vm3940_vm5, 0.0, %v1991_v38  ;;  %v1994_v38 = vld [vmem:[#allocation2 + $0x5f] sm:$0xff] }
 0x34c   : > { %v1615_v29 = vadd.f32 %v1575_v54, %v1501_v21  ;;  %1454 = vst.msk [vmem:[#allocation3 + $0x8] sm:$0xff] %vm405_vm0, %v1438_v63  ;;  %v3113_v54 = vld [vmem:[%s4626_s6 + $0x8] sm:$0xff]  ;;  %v2037_v46 = vpack.c.bf16 %v1992_v40, %v2007_v5 }
 0x34d   : > { %3054 = vmatmul.msk.bf16.gmra.mxu0 %vm405_vm0, %v2376_v60  ;;  %v1580_v23 = vpop.f32.mrf.mxu3  ;;  %2615 = vmatpush.bf16.msra.mxu1 %v3113_v54 }
 0x34e   : > { %1631 = vst.msk [vmem:[#allocation3] sm:$0xff] %vm405_vm0, %v1615_v29  ;;  %3022 = vmatmul.msk.bf16.gmra.mxu2 %vm405_vm0, %v2036_v10 }
 0x351   : > { %v1402_v27 = vpop.f32.mrf.mxu2 }
 0x352   : > { %v1439_v30 = vadd.f32 %v1402_v27, %v1325_v17  ;;  %v4275_v22 = vpop.f32.mrf.mxu0  ;;  %v2172_v17 = vld [vmem:[#allocation2 + $0x60] sm:$0xff] }
 0x353   : > { %v1502_v59 = vld [vmem:[#allocation3 + $0x8] sm:$0xff] }
 0x354   : > { %v1616_v61 = vadd.f32 %v1577_v15, %v1502_v59  ;;  %1455 = vst.msk [vmem:[#allocation3 + $0x10] sm:$0xff] %vm405_vm0, %v1439_v30  ;;  %v4296_v15 = vpop.f32.mrf.mxu1  ;;  %v2350_v59 = vsel %vm4081_vm12, 0.0, %v4125_v52 }
 0x355   : > { %v1663_v42 = vld [vmem:[#allocation3] sm:$0xff]  ;;  %v1582_v53 = vpop.f32.mrf.mxu3 }
 0x356   : > { %1632 = vst.msk [vmem:[#allocation3 + $0x8] sm:$0xff] %vm405_vm0, %v1616_v61  ;;  %v1777_v43 = vadd.f32 %v1737_v19, %v1663_v42  ;;  %v2377_v19 = vpack.c.bf16 %v2348_v2, %v4100_v4 }
 0x358   : > { %1793 = vst.msk [vmem:[#allocation3] sm:$0xff] %vm405_vm0, %v1777_v43 }
 0x359   : > { %v1404_v49 = vpop.f32.mrf.mxu2 }
 0x35a   : > { %v1440_v31 = vadd.f32 %v1404_v49, %v1326_v34  ;;  %v4291_v37 = vpop.f32.mrf.mxu0  ;;  %3039 = vmatmul.msk.bf16.gmra.mxu3 %vm405_vm0, %v2199_v7  ;;  %v1329_v49 = vld [vmem:[#allocation3 + $0x30] sm:$0xff] }
 0x35b   : > { %v1503_v9 = vld [vmem:[#allocation3 + $0x10] sm:$0xff] }
 0x35c   : > { %v1617_v0 = vadd.f32 %v1580_v23, %v1503_v9  ;;  %1456 = vst.msk [vmem:[#allocation3 + $0x18] sm:$0xff] %vm405_vm0, %v1440_v31  ;;  %v2171_v23 = vld [vmem:[#allocation2 + $0x58] sm:$0xff]  ;;  %v4313_v42 = vpop.f32.mrf.mxu1 }
 0x35d   : > { %v1664_v3 = vld [vmem:[#allocation3 + $0x8] sm:$0xff]  ;;  %3055 = vmatmul.msk.bf16.gmra.mxu0 %vm405_vm0, %v2377_v19  ;;  %v1585_v4 = vpop.f32.mrf.mxu3  ;;  %v2200_v41 = vpack.c.bf16 %v2172_v17, %v2171_v23  ;;  %v1330_v23 = vld [vmem:[#allocation3 + $0x38] sm:$0xff] }
 0x35e   : > { %1633 = vst.msk [vmem:[#allocation3 + $0x10] sm:$0xff] %vm405_vm0, %v1617_v0  ;;  %v1778_v14 = vadd.f32 %v1739_v45, %v1664_v3  ;;  %3023 = vmatmul.msk.bf16.gmra.mxu2 %vm405_vm0, %v2037_v46  ;;  %v1993_v45 = vld [vmem:[#allocation2 + $0x57] sm:$0xff] }
 0x35f   : > { %v1841_v6 = vld [vmem:[#allocation3] sm:$0xff]  ;;  %v2009_v39 = vsel %vm3987_vm8, 0.0, %v1993_v45 }
 0x360   : > { %1794 = vst.msk [vmem:[#allocation3 + $0x8] sm:$0xff] %vm405_vm0, %v1778_v14  ;;  %v1955_v33 = vadd.f32 %v4253_v8, %v1841_v6  ;;  %v2038_v52 = vpack.c.bf16 %v1994_v38, %v2009_v39  ;;  %v2173_v14 = vld [vmem:[#allocation2 + $0x68] sm:$0xff]  ;;  %v1331_v39 = vld [vmem:[#allocation3 + $0x40] sm:$0xff] }
 0x361   : > { %v1407_v60 = vpop.f32.mrf.mxu2 }
 0x362   : > { %1971 = vst.msk [vmem:[#allocation3] sm:$0xff] %vm405_vm0, %v1955_v33  ;;  %v1441_v63 = vadd.f32 %v1407_v60, %v1327_v47  ;;  %v4303_v10 = vpop.f32.mrf.mxu0  ;;  %v2352_v47 = vsel %vm4107_vm13, 0.0, %v4157_v50 }
 0x363   : > { %v1504_v21 = vld [vmem:[#allocation3 + $0x18] sm:$0xff] }
 0x364   : > { %v1618_v29 = vadd.f32 %v1582_v53, %v1504_v21  ;;  %1457 = vst.msk [vmem:[#allocation3 + $0x20] sm:$0xff] %vm405_vm0, %v1441_v63  ;;  %v1328_v53 = vld [vmem:[#allocation3 + $0x28] sm:$0xff]  ;;  %v4329_v31 = vpop.f32.mrf.mxu1  ;;  %v1996_v63 = vld [vmem:[#allocation2 + $0x6f] sm:$0xff] }
 0x365   : > { %v1665_v27 = vld [vmem:[#allocation3 + $0x10] sm:$0xff]  ;;  %v1587_v8 = vpop.f32.mrf.mxu3 }
 0x366   : > { %1634 = vst.msk [vmem:[#allocation3 + $0x18] sm:$0xff] %vm405_vm0, %v1618_v29  ;;  %v1779_v30 = vadd.f32 %v4267_v11, %v1665_v27  ;;  %v2378_v11 = vpack.c.bf16 %v2350_v59, %v4127_v57  ;;  %v2379_v27 = vpack.c.bf16 %v2352_v47, %v4159_v51 }
 0x367   : > { %v1842_v61 = vld [vmem:[#allocation3 + $0x8] sm:$0xff] }
 0x368   : > { %1795 = vst.msk [vmem:[#allocation3 + $0x10] sm:$0xff] %vm405_vm0, %v1779_v30  ;;  %v1956_v43 = vadd.f32 %v4264_v56, %v1842_v61 }
 0x369   : > { %v1409_v2 = vpop.f32.mrf.mxu2 }
 0x36a   : > { %1972 = vst.msk [vmem:[#allocation3 + $0x8] sm:$0xff] %vm405_vm0, %v1956_v43  ;;  %v1442_v36 = vadd.f32 %v1409_v2, %v1328_v53  ;;  %v4319_v40 = vpop.f32.mrf.mxu0  ;;  %3040 = vmatmul.msk.bf16.gmra.mxu3 %vm405_vm0, %v2200_v41 }
 0x36b   : > { %v1505_v5 = vld [vmem:[#allocation3 + $0x20] sm:$0xff] }
 0x36c   : > { %v1619_v16 = vadd.f32 %v1585_v4, %v1505_v5  ;;  %1458 = vst.msk [vmem:[#allocation3 + $0x28] sm:$0xff] %vm405_vm0, %v1442_v36  ;;  %v2174_v4 = vld [vmem:[#allocation2 + $0x70] sm:$0xff]  ;;  %v1930_v12 = vpop.f32.mrf.mxu1  ;;  %v2175_v36 = vld [vmem:[#allocation2 + $0x78] sm:$0xff] }
 0x36d   : > { %v1666_v7 = vld [vmem:[#allocation3 + $0x18] sm:$0xff]  ;;  %3056 = vmatmul.msk.bf16.gmra.mxu0 %vm405_vm0, %v2378_v11  ;;  %v1590_v57 = vpop.f32.mrf.mxu3  ;;  %v2201_v29 = vpack.c.bf16 %v2174_v4, %v2173_v14 }
 0x36e   : > { %1635 = vst.msk [vmem:[#allocation3 + $0x20] sm:$0xff] %vm405_vm0, %v1619_v16  ;;  %v1780_v56 = vadd.f32 %v4275_v22, %v1666_v7  ;;  %3024 = vmatmul.msk.bf16.gmra.mxu2 %vm405_vm0, %v2038_v52  ;;  %v1995_v22 = vld [vmem:[#allocation2 + $0x67] sm:$0xff] }
 0x36f   : > { %v1843_v54 = vld [vmem:[#allocation3 + $0x10] sm:$0xff]  ;;  %v2011_v21 = vsel %vm3866_vm2, 0.0, %v1995_v22 }
 0x370   : > { %1796 = vst.msk [vmem:[#allocation3 + $0x18] sm:$0xff] %vm405_vm0, %v1780_v56  ;;  %v1957_v34 = vadd.f32 %v4277_v32, %v1843_v54  ;;  %v2039_v30 = vpack.c.bf16 %v1996_v63, %v2011_v21  ;;  %v2176_v52 = vld [vmem:[#allocation2 + $0x80] sm:$0xff]  ;;  %v2354_v56 = vsel %vm4135_vm14, 0.0, %v4191_v24 }
 0x371   : > { %v1412_v19 = vpop.f32.mrf.mxu2  ;;  %v1998_v54 = vld [vmem:[#allocation2 + $0x7f] sm:$0xff] }
 0x372   : > { %1973 = vst.msk [vmem:[#allocation3 + $0x10] sm:$0xff] %vm405_vm0, %v1957_v34  ;;  %v1443_v46 = vadd.f32 %v1412_v19, %v1329_v49  ;;  %v4332_v9 = vpop.f32.mrf.mxu0  ;;  %v2202_v49 = vpack.c.bf16 %v2176_v52, %v2175_v36  ;;  %v2179_v52 = vld [vmem:[#allocation2 + $0x98] sm:$0xff] }
 0x373   : > { %v1506_v0 = vld [vmem:[#allocation3 + $0x28] sm:$0xff] }
 0x374   : > { %v1620_v3 = vadd.f32 %v1587_v8, %v1506_v0  ;;  %1459 = vst.msk [vmem:[#allocation3 + $0x30] sm:$0xff] %vm405_vm0, %v1443_v46  ;;  %v1932_v16 = vpop.f32.mrf.mxu1  ;;  %v1332_v46 = vld [vmem:[#allocation3 + $0x48] sm:$0xff] }
 0x375   : > { %v1667_v6 = vld [vmem:[#allocation3 + $0x20] sm:$0xff]  ;;  %v1592_v33 = vpop.f32.mrf.mxu3 }
 0x376   : > { %1636 = vst.msk [vmem:[#allocation3 + $0x28] sm:$0xff] %vm405_vm0, %v1620_v3  ;;  %v1781_v32 = vadd.f32 %v4291_v37, %v1667_v6  ;;  %v2380_v3 = vpack.c.bf16 %v2354_v56, %v4193_v48  ;;  %v2341_v56 = vld [vmem:[#allocation2 + $0x99] sm:$0xff] }
 0x377   : > { %v1844_v60 = vld [vmem:[#allocation3 + $0x18] sm:$0xff] }
 0x378   : > { %1797 = vst.msk [vmem:[#allocation3 + $0x20] sm:$0xff] %vm405_vm0, %v1781_v32  ;;  %v1958_v45 = vadd.f32 %v4296_v15, %v1844_v60 }
 0x379   : > { %v1414_v17 = vpop.f32.mrf.mxu2 }
 0x37a   : > { %1974 = vst.msk [vmem:[#allocation3 + $0x18] sm:$0xff] %vm405_vm0, %v1958_v45  ;;  %v1444_v37 = vadd.f32 %v1414_v17, %v1330_v23  ;;  %v4346_v44 = vpop.f32.mrf.mxu0  ;;  %3041 = vmatmul.msk.bf16.gmra.mxu3 %vm405_vm0, %v2201_v29  ;;  %v2356_v17 = vsel %vm4168_vm15, 0.0, %v4230_v26 }
 0x37b   : > { %v1507_v50 = vld [vmem:[#allocation3 + $0x30] sm:$0xff] }
 0x37c   : > { %v1621_v8 = vadd.f32 %v1590_v57, %v1507_v50  ;;  %1460 = vst.msk [vmem:[#allocation3 + $0x38] sm:$0xff] %vm405_vm0, %v1444_v37  ;;  %v1935_v6 = vpop.f32.mrf.mxu1  ;;  %v2015_v37 = vsel %vm3944_vm6, 0.0, %v4200_v55  ;;  %v3112_v50 = vld [vmem:[%s4626_s6] sm:$0xff] }
 0x37d   : > { %v1668_v59 = vld [vmem:[#allocation3 + $0x28] sm:$0xff]  ;;  %3057 = vmatmul.msk.bf16.gmra.mxu0 %vm405_vm0, %v2379_v27  ;;  %v1595_v15 = vpop.f32.mrf.mxu3  ;;  %v2041_v26 = vpack.c.bf16 %v4208_v13, %v2015_v37  ;;  %2616 = vmatpush.bf16.msra.mxu1 %v3112_v50  ;;  %v1338_v37 = vld [vmem:[#allocation3 + $0x78] sm:$0xff] }
 0x37e   : > { %1637 = vst.msk [vmem:[#allocation3 + $0x30] sm:$0xff] %vm405_vm0, %v1621_v8  ;;  %v1782_v51 = vadd.f32 %v4303_v10, %v1668_v59  ;;  %3025 = vmatmul.msk.bf16.gmra.mxu2 %vm405_vm0, %v2039_v30  ;;  %v1997_v10 = vld [vmem:[#allocation2 + $0x77] sm:$0xff]  ;;  %v2381_v59 = vpack.c.bf16 %v2356_v17, %v4233_v58 }
 0x37f   : > { %v1845_v61 = vld [vmem:[#allocation3 + $0x20] sm:$0xff]  ;;  %v2013_v34 = vsel %vm3910_vm4, 0.0, %v1997_v10  ;;  %v2342_v10 = vld [vmem:[#allocation2 + $0xa1] sm:$0xff] }
 0x380   : > { %1798 = vst.msk [vmem:[#allocation3 + $0x28] sm:$0xff] %vm405_vm0, %v1782_v51  ;;  %v1959_v38 = vadd.f32 %v4313_v42, %v1845_v61  ;;  %v2040_v22 = vpack.c.bf16 %v1998_v54, %v2013_v34  ;;  %v2002_v34 = vld [vmem:[#allocation2 + $0x9f] sm:$0xff] }
 0x381   : > { %v1417_v41 = vpop.f32.mrf.mxu2 }
 0x382   : > { %1975 = vst.msk [vmem:[#allocation3 + $0x20] sm:$0xff] %vm405_vm0, %v1959_v38  ;;  %v1445_v43 = vadd.f32 %v1417_v41, %v1331_v39  ;;  %v4357_v53 = vpop.f32.mrf.mxu0  ;;  %v1335_v39 = vld [vmem:[#allocation3 + $0x60] sm:$0xff] }
 0x383   : > { %v1508_v2 = vld [vmem:[#allocation3 + $0x38] sm:$0xff] }
 0x384   : > { %v1622_v11 = vadd.f32 %v1592_v33, %v1508_v2  ;;  %1461 = vst.msk [vmem:[#allocation3 + $0x40] sm:$0xff] %vm405_vm0, %v1445_v43  ;;  %v1333_v33 = vld [vmem:[#allocation3 + $0x50] sm:$0xff] }
 0x385   : > { %v1669_v5 = vld [vmem:[#allocation3 + $0x30] sm:$0xff]  ;;  %v1597_v7 = vpop.f32.mrf.mxu3 }
 0x386   : > { %1638 = vst.msk [vmem:[#allocation3 + $0x38] sm:$0xff] %vm405_vm0, %v1622_v11  ;;  %v1783_v42 = vadd.f32 %v4319_v40, %v1669_v5  ;;  %v2180_v5 = vld [vmem:[#allocation2 + $0xa0] sm:$0xff] }
 0x387   : > { %v1846_v57 = vld [vmem:[#allocation3 + $0x28] sm:$0xff] }
 0x388   : > { %1799 = vst.msk [vmem:[#allocation3 + $0x30] sm:$0xff] %vm405_vm0, %v1783_v42  ;;  %v1960_v19 = vadd.f32 %v4329_v31, %v1846_v57  ;;  %v2358_v57 = vsel %vm4204_vm1, 0.0, %v2342_v10  ;;  %v2020_v10 = vld [vmem:[#allocation3 + $0x8] sm:$0xff] }
 0x389   : > { %v1419_v0 = vpop.f32.mrf.mxu2 }
 0x38a   : > { %1976 = vst.msk [vmem:[#allocation3 + $0x28] sm:$0xff] %vm405_vm0, %v1960_v19  ;;  %v1446_v40 = vadd.f32 %v1419_v0, %v1332_v46  ;;  %v4371_v28 = vpop.f32.mrf.mxu0  ;;  %3042 = vmatmul.msk.bf16.gmra.mxu3 %vm405_vm0, %v2202_v49  ;;  %v2204_v19 = vpack.c.bf16 %v2180_v5, %v2179_v52  ;;  %v1336_v0 = vld [vmem:[#allocation3 + $0x68] sm:$0xff] }
 0x38b   : > { %v1509_v24 = vld [vmem:[#allocation3 + $0x40] sm:$0xff] }
 0x38c   : > { %v1623_v25 = vadd.f32 %v1595_v15, %v1509_v24  ;;  %1462 = vst.msk [vmem:[#allocation3 + $0x48] sm:$0xff] %vm405_vm0, %v1446_v40  ;;  %v2382_v40 = vpack.c.bf16 %v2358_v57, %v2341_v56 }
 0x38d   : > { %v1670_v14 = vld [vmem:[#allocation3 + $0x38] sm:$0xff]  ;;  %3058 = vmatmul.msk.bf16.gmra.mxu0 %vm405_vm0, %v2380_v3  ;;  %v1600_v48 = vpop.f32.mrf.mxu3 }
 0x38e   : > { %1639 = vst.msk [vmem:[#allocation3 + $0x40] sm:$0xff] %vm405_vm0, %v1623_v25  ;;  %v1784_v31 = vadd.f32 %v4332_v9, %v1670_v14  ;;  %3026 = vmatmul.msk.bf16.gmra.mxu2 %vm405_vm0, %v2040_v22 }
 0x38f   : > { %v1847_v4 = vld [vmem:[#allocation3 + $0x30] sm:$0xff] }
 0x390   : > { %1800 = vst.msk [vmem:[#allocation3 + $0x38] sm:$0xff] %vm405_vm0, %v1784_v31  ;;  %v1961_v32 = vadd.f32 %v1930_v12, %v1847_v4  ;;  %v1334_v12 = vld [vmem:[#allocation3 + $0x58] sm:$0xff] }
 0x391   : > { %v1422_v47 = vpop.f32.mrf.mxu2 }
 0x392   : > { %1977 = vst.msk [vmem:[#allocation3 + $0x30] sm:$0xff] %vm405_vm0, %v1961_v32  ;;  %v1447_v60 = vadd.f32 %v1422_v47, %v1333_v33  ;;  %v4381_v63 = vpop.f32.mrf.mxu0  ;;  %v1337_v32 = vld [vmem:[#allocation3 + $0x70] sm:$0xff] }
 0x393   : > { %v1510_v21 = vld [vmem:[#allocation3 + $0x48] sm:$0xff] }
 0x394   : > { %v1624_v29 = vadd.f32 %v1597_v7, %v1510_v21  ;;  %1463 = vst.msk [vmem:[#allocation3 + $0x50] sm:$0xff] %vm405_vm0, %v1447_v60 }
 0x395   : > { %v1671_v9 = vld [vmem:[#allocation3 + $0x40] sm:$0xff]  ;;  %v1602_v23 = vpop.f32.mrf.mxu3 }
 0x396   : > { %1640 = vst.msk [vmem:[#allocation3 + $0x48] sm:$0xff] %vm405_vm0, %v1624_v29  ;;  %v1785_v45 = vadd.f32 %v4346_v44, %v1671_v9  ;;  %v1937_v44 = vpop.f32.mrf.mxu1 }
 0x397   : > { %v1848_v27 = vld [vmem:[#allocation3 + $0x38] sm:$0xff] }
 0x398   : > { %1801 = vst.msk [vmem:[#allocation3 + $0x40] sm:$0xff] %vm405_vm0, %v1785_v45  ;;  %v1962_v30 = vadd.f32 %v1932_v16, %v1848_v27 }
 0x399   : > { %v1424_v8 = vpop.f32.mrf.mxu2 }
 0x39a   : > { %1978 = vst.msk [vmem:[#allocation3 + $0x38] sm:$0xff] %vm405_vm0, %v1962_v30  ;;  %v1448_v20 = vadd.f32 %v1424_v8, %v1334_v12  ;;  %v4399_v51 = vpop.f32.mrf.mxu0  ;;  %3043 = vmatmul.msk.bf16.gmra.mxu3 %vm405_vm0, %v4220_v62 }
 0x39b   : > { %v1511_v1 = vld [vmem:[#allocation3 + $0x50] sm:$0xff] }
 0x39c   : > { %v1625_v55 = vadd.f32 %v1600_v48, %v1511_v1  ;;  %1464 = vst.msk [vmem:[#allocation3 + $0x58] sm:$0xff] %vm405_vm0, %v1448_v20 }
 0x39d   : > { %v1672_v15 = vld [vmem:[#allocation3 + $0x48] sm:$0xff]  ;;  %3059 = vmatmul.msk.bf16.gmra.mxu0 %vm405_vm0, %v2381_v59  ;;  %v1605_v13 = vpop.f32.mrf.mxu3 }
 0x39e   : > { %1641 = vst.msk [vmem:[#allocation3 + $0x50] sm:$0xff] %vm405_vm0, %v1625_v55  ;;  %v1786_v58 = vadd.f32 %v4357_v53, %v1672_v15  ;;  %3027 = vmatmul.msk.bf16.gmra.mxu2 %vm405_vm0, %v2041_v26  ;;  %v1940_v11 = vpop.f32.mrf.mxu1  ;;  %v2001_v53 = vld [vmem:[#allocation2 + $0x97] sm:$0xff] }
 0x39f   : > { %v1849_v61 = vld [vmem:[#allocation3 + $0x40] sm:$0xff]  ;;  %v2017_v49 = vsel %vm3993_vm9, 0.0, %v2001_v53 }
 0x3a0   : > { %1802 = vst.msk [vmem:[#allocation3 + $0x48] sm:$0xff] %vm405_vm0, %v1786_v58  ;;  %v1963_v38 = vadd.f32 %v1935_v6, %v1849_v61  ;;  %v2019_v55 = vld [vmem:[#allocation3] sm:$0xff] }
 0x3a1   : > { %v1427_v41 = vpop.f32.mrf.mxu2 }
 0x3a2   : > { %1979 = vst.msk [vmem:[#allocation3 + $0x40] sm:$0xff] %vm405_vm0, %v1963_v38  ;;  %v1449_v62 = vadd.f32 %v1427_v41, %v1335_v39  ;;  %v4410_v43 = vpop.f32.mrf.mxu0 }
 0x3a3   : > { %v1512_v2 = vld [vmem:[#allocation3 + $0x58] sm:$0xff] }
 0x3a4   : > { %v1626_v36 = vadd.f32 %v1602_v23, %v1512_v2  ;;  %1465 = vst.msk [vmem:[#allocation3 + $0x60] sm:$0xff] %vm405_vm0, %v1449_v62 }
 0x3a5   : > { %v1673_v16 = vld [vmem:[#allocation3 + $0x50] sm:$0xff]  ;;  %v1607_v7 = vpop.f32.mrf.mxu3 }
 0x3a6   : > { %1642 = vst.msk [vmem:[#allocation3 + $0x58] sm:$0xff] %vm405_vm0, %v1626_v36  ;;  %v1787_v42 = vadd.f32 %v4371_v28, %v1673_v16  ;;  %v2042_v28 = vpack.c.bf16 %v2002_v34, %v2017_v49  ;;  %v1942_v14 = vpop.f32.mrf.mxu1  ;;  %v2021_v49 = vld [vmem:[#allocation3 + $0x10] sm:$0xff] }
 0x3a7   : > { %v1850_v54 = vld [vmem:[#allocation3 + $0x48] sm:$0xff] }
 0x3a8   : > { %1803 = vst.msk [vmem:[#allocation3 + $0x50] sm:$0xff] %vm405_vm0, %v1787_v42  ;;  %v1964_v46 = vadd.f32 %v1937_v44, %v1850_v54 }
 0x3a9   : > { %v1429_v3 = vpop.f32.mrf.mxu2 }
 0x3aa   : > { %1980 = vst.msk [vmem:[#allocation3 + $0x48] sm:$0xff] %vm405_vm0, %v1964_v46  ;;  %v1450_v22 = vadd.f32 %v1429_v3, %v1336_v0  ;;  %v1772_v24 = vpop.f32.mrf.mxu0  ;;  %3044 = vmatmul.msk.bf16.gmra.mxu3 %vm405_vm0, %v2204_v19 }
 0x3ab   : > { %v1513_v25 = vld [vmem:[#allocation3 + $0x60] sm:$0xff] }
 0x3ac   : > { %v1627_v35 = vadd.f32 %v1605_v13, %v1513_v25  ;;  %1466 = vst.msk [vmem:[#allocation3 + $0x68] sm:$0xff] %vm405_vm0, %v1450_v22 }
 0x3ad   : > { %v1674_v18 = vld [vmem:[#allocation3 + $0x58] sm:$0xff]  ;;  %3060 = vmatmul.msk.bf16.gmra.mxu0 %vm405_vm0, %v2382_v40  ;;  %v1610_v48 = vpop.f32.mrf.mxu3 }
 0x3ae   : > { %1643 = vst.msk [vmem:[#allocation3 + $0x60] sm:$0xff] %vm405_vm0, %v1627_v35  ;;  %v1788_v31 = vadd.f32 %v4381_v63, %v1674_v18  ;;  %3028 = vmatmul.msk.bf16.gmra.mxu2 %vm405_vm0, %v2042_v28  ;;  %v1945_v17 = vpop.f32.mrf.mxu1 }
 0x3af   : > { %v1851_v4 = vld [vmem:[#allocation3 + $0x50] sm:$0xff] }
 0x3b0   : > { %1804 = vst.msk [vmem:[#allocation3 + $0x58] sm:$0xff] %vm405_vm0, %v1788_v31  ;;  %v1965_v6 = vadd.f32 %v1940_v11, %v1851_v4 }
 0x3b1   : > { %v1432_v33 = vpop.f32.mrf.mxu2 }
 0x3b2   : > { %1981 = vst.msk [vmem:[#allocation3 + $0x50] sm:$0xff] %vm405_vm0, %v1965_v6  ;;  %v1451_v47 = vadd.f32 %v1432_v33, %v1337_v32  ;;  %v1774_v60 = vpop.f32.mrf.mxu0 }
 0x3b3   : > { %v1514_v21 = vld [vmem:[#allocation3 + $0x68] sm:$0xff] }
 0x3b4   : > { %v1628_v29 = vadd.f32 %v1607_v7, %v1514_v21  ;;  %1467 = vst.msk [vmem:[#allocation3 + $0x70] sm:$0xff] %vm405_vm0, %v1451_v47  ;;  %v2023_v21 = vld [vmem:[#allocation3 + $0x20] sm:$0xff] }
 0x3b5   : > { %v1675_v9 = vld [vmem:[#allocation3 + $0x60] sm:$0xff]  ;;  %v1612_v45 = vpop.f32.mrf.mxu3 }
 0x3b6   : > { %1644 = vst.msk [vmem:[#allocation3 + $0x68] sm:$0xff] %vm405_vm0, %v1628_v29  ;;  %v1789_v63 = vadd.f32 %v4399_v51, %v1675_v9  ;;  %v1947_v58 = vpop.f32.mrf.mxu1 }
 0x3b7   : > { %v1852_v23 = vld [vmem:[#allocation3 + $0x58] sm:$0xff] }
 0x3b8   : > { %1805 = vst.msk [vmem:[#allocation3 + $0x60] sm:$0xff] %vm405_vm0, %v1789_v63  ;;  %v1966_v27 = vadd.f32 %v1942_v14, %v1852_v23  ;;  %v2022_v14 = vld [vmem:[#allocation3 + $0x18] sm:$0xff]  ;;  %v4457_v63 = vld [vmem:[%s4691_s13] ss:$0 sm:$0xff] }
 0x3b9   : > { %v1434_v30 = vpop.f32.mrf.mxu2 }
 0x3ba   : > { %1982 = vst.msk [vmem:[#allocation3 + $0x58] sm:$0xff] %vm405_vm0, %v1966_v27  ;;  %v1452_v50 = vadd.f32 %v1434_v30, %v1338_v37  ;;  %v2433_v12 = vpop.f32.mrf.mxu0 }
 0x3bb   : > { %v1515_v8 = vld [vmem:[#allocation3 + $0x70] sm:$0xff] }
 0x3bc   : > { %v1629_v44 = vadd.f32 %v1610_v48, %v1515_v8  ;;  %1468 = vst.msk [vmem:[#allocation3 + $0x78] sm:$0xff] %vm405_vm0, %v1452_v50 }
 0x3bd   : > { %v1676_v59 = vld [vmem:[#allocation3 + $0x68] sm:$0xff]  ;;  %v2255_v26 = vpop.f32.mrf.mxu3 }
 0x3be   : > { %1645 = vst.msk [vmem:[#allocation3 + $0x70] sm:$0xff] %vm405_vm0, %v1629_v44  ;;  %v1790_v20 = vadd.f32 %v4410_v43, %v1676_v59  ;;  %v1950_v16 = vpop.f32.mrf.mxu1  ;;  %v2024_v59 = vld [vmem:[#allocation3 + $0x28] sm:$0xff] }
 0x3bf   : > { %v1853_v51 = vld [vmem:[#allocation3 + $0x60] sm:$0xff] }
 0x3c0   : > { %1806 = vst.msk [vmem:[#allocation3 + $0x68] sm:$0xff] %vm405_vm0, %v1790_v20  ;;  %v1967_v1 = vadd.f32 %v1945_v17, %v1853_v51 }
 0x3c1   : > { %v2093_v15 = vpop.f32.mrf.mxu2 }
 0x3c2   : > { %1983 = vst.msk [vmem:[#allocation3 + $0x60] sm:$0xff] %vm405_vm0, %v1967_v1  ;;  %v2133_v13 = vadd.f32 %v2093_v15, %v2019_v55  ;;  %v2435_v61 = vpop.f32.mrf.mxu0 }
 0x3c3   : > { %v1516_v38 = vld [vmem:[#allocation3 + $0x78] sm:$0xff] }
 0x3c4   : > { %v1630_v39 = vadd.f32 %v1612_v45, %v1516_v38  ;;  %2149 = vst.msk [vmem:[#allocation3] sm:$0xff] %vm405_vm0, %v2133_v13 }
 0x3c5   : > { %v1677_v41 = vld [vmem:[#allocation3 + $0x70] sm:$0xff]  ;;  %v2257_v43 = vpop.f32.mrf.mxu3 }
 0x3c6   : > { %1646 = vst.msk [vmem:[#allocation3 + $0x78] sm:$0xff] %vm405_vm0, %v1630_v39  ;;  %v1791_v62 = vadd.f32 %v1772_v24, %v1677_v41  ;;  %v1952_v28 = vpop.f32.mrf.mxu1  ;;  %v2025_v39 = vld [vmem:[#allocation3 + $0x30] sm:$0xff] }
 0x3c7   : > { %v1854_v2 = vld [vmem:[#allocation3 + $0x68] sm:$0xff] }
 0x3c8   : > { %1807 = vst.msk [vmem:[#allocation3 + $0x70] sm:$0xff] %vm405_vm0, %v1791_v62  ;;  %v1968_v11 = vadd.f32 %v1947_v58, %v1854_v2 }
 0x3c9   : > { %v2095_v36 = vpop.f32.mrf.mxu2 }
 0x3ca   : > { %1984 = vst.msk [vmem:[#allocation3 + $0x68] sm:$0xff] %vm405_vm0, %v1968_v11  ;;  %v2134_v53 = vadd.f32 %v2095_v36, %v2020_v10  ;;  %v2438_v52 = vpop.f32.mrf.mxu0 }
 0x3cb   : > { %v2181_v5 = vld [vmem:[#allocation3] sm:$0xff] }
 0x3cc   : > { %v2295_v42 = vadd.f32 %v2255_v26, %v2181_v5  ;;  %2150 = vst.msk [vmem:[#allocation3 + $0x8] sm:$0xff] %vm405_vm0, %v2134_v53 }
 0x3cd   : > { %v1678_v7 = vld [vmem:[#allocation3 + $0x78] sm:$0xff]  ;;  %v2260_v57 = vpop.f32.mrf.mxu3 }
 0x3ce   : > { %2311 = vst.msk [vmem:[#allocation3] sm:$0xff] %vm405_vm0, %v2295_v42  ;;  %v1792_v56 = vadd.f32 %v1774_v60, %v1678_v7  ;;  %v2026_v7 = vld [vmem:[#allocation3 + $0x38] sm:$0xff] }
 0x3cf   : > { %v1855_v54 = vld [vmem:[#allocation3 + $0x70] sm:$0xff] }
 0x3d0   : > { %1808 = vst.msk [vmem:[#allocation3 + $0x78] sm:$0xff] %vm405_vm0, %v1792_v56  ;;  %v1969_v34 = vadd.f32 %v1950_v16, %v1855_v54 }
 0x3d1   : > { %v2098_v19 = vpop.f32.mrf.mxu2 }
 0x3d2   : > { %1985 = vst.msk [vmem:[#allocation3 + $0x70] sm:$0xff] %vm405_vm0, %v1969_v34  ;;  %v2135_v46 = vadd.f32 %v2098_v19, %v2021_v49  ;;  %v2440_v40 = vpop.f32.mrf.mxu0 }
 0x3d3   : > { %v2182_v0 = vld [vmem:[#allocation3 + $0x8] sm:$0xff] }
 0x3d4   : > { %v2296_v3 = vadd.f32 %v2257_v43, %v2182_v0  ;;  %2151 = vst.msk [vmem:[#allocation3 + $0x10] sm:$0xff] %vm405_vm0, %v2135_v46 }
 0x3d5   : > { %v2359_v22 = vld [vmem:[#allocation3] sm:$0xff]  ;;  %v2262_v25 = vpop.f32.mrf.mxu3 }
 0x3d6   : > { %2312 = vst.msk [vmem:[#allocation3 + $0x8] sm:$0xff] %vm405_vm0, %v2296_v3  ;;  %v2473_v24 = vadd.f32 %v2433_v12, %v2359_v22 }
 0x3d7   : > { %v1856_v35 = vld [vmem:[#allocation3 + $0x78] sm:$0xff] }
 0x3d8   : > { %2489 = vst.msk [vmem:[#allocation3] sm:$0xff] %vm405_vm0, %v2473_v24  ;;  %v1970_v18 = vadd.f32 %v1952_v28, %v1856_v35  ;;  %v2027_v28 = vld [vmem:[#allocation3 + $0x40] sm:$0xff] }
 0x3d9   : > { %v2100_v31 = vpop.f32.mrf.mxu2 }
 0x3da   : > { %1986 = vst.msk [vmem:[#allocation3 + $0x78] sm:$0xff] %vm405_vm0, %v1970_v18  ;;  %v2136_v48 = vadd.f32 %v2100_v31, %v2022_v14  ;;  %v2443_v60 = vpop.f32.mrf.mxu0 }
 0x3db   : > { %v2183_v4 = vld [vmem:[#allocation3 + $0x10] sm:$0xff] }
 0x3dc   : > { %v2297_v6 = vadd.f32 %v2260_v57, %v2183_v4  ;;  %2152 = vst.msk [vmem:[#allocation3 + $0x18] sm:$0xff] %vm405_vm0, %v2136_v48 }
 0x3dd   : > { %v2360_v32 = vld [vmem:[#allocation3 + $0x8] sm:$0xff]  ;;  %v2265_v47 = vpop.f32.mrf.mxu3 }
 0x3de   : > { %2313 = vst.msk [vmem:[#allocation3 + $0x10] sm:$0xff] %vm405_vm0, %v2297_v6  ;;  %v2474_v33 = vadd.f32 %v2435_v61, %v2360_v32 }
 0x3df   : > { %v2505_v23 = vld [vmem:[#allocation3] sm:$0xff] }
 0x3e0   : > { %2490 = vst.msk [vmem:[#allocation3 + $0x8] sm:$0xff] %vm405_vm0, %v2474_v33  ;;  %v2525_v50 = vadd.f32 %v4457_v63, %v2505_v23 }
 0x3e1   : > { %v2103_v29 = vpop.f32.mrf.mxu2 }
 0x3e2   : > { %v2137_v9 = vadd.f32 %v2103_v29, %v2023_v21  ;;  %v2445_v44 = vpop.f32.mrf.mxu0  ;;  %v2541_v51 = vmax.f32 %v2525_v50, 0.0 }
 0x3e3   : > { %v2184_v45 = vld [vmem:[#allocation3 + $0x18] sm:$0xff] }
 0x3e4   : > { %v2298_v17 = vadd.f32 %v2262_v25, %v2184_v45  ;;  %2153 = vst.msk [vmem:[#allocation3 + $0x20] sm:$0xff] %vm405_vm0, %v2137_v9 }
 0x3e5   : > { %v2361_v27 = vld [vmem:[#allocation3 + $0x10] sm:$0xff]  ;;  %v2267_v30 = vpop.f32.mrf.mxu3 }
 0x3e6   : > { %2314 = vst.msk [vmem:[#allocation3 + $0x18] sm:$0xff] %vm405_vm0, %v2298_v17  ;;  %v2475_v37 = vadd.f32 %v2438_v52, %v2361_v27 }
 0x3e7   : > { %v2506_v12 = vld [vmem:[#allocation3 + $0x8] sm:$0xff] }
 0x3e8   : > { %2491 = vst.msk [vmem:[#allocation3 + $0x10] sm:$0xff] %vm405_vm0, %v2475_v37  ;;  %v2526_v8 = vadd.f32 %v4457_v63, %v2506_v12  ;;  %v2029_v12 = vld [vmem:[#allocation3 + $0x50] sm:$0xff] }
 0x3e9   : > { %v2105_v20 = vpop.f32.mrf.mxu2 }
 0x3ea   : > { %v2138_v26 = vadd.f32 %v2105_v20, %v2024_v59  ;;  %v2542_v1 = vmax.f32 %v2526_v8, 0.0  ;;  %v2448_v43 = vpop.f32.mrf.mxu0 }
 0x3eb   : > { %v2185_v55 = vld [vmem:[#allocation3 + $0x20] sm:$0xff] }
 0x3ec   : > { %v2299_v15 = vadd.f32 %v2265_v47, %v2185_v55  ;;  %2154 = vst.msk [vmem:[#allocation3 + $0x28] sm:$0xff] %vm405_vm0, %v2138_v26  ;;  %v2557_v58 = vpack.c.bf16 %v2542_v1, %v2541_v51 }
 0x3ed   : > { %v2362_v13 = vld [vmem:[#allocation3 + $0x18] sm:$0xff]  ;;  %v2270_v38 = vpop.f32.mrf.mxu3 }
 0x3ee   : > { %2315 = vst.msk [vmem:[#allocation3 + $0x20] sm:$0xff] %vm405_vm0, %v2299_v15  ;;  %v2476_v61 = vadd.f32 %v2440_v40, %v2362_v13  ;;  %3069 = vmatmul.msk.bf16.vlgmr.msra.gmra.mxu1 %vm405_vm0, %v2557_v58 }
 0x3ef   : > { %v2507_v11 = vld [vmem:[#allocation3 + $0x10] sm:$0xff] }
 0x3f0   : > { %2492 = vst.msk [vmem:[#allocation3 + $0x18] sm:$0xff] %vm405_vm0, %v2476_v61  ;;  %v2527_v5 = vadd.f32 %v4457_v63, %v2507_v11  ;;  %v2030_v61 = vld [vmem:[#allocation3 + $0x58] sm:$0xff] }
 0x3f1   : > { %v2108_v41 = vpop.f32.mrf.mxu2 }
 0x3f2   : > { %v2139_v62 = vadd.f32 %v2108_v41, %v2025_v39  ;;  %v2543_v54 = vmax.f32 %v2527_v5, 0.0  ;;  %v2450_v0 = vpop.f32.mrf.mxu0  ;;  %v2031_v5 = vld [vmem:[#allocation3 + $0x60] sm:$0xff] }
 0x3f3   : > { %v2186_v2 = vld [vmem:[#allocation3 + $0x28] sm:$0xff] }
 0x3f4   : > { %v2300_v10 = vadd.f32 %v2267_v30, %v2186_v2  ;;  %2155 = vst.msk [vmem:[#allocation3 + $0x30] sm:$0xff] %vm405_vm0, %v2139_v62 }
 0x3f5   : > { %v2363_v36 = vld [vmem:[#allocation3 + $0x20] sm:$0xff]  ;;  %v2272_v52 = vpop.f32.mrf.mxu3 }
 0x3f6   : > { %2316 = vst.msk [vmem:[#allocation3 + $0x28] sm:$0xff] %vm405_vm0, %v2300_v10  ;;  %v2477_v53 = vadd.f32 %v2443_v60, %v2363_v36  ;;  %v2028_v60 = vld [vmem:[#allocation3 + $0x48] sm:$0xff] }
 0x3f7   : > { %v2508_v16 = vld [vmem:[#allocation3 + $0x18] sm:$0xff] }
 0x3f8   : > { %2493 = vst.msk [vmem:[#allocation3 + $0x20] sm:$0xff] %vm405_vm0, %v2477_v53  ;;  %v2528_v42 = vadd.f32 %v4457_v63, %v2508_v16 }
 0x3f9   : > { %v2110_v56 = vpop.f32.mrf.mxu2 }
 0x3fa   : > { %v2140_v57 = vadd.f32 %v2110_v56, %v2026_v7  ;;  %v2544_v34 = vmax.f32 %v2528_v42, 0.0  ;;  %v2453_v4 = vpop.f32.mrf.mxu0 }
 0x3fb   : > { %v2187_v49 = vld [vmem:[#allocation3 + $0x30] sm:$0xff] }
 0x3fc   : > { %v2301_v19 = vadd.f32 %v2270_v38, %v2187_v49  ;;  %2156 = vst.msk [vmem:[#allocation3 + $0x38] sm:$0xff] %vm405_vm0, %v2140_v57  ;;  %v2558_v46 = vpack.c.bf16 %v2544_v34, %v2543_v54 }
 0x3fd   : > { %v2364_v3 = vld [vmem:[#allocation3 + $0x28] sm:$0xff]  ;;  %v2275_v22 = vpop.f32.mrf.mxu3 }
 0x3fe   : > { %2317 = vst.msk [vmem:[#allocation3 + $0x30] sm:$0xff] %vm405_vm0, %v2301_v19  ;;  %v2478_v40 = vadd.f32 %v2445_v44, %v2364_v3  ;;  %3070 = vmatmul.msk.bf16.gmra.mxu1 %vm405_vm0, %v2558_v46 }
 0x3ff   : > { %v2509_v18 = vld [vmem:[#allocation3 + $0x20] sm:$0xff] }
 0x400   : > { %2494 = vst.msk [vmem:[#allocation3 + $0x28] sm:$0xff] %vm405_vm0, %v2478_v40  ;;  %v2529_v6 = vadd.f32 %v4457_v63, %v2509_v18  ;;  %v2032_v40 = vld [vmem:[#allocation3 + $0x68] sm:$0xff] }
 0x401   : > { %v2113_v24 = vpop.f32.mrf.mxu2 }
 0x402   : > { %v2141_v25 = vadd.f32 %v2113_v24, %v2027_v28  ;;  %v2545_v9 = vmax.f32 %v2529_v6, 0.0  ;;  %v2455_v50 = vpop.f32.mrf.mxu0 }
 0x403   : > { %v2188_v35 = vld [vmem:[#allocation3 + $0x38] sm:$0xff] }
 0x404   : > { %v2302_v14 = vadd.f32 %v2272_v52, %v2188_v35  ;;  %2157 = vst.msk [vmem:[#allocation3 + $0x40] sm:$0xff] %vm405_vm0, %v2141_v25 }
 0x405   : > { %v2365_v31 = vld [vmem:[#allocation3 + $0x30] sm:$0xff]  ;;  %v2277_v32 = vpop.f32.mrf.mxu3 }
 0x406   : > { %2318 = vst.msk [vmem:[#allocation3 + $0x38] sm:$0xff] %vm405_vm0, %v2302_v14  ;;  %v2479_v48 = vadd.f32 %v2448_v43, %v2365_v31 }
 0x407   : > { %v2510_v33 = vld [vmem:[#allocation3 + $0x28] sm:$0xff] }
 0x408   : > { %2495 = vst.msk [vmem:[#allocation3 + $0x30] sm:$0xff] %vm405_vm0, %v2479_v48  ;;  %v2530_v47 = vadd.f32 %v4457_v63, %v2510_v33 }
 0x409   : > { %v2115_v21 = vpop.f32.mrf.mxu2 }
 0x40a   : > { %v2142_v29 = vadd.f32 %v2115_v21, %v2028_v60  ;;  %v2546_v45 = vmax.f32 %v2530_v47, 0.0  ;;  %v2458_v41 = vpop.f32.mrf.mxu0 }
 0x40b   : > { %v2189_v23 = vld [vmem:[#allocation3 + $0x40] sm:$0xff] }
 0x40c   : > { %v2303_v17 = vadd.f32 %v2275_v22, %v2189_v23  ;;  %2158 = vst.msk [vmem:[#allocation3 + $0x48] sm:$0xff] %vm405_vm0, %v2142_v29  ;;  %v2559_v27 = vpack.c.bf16 %v2546_v45, %v2545_v9 }
 0x40d   : > { %v2366_v37 = vld [vmem:[#allocation3 + $0x38] sm:$0xff]  ;;  %v2280_v44 = vpop.f32.mrf.mxu3 }
 0x40e   : > { %2319 = vst.msk [vmem:[#allocation3 + $0x40] sm:$0xff] %vm405_vm0, %v2303_v17  ;;  %v2480_v30 = vadd.f32 %v2450_v0, %v2366_v37  ;;  %3071 = vmatmul.msk.bf16.gmra.mxu1 %vm405_vm0, %v2559_v27 }
 0x40f   : > { %v2511_v26 = vld [vmem:[#allocation3 + $0x30] sm:$0xff] }
 0x410   : > { %2496 = vst.msk [vmem:[#allocation3 + $0x38] sm:$0xff] %vm405_vm0, %v2480_v30  ;;  %v2531_v15 = vadd.f32 %v4457_v63, %v2511_v26 }
 0x411   : > { %v2118_v8 = vpop.f32.mrf.mxu2 }
 0x412   : > { %v2143_v59 = vadd.f32 %v2118_v8, %v2029_v12  ;;  %v2547_v62 = vmax.f32 %v2531_v15, 0.0  ;;  %v2460_v54 = vpop.f32.mrf.mxu0 }
 0x413   : > { %v2190_v20 = vld [vmem:[#allocation3 + $0x48] sm:$0xff] }
 0x414   : > { %v2304_v51 = vadd.f32 %v2277_v32, %v2190_v20  ;;  %2159 = vst.msk [vmem:[#allocation3 + $0x50] sm:$0xff] %vm405_vm0, %v2143_v59  ;;  %v2033_v32 = vld [vmem:[#allocation3 + $0x70] sm:$0xff] }
 0x415   : > { %v2367_v1 = vld [vmem:[#allocation3 + $0x40] sm:$0xff]  ;;  %v2282_v11 = vpop.f32.mrf.mxu3 }
 0x416   : > { %2320 = vst.msk [vmem:[#allocation3 + $0x48] sm:$0xff] %vm405_vm0, %v2304_v51  ;;  %v2481_v55 = vadd.f32 %v2453_v4, %v2367_v1 }
 0x417   : > { %v2512_v58 = vld [vmem:[#allocation3 + $0x38] sm:$0xff] }
 0x418   : > { %2497 = vst.msk [vmem:[#allocation3 + $0x40] sm:$0xff] %vm405_vm0, %v2481_v55  ;;  %v2532_v13 = vadd.f32 %v4457_v63, %v2512_v58 }
 0x419   : > { %v2120_v38 = vpop.f32.mrf.mxu2 }
 0x41a   : > { %v2144_v39 = vadd.f32 %v2120_v38, %v2030_v61  ;;  %v2548_v43 = vmax.f32 %v2532_v13, 0.0  ;;  %v2463_v4 = vpop.f32.mrf.mxu0 }
 0x41b   : > { %v2191_v2 = vld [vmem:[#allocation3 + $0x50] sm:$0xff] }
 0x41c   : > { %v2305_v10 = vadd.f32 %v2280_v44, %v2191_v2  ;;  %2160 = vst.msk [vmem:[#allocation3 + $0x58] sm:$0xff] %vm405_vm0, %v2144_v39  ;;  %v2560_v36 = vpack.c.bf16 %v2548_v43, %v2547_v62 }
 0x41d   : > { %v2368_v53 = vld [vmem:[#allocation3 + $0x48] sm:$0xff]  ;;  %v2285_v49 = vpop.f32.mrf.mxu3 }
 0x41e   : > { %2321 = vst.msk [vmem:[#allocation3 + $0x50] sm:$0xff] %vm405_vm0, %v2305_v10  ;;  %v2482_v52 = vadd.f32 %v2455_v50, %v2368_v53  ;;  %3072 = vmatmul.msk.bf16.gmra.mxu1 %vm405_vm0, %v2560_v36  ;;  %v2034_v50 = vld [vmem:[#allocation3 + $0x78] sm:$0xff] }
 0x41f   : > { %v2513_v56 = vld [vmem:[#allocation3 + $0x40] sm:$0xff] }
 0x420   : > { %2498 = vst.msk [vmem:[#allocation3 + $0x48] sm:$0xff] %vm405_vm0, %v2482_v52  ;;  %v2533_v46 = vadd.f32 %v4457_v63, %v2513_v56 }
 0x421   : > { %v2123_v16 = vpop.f32.mrf.mxu2 }
 0x422   : > { %v2145_v42 = vadd.f32 %v2123_v16, %v2031_v5  ;;  %v2549_v24 = vmax.f32 %v2533_v46, 0.0  ;;  %v2465_v27 = vpop.f32.mrf.mxu0  ;;  %v2658_v46 = vld [vmem:[%s3639_s11] sm:$0xff] }
 0x423   : > { %v2192_v7 = vld [vmem:[#allocation3 + $0x58] sm:$0xff] }
 0x424   : > { %v2306_v57 = vadd.f32 %v2282_v11, %v2192_v7  ;;  %2161 = vst.msk [vmem:[#allocation3 + $0x60] sm:$0xff] %vm405_vm0, %v2145_v42 }
 0x425   : > { %v2369_v34 = vld [vmem:[#allocation3 + $0x50] sm:$0xff]  ;;  %v2287_v6 = vpop.f32.mrf.mxu3 }
 0x426   : > { %2322 = vst.msk [vmem:[#allocation3 + $0x58] sm:$0xff] %vm405_vm0, %v2306_v57  ;;  %v2483_v19 = vadd.f32 %v2458_v41, %v2369_v34 }
 0x427   : > { %v2514_v0 = vld [vmem:[#allocation3 + $0x48] sm:$0xff] }
 0x428   : > { %2499 = vst.msk [vmem:[#allocation3 + $0x50] sm:$0xff] %vm405_vm0, %v2483_v19  ;;  %v2534_v3 = vadd.f32 %v4457_v63, %v2514_v0 }
 0x429   : > { %v2125_v22 = vpop.f32.mrf.mxu2 }
 0x42a   : > { %v2146_v28 = vadd.f32 %v2125_v22, %v2032_v40  ;;  %v2550_v25 = vmax.f32 %v2534_v3, 0.0  ;;  %v2468_v13 = vpop.f32.mrf.mxu0  ;;  %v2659_v22 = vld [vmem:[%s3639_s11 + $0x8] sm:$0xff] }
 0x42b   : > { %v2193_v35 = vld [vmem:[#allocation3 + $0x60] sm:$0xff] }
 0x42c   : > { %v2307_v18 = vadd.f32 %v2285_v49, %v2193_v35  ;;  %2162 = vst.msk [vmem:[#allocation3 + $0x68] sm:$0xff] %vm405_vm0, %v2146_v28  ;;  %v2561_v14 = vpack.c.bf16 %v2550_v25, %v2549_v24  ;;  %v4525_v49 = vld [vmem:[%s4692_s21] ss:$0 sm:$0xff] }
 0x42d   : > { %v2370_v31 = vld [vmem:[#allocation3 + $0x58] sm:$0xff]  ;;  %v2290_v30 = vpop.f32.mrf.mxu3 }
 0x42e   : > { %2323 = vst.msk [vmem:[#allocation3 + $0x60] sm:$0xff] %vm405_vm0, %v2307_v18  ;;  %v2484_v48 = vadd.f32 %v2460_v54, %v2370_v31  ;;  %3073 = vmatmul.msk.bf16.gmra.mxu1 %vm405_vm0, %v2561_v14  ;;  %v2660_v18 = vld [vmem:[%s3639_s11 + $0x10] sm:$0xff] }
 0x42f   : > { %v2515_v21 = vld [vmem:[#allocation3 + $0x50] sm:$0xff] }
 0x430   : > { %2500 = vst.msk [vmem:[#allocation3 + $0x58] sm:$0xff] %vm405_vm0, %v2484_v48  ;;  %v2535_v23 = vadd.f32 %v4457_v63, %v2515_v21  ;;  %v2662_v21 = vld [vmem:[%s3639_s11 + $0x20] sm:$0xff] }
 0x431   : > { %v2128_v33 = vpop.f32.mrf.mxu2 }
 0x432   : > { %v2147_v47 = vadd.f32 %v2128_v33, %v2033_v32  ;;  %v2551_v44 = vmax.f32 %v2535_v23, 0.0  ;;  %v2470_v52 = vpop.f32.mrf.mxu0 }
 0x433   : > { %v2194_v60 = vld [vmem:[#allocation3 + $0x68] sm:$0xff] }
 0x434   : > { %v2308_v29 = vadd.f32 %v2287_v6, %v2194_v60  ;;  %2163 = vst.msk [vmem:[#allocation3 + $0x70] sm:$0xff] %vm405_vm0, %v2147_v47  ;;  %v2661_v6 = vld [vmem:[%s3639_s11 + $0x18] sm:$0xff] }
 0x435   : > { %v2371_v9 = vld [vmem:[#allocation3 + $0x60] sm:$0xff]  ;;  %v2292_v58 = vpop.f32.mrf.mxu3 }
 0x436   : > { %2324 = vst.msk [vmem:[#allocation3 + $0x68] sm:$0xff] %vm405_vm0, %v2308_v29  ;;  %v2485_v45 = vadd.f32 %v2463_v4, %v2371_v9 }
 0x437   : > { %v2516_v17 = vld [vmem:[#allocation3 + $0x58] sm:$0xff] }
 0x438   : > { %2501 = vst.msk [vmem:[#allocation3 + $0x60] sm:$0xff] %vm405_vm0, %v2485_v45  ;;  %v2536_v37 = vadd.f32 %v4457_v63, %v2516_v17  ;;  %v2663_v17 = vld [vmem:[%s3639_s11 + $0x28] sm:$0xff] }
 0x439   : > { %v2130_v12 = vpop.f32.mrf.mxu2 }
 0x43a   : > { %v2148_v8 = vadd.f32 %v2130_v12, %v2034_v50  ;;  %v2552_v59 = vmax.f32 %v2536_v37, 0.0  ;;  %v2664_v12 = vld [vmem:[%s3639_s11 + $0x30] sm:$0xff] }
 0x43b   : > { %v2195_v20 = vld [vmem:[#allocation3 + $0x70] sm:$0xff] }
 0x43c   : > { %v2309_v26 = vadd.f32 %v2290_v30, %v2195_v20  ;;  %2164 = vst.msk [vmem:[#allocation3 + $0x78] sm:$0xff] %vm405_vm0, %v2148_v8  ;;  %v2562_v51 = vpack.c.bf16 %v2552_v59, %v2551_v44 }
 0x43d   : > { %v2372_v1 = vld [vmem:[#allocation3 + $0x68] sm:$0xff] }
 0x43e   : > { %2325 = vst.msk [vmem:[#allocation3 + $0x70] sm:$0xff] %vm405_vm0, %v2309_v26  ;;  %v2486_v55 = vadd.f32 %v2465_v27, %v2372_v1  ;;  %3074 = vmatmul.msk.bf16.gmra.mxu1 %vm405_vm0, %v2562_v51  ;;  %v2665_v26 = vld [vmem:[%s3639_s11 + $0x38] sm:$0xff] }
 0x43f   : > { %v2517_v61 = vld [vmem:[#allocation3 + $0x60] sm:$0xff] }
 0x440   : > { %2502 = vst.msk [vmem:[#allocation3 + $0x68] sm:$0xff] %vm405_vm0, %v2486_v55  ;;  %v2537_v62 = vadd.f32 %v4457_v63, %v2517_v61 }
 0x442   : > { %v2553_v11 = vmax.f32 %v2537_v62, 0.0 }
 0x443   : > { %v2196_v15 = vld [vmem:[#allocation3 + $0x78] sm:$0xff] }
 0x444   : > { %v2310_v38 = vadd.f32 %v2292_v58, %v2196_v15  ;;  %v2666_v58 = vld [vmem:[%s3639_s11 + $0x40] sm:$0xff] }
 0x445   : > { %v2373_v39 = vld [vmem:[#allocation3 + $0x70] sm:$0xff] }
 0x446   : > { %2326 = vst.msk [vmem:[#allocation3 + $0x78] sm:$0xff] %vm405_vm0, %v2310_v38  ;;  %v2487_v41 = vadd.f32 %v2468_v13, %v2373_v39 }
 0x447   : > { %v2518_v43 = vld [vmem:[#allocation3 + $0x68] sm:$0xff] }
 0x448   : > { %2503 = vst.msk [vmem:[#allocation3 + $0x70] sm:$0xff] %vm405_vm0, %v2487_v41  ;;  %v2538_v2 = vadd.f32 %v4457_v63, %v2518_v43  ;;  %v2667_v41 = vld [vmem:[%s3639_s11 + $0x48] sm:$0xff] }
 0x44a   : > { %v2554_v10 = vmax.f32 %v2538_v2, 0.0 }
 0x44c   : > { %v2563_v36 = vpack.c.bf16 %v2554_v10, %v2553_v11  ;;  %v2668_v10 = vld [vmem:[%s3639_s11 + $0x50] sm:$0xff] }
 0x44d   : > { %v2374_v53 = vld [vmem:[#allocation3 + $0x78] sm:$0xff] }
 0x44e   : > { %v2488_v5 = vadd.f32 %v2470_v52, %v2374_v53  ;;  %3075 = vmatmul.msk.bf16.gmra.mxu1 %vm405_vm0, %v2563_v36 }
 0x44f   : > { %v2519_v16 = vld [vmem:[#allocation3 + $0x70] sm:$0xff] }
 0x450   : > { %2504 = vst.msk [vmem:[#allocation3 + $0x78] sm:$0xff] %vm405_vm0, %v2488_v5  ;;  %v2539_v42 = vadd.f32 %v4457_v63, %v2519_v16  ;;  %v2669_v16 = vld [vmem:[%s3639_s11 + $0x58] sm:$0xff] }
 0x452   : > { %v2555_v57 = vmax.f32 %v2539_v42, 0.0 }
 0x457   : > { %v2520_v7 = vld [vmem:[#allocation3 + $0x78] sm:$0xff] }
 0x458   : > { %v2540_v56 = vadd.f32 %v4457_v63, %v2520_v7 }
 0x45a   : > { %v2556_v54 = vmax.f32 %v2540_v56, 0.0 }
 0x45c   : > { %v2564_v34 = vpack.c.bf16 %v2556_v54, %v2555_v57  ;;  %v2670_v54 = vld [vmem:[%s3639_s11 + $0x60] sm:$0xff] }
 0x45e   : > { %3076 = vmatmul.msk.bf16.gmra.mxu1 %vm405_vm0, %v2564_v34 }
 0x46b   : > { %v2618_v19 = vpop.f32.mrf.mxu1 }
 0x46c   : > { %v2619_v0 = vadd.f32 %v4525_v49, %v2618_v19 }
 0x46e   : > { %v2674_v3 = vadd.f32 %v2658_v46, %v2619_v0 }
 0x470   : > { %v2690_v63 = vmax.f32 %v2674_v3, 0.0  ;;  %v2671_v3 = vld [vmem:[%s3639_s11 + $0x68] sm:$0xff] }
 0x472   : > { %2706 = vst [vmem:[%s3797_s23] sm:$0xff] %v2690_v63 }
 0x473   : > { %v2620_v40 = vpop.f32.mrf.mxu1 }
 0x474   : > { %v2621_v28 = vadd.f32 %v4525_v49, %v2620_v40 }
 0x476   : > { %v2675_v24 = vadd.f32 %v2659_v22, %v2621_v28 }
 0x478   : > { %v2691_v25 = vmax.f32 %v2675_v24, 0.0  ;;  %v2672_v24 = vld [vmem:[%s3639_s11 + $0x70] sm:$0xff] }
 0x47a   : > { %2707 = vst [vmem:[%s3797_s23 + $0x8] sm:$0xff] %v2691_v25 }
 0x47b   : > { %v2623_v35 = vpop.f32.mrf.mxu1 }
 0x47c   : > { %v2624_v14 = vadd.f32 %v4525_v49, %v2623_v35 }
 0x47e   : > { %v2676_v31 = vadd.f32 %v2660_v18, %v2624_v14 }
 0x480   : > { %v2692_v48 = vmax.f32 %v2676_v31, 0.0  ;;  %v2673_v31 = vld [vmem:[%s3639_s11 + $0x78] sm:$0xff]  ;;  %s3373_s11 = scalar_lea.hbm %s4693_s17, 512 }
 0x481   : > { %p3375_p5 = scmp.lt.s32.totalorder %s3373_s11, %s3369_s22 }
 0x482   : > { %2708 = vst [vmem:[%s3797_s23 + $0x10] sm:$0xff] %v2692_v48 }
 0x483   : > { %v2625_v4 = vpop.f32.mrf.mxu1  ;;  %p3376_p7 = por %p3375_p5, %p3374_p0 }
 0x484   : > { %v2626_v32 = vadd.f32 %v4525_v49, %v2625_v4 }
 0x485   : > { %p3377_p9 = pnand %p3376_p7, %p3372_p13 }
 0x486   : > { %v2677_v33 = vadd.f32 %v2661_v6, %v2626_v32 }
 0x488   : > { %v2693_v47 = vmax.f32 %v2677_v33, 0.0 }
 0x48a   : > { %2709 = vst [vmem:[%s3797_s23 + $0x18] sm:$0xff] %v2693_v47 }
 0x48b   : > { %v2628_v60 = vpop.f32.mrf.mxu1 }
 0x48c   : > { %v2629_v29 = vadd.f32 %v4525_v49, %v2628_v60 }
 0x48e   : > { %v2678_v9 = vadd.f32 %v2662_v21, %v2629_v29 }
 0x490   : > { %v2694_v45 = vmax.f32 %v2678_v9, 0.0 }
 0x492   : > { %2710 = vst [vmem:[%s3797_s23 + $0x20] sm:$0xff] %v2694_v45 }
 0x493   : > { %v2630_v23 = vpop.f32.mrf.mxu1 }
 0x494   : > { %v2631_v27 = vadd.f32 %v4525_v49, %v2630_v23 }
 0x496   : > { %v2679_v37 = vadd.f32 %v2663_v17, %v2631_v27 }
 0x498   : > { %v2695_v30 = vmax.f32 %v2679_v37, 0.0 }
 0x49a   : > { %2711 = vst [vmem:[%s3797_s23 + $0x28] sm:$0xff] %v2695_v30 }
 0x49b   : > { %v2633_v50 = vpop.f32.mrf.mxu1 }
 0x49c   : > { %v2634_v8 = vadd.f32 %v4525_v49, %v2633_v50 }
 0x49e   : > { %v2680_v44 = vadd.f32 %v2664_v12, %v2634_v8 }
 0x4a0   : > { %v2696_v59 = vmax.f32 %v2680_v44, 0.0 }
 0x4a2   : > { %2712 = vst [vmem:[%s3797_s23 + $0x30] sm:$0xff] %v2696_v59 }
 0x4a3   : > { %v2635_v20 = vpop.f32.mrf.mxu1 }
 0x4a4   : > { %v2636_v51 = vadd.f32 %v4525_v49, %v2635_v20 }
 0x4a6   : > { %v2681_v1 = vadd.f32 %v2665_v26, %v2636_v51 }
 0x4a8   : > { %v2697_v55 = vmax.f32 %v2681_v1, 0.0 }
 0x4aa   : > { %2713 = vst [vmem:[%s3797_s23 + $0x38] sm:$0xff] %v2697_v55 }
 0x4ab   : > { %v2638_v15 = vpop.f32.mrf.mxu1 }
 0x4ac   : > { %v2639_v13 = vadd.f32 %v4525_v49, %v2638_v15 }
 0x4ae   : > { %v2682_v61 = vadd.f32 %v2666_v58, %v2639_v13 }
 0x4b0   : > { %v2698_v38 = vmax.f32 %v2682_v61, 0.0 }
 0x4b2   : > { %2714 = vst [vmem:[%s3797_s23 + $0x40] sm:$0xff] %v2698_v38 }
 0x4b3   : > { %v2640_v39 = vpop.f32.mrf.mxu1 }
 0x4b4   : > { %v2641_v62 = vadd.f32 %v4525_v49, %v2640_v39 }
 0x4b6   : > { %v2683_v43 = vadd.f32 %v2667_v41, %v2641_v62 }
 0x4b8   : > { %v2699_v2 = vmax.f32 %v2683_v43, 0.0 }
 0x4ba   : > { %2715 = vst [vmem:[%s3797_s23 + $0x48] sm:$0xff] %v2699_v2 }
 0x4bb   : > { %v2643_v11 = vpop.f32.mrf.mxu1 }
 0x4bc   : > { %v2644_v36 = vadd.f32 %v4525_v49, %v2643_v11 }
 0x4be   : > { %v2684_v53 = vadd.f32 %v2668_v10, %v2644_v36 }
 0x4c0   : > { %v2700_v52 = vmax.f32 %v2684_v53, 0.0 }
 0x4c2   : > { %2716 = vst [vmem:[%s3797_s23 + $0x50] sm:$0xff] %v2700_v52 }
 0x4c3   : > { %v2645_v5 = vpop.f32.mrf.mxu1 }
 0x4c4   : > { %v2646_v42 = vadd.f32 %v4525_v49, %v2645_v5 }
 0x4c6   : > { %v2685_v7 = vadd.f32 %v2669_v16, %v2646_v42 }
 0x4c8   : > { %v2701_v56 = vmax.f32 %v2685_v7, 0.0 }
 0x4ca   : > { %2717 = vst [vmem:[%s3797_s23 + $0x58] sm:$0xff] %v2701_v56 }
 0x4cb   : > { %v2648_v57 = vpop.f32.mrf.mxu1 }
 0x4cc   : > { %v2649_v34 = vadd.f32 %v4525_v49, %v2648_v57 }
 0x4ce   : > { %v2686_v19 = vadd.f32 %v2670_v54, %v2649_v34 }
 0x4d0   : > { %v2702_v46 = vmax.f32 %v2686_v19, 0.0 }
 0x4d2   : > { %2718 = vst [vmem:[%s3797_s23 + $0x60] sm:$0xff] %v2702_v46 }
 0x4d3   : > { %v2650_v0 = vpop.f32.mrf.mxu1 }
 0x4d4   : > { %v2651_v63 = vadd.f32 %v4525_v49, %v2650_v0 }
 0x4d6   : > { %v2687_v40 = vadd.f32 %v2671_v3, %v2651_v63 }
 0x4d8   : > { %v2703_v22 = vmax.f32 %v2687_v40, 0.0 }
 0x4da   : > { %2719 = vst [vmem:[%s3797_s23 + $0x68] sm:$0xff] %v2703_v22 }
 0x4db   : > { %v2653_v28 = vpop.f32.mrf.mxu1 }
 0x4dc   : > { %v2654_v25 = vadd.f32 %v4525_v49, %v2653_v28 }
 0x4de   : > { %v2688_v35 = vadd.f32 %v2672_v24, %v2654_v25 }
 0x4e0   : > { %v2704_v18 = vmax.f32 %v2688_v35, 0.0 }
 0x4e2   : > { %2720 = vst [vmem:[%s3797_s23 + $0x70] sm:$0xff] %v2704_v18 }
 0x4e3   : > { %v2655_v14 = vpop.f32.mrf.mxu1 }
 0x4e4   : > { %v2656_v48 = vadd.f32 %v4525_v49, %v2655_v14 }
 0x4e6   : > { %v2689_v4 = vadd.f32 %v2673_v31, %v2656_v48 }
 0x4e8   : > { %v2705_v6 = vmax.f32 %v2689_v4, 0.0 }
 0x4ea   : > { %2721 = vst [vmem:[%s3797_s23 + $0x78] sm:$0xff] %v2705_v6 }
 0x4eb   : > { %3380 = shalt.err (!%p3377_p9)
}
 0x4ec   : > { %s3471_s10 = smov 128   ;;  %s3472_s23 = smov 8  }
 0x4ed   : > { %3149 = dma.vmem_to_hbm [thread:$0]  (%p3606_p3), %s2738_s9, 2048, %s2740_s27, %s2723_s30, %s3471_s10, %s3471_s10, %s3472_s23  }
 0x4ee PF: > { %s4695_s20 = sld [smem:[#allocation23_spill]]  ;;  %p3166_p2 = scmp.ge.s32.totalorder %s3459_s12, 2 }
 0x4f0   : > { %p3160_p1 = pnand %p3166_p2, %p3577_p6 }
 0x4f2   : > { %p3161_p4 = pneg %p3160_p1 }
 0x4f4   : > { %s2754_s16 = sand.u32 1, %s4695_s20  }
 0x4f5   : > { %s2755_s25 = scalar_lea.sflag [#allocation8], %s2754_s16 }
 0x4f6   : > { %3426 = dma.done.wait (%p3161_p4), %s2755_s25, 2048  }
 0x4f7   : > { %3428 = vsyncadd (%p3161_p4), %s2755_s25, 4294965248  ;;  %s25_s12 = sadd.s32 1, %s3459_s12   ;;  %s4697_s30 = sld [smem:[#allocation24_spill]] }
 0x4f8   : > { %p22_p8 = scmp.ge.s32.totalorder %s25_s12, 6   ;;  %s4698_s9 = sld [smem:[#allocation25_spill]] }
 0x4f9   : > { %s4699_s10 = sld [smem:[#allocation27_spill]]  ;;  %s4701_s27 = smov %s3435_s28 }
 0x4fa   : > { %s4700_s11 = sld [smem:[#allocation29_spill]]  ;;  %s4702_s28 = smov %s3439_s29 }
 0x4fb   : > { %s4703_s29 = smov %s3624_s7  ;;  %24 = sbr.rel (!%p22_p8) target bundleno = 13 (0xd), region = 134 }
 0x500   :  { %2761 = vsyncpa [#allocation7], 1 }
 0x501   :  { %2763 = vsyncpa [#allocation7 + $0x1], 1 }
 0x502   :  { %2764 = vsyncpa [#allocation10], 1 }
 0x503   :  { %2765 = vsyncpa [#allocation8], 1 }
 0x504   :  { %2767 = vsyncpa [#allocation8 + $0x1], 1 }
 0x505   :  { %2768 = vsyncmov [#allocation5] }
 0x508   :  { %s2769_s26 = vpop.sfrf %2768 }
 0x509   :  { %p3083_p6 = scmp.ne.s32.totalorder %s2769_s26, 0 }
 0x50b   :  { %2773 = shalt.err (%p3083_p6)  }
 0x50c   :  { %2775 = vsyncmov [#allocation5 + $0x1] }
 0x50f   :  { %s2776_s7 = vpop.sfrf %2775 }
 0x510   :  { %p3084_p3 = scmp.ne.s32.totalorder %s2776_s7, 0 }
 0x512   :  { %2780 = shalt.err (%p3084_p3)  }

</bundles_post_ra>
